<compile_context>
chip_gen: v7x
topology: tpu7x:2x2x1
jax: 0.10.0
libtpu: 0.0.40
codegen_flags: <defaults>
</compile_context>

<pallas_src>
import jax
import jax.numpy as jnp
from jax.experimental import pallas as pl
from jax.experimental.pallas import tpu as pltpu

EMB = 25      # GloVe twitter dim=25
HID = 64      # hidden_size (forced by the gather/Linear shapes)
FC1 = 64
NCLS = 3
NEG_SLOPE = 0.01  # torch.nn.LeakyReLU default negative_slope


# ----------------------------- Fused Pallas kernel --------------------------

def _fused_kernel(x_ref, len_ref, wih_ref, whh_ref, b_ref,
                  w1_ref, b1_ref, w2_ref, b2_ref, out_ref, xw_ref):
    """x_ref: (Bp*T, E) batch-major rows (row = b*T + t); everything in VMEM.

    Gate columns of wih/whh/b are pre-permuted to (i, f, o, g) so the three
    sigmoid gates form one contiguous lane block.
    """
    Bp = len_ref.shape[0]
    H = whh_ref.shape[0]
    T = x_ref.shape[0] // Bp

    # ---- Phase 1: hoisted input projection (one MXU-friendly matmul) -------
    xw = (jnp.dot(x_ref[...], wih_ref[...],
                  preferred_element_type=jnp.float32)
          + b_ref[...])                                   # (Bp*T, 4H)
    xw_ref[...] = xw.reshape(Bp, T, 4 * H)                # free leading-dim split

    # ---- Phase 2: LSTM recurrence (fully unrolled; T is small & static) ----
    lens_v = len_ref[...]                                 # (Bp, 1) int32, one load
    whh = whh_ref[...]                                    # (H, 4H), one load

    h = jnp.zeros((Bp, H), jnp.float32)
    c = jnp.zeros((Bp, H), jnp.float32)
    for t in range(T):                                    # static unroll (tiny T)
        # All batch rows of step t: static middle-dim index into the slab
        # (no host-side time-major transpose needed).
        gates = (xw_ref[:, t, :]
                 + jnp.dot(h, whh, preferred_element_type=jnp.float32))
        sig = jax.nn.sigmoid(gates[:, :3 * H])            # i | f | o contiguous
        g_g = jnp.tanh(gates[:, 3 * H:])
        i_g = sig[:, 0 * H:1 * H]
        f_g = sig[:, 1 * H:2 * H]
        o_g = sig[:, 2 * H:3 * H]
        c_new = f_g * c + i_g * g_g
        h_new = o_g * jnp.tanh(c_new)
        # pack_padded_sequence semantics: state only advances while t < len,
        # so at loop end h == h[len-1] (the torch.gather "slicer" result).
        valid = lens_v > t                                # (Bp, 1) bool
        h = jnp.where(valid, h_new, h)
        c = jnp.where(valid, c_new, c)

    # ---- Phase 3: head  Linear -> LeakyReLU -> Linear -> Softmax(dim=1) ----
    y1 = jnp.dot(h, w1_ref[...], preferred_element_type=jnp.float32) + b1_ref[...]
    y2 = jnp.where(y1 > 0, y1, NEG_SLOPE * y1)
    y3 = jnp.dot(y2, w2_ref[...], preferred_element_type=jnp.float32) + b2_ref[...]
    y3 = y3 - jnp.max(y3, axis=1, keepdims=True)
    e = jnp.exp(y3)
    out_ref[...] = e / jnp.sum(e, axis=1, keepdims=True)  # exact normalization


# ------------------------------ Wrapper --------------------------------------

def sentiment_classifier_forward(x, x_len, kparams):
    """x: (B, T, EMB) float32 (already GloVe-embedded), x_len: (B,) int.

    `kparams` must come from prepare_params() (gate columns in i,f,o,g order).
    """
    B, T, E = x.shape
    Bp = ((B + 7) // 8) * 8                       # pad batch to a sublane multiple

    # Batch-major throughout: pad the batch axis only, then a contiguous
    # (free) reshape to row = b*T + t.  No transpose, no extra HBM pass of x.
    xp = jnp.pad(x.astype(jnp.float32), ((0, Bp - B), (0, 0), (0, 0)))   # (Bp,T,E)
    x2d = xp.reshape(Bp * T, E)
    lens = jnp.pad(x_len.astype(jnp.int32), (0, Bp - B)).reshape(Bp, 1)

    probs = pl.pallas_call(
        _fused_kernel,
        out_shape=jax.ShapeDtypeStruct((Bp, NCLS), jnp.float32),
        scratch_shapes=[pltpu.VMEM((Bp, T, 4 * HID), jnp.float32)],  # xW slab
    )(x2d, lens,
      kparams["w_ih"], kparams["w_hh"], kparams["b_lstm"],
      kparams["w1"], kparams["b1"], kparams["w2"], kparams["b2"])

    return probs[:B]


# --------------------------- Parameter init / prep ---------------------------

def init_params(key):
    """Deterministic synthetic params matching the PyTorch module's shapes.

    Stored transposed ((in, 4H) / (in, out)); gate order is PyTorch's i,f,g,o.
    """
    ks = jax.random.split(key, 8)
    k_lstm = 1.0 / jnp.sqrt(HID)
    k_fc1 = 1.0 / jnp.sqrt(HID)
    k_fc2 = 1.0 / jnp.sqrt(FC1)
    u = lambda k, shape, lim: jax.random.uniform(k, shape, jnp.float32, -lim, lim)
    return {
        "w_ih": u(ks[0], (EMB, 4 * HID), k_lstm),
        "w_hh": u(ks[1], (HID, 4 * HID), k_lstm),
        "b_lstm": u(ks[2], (1, 4 * HID), k_lstm) + u(ks[3], (1, 4 * HID), k_lstm),
        "w1": u(ks[4], (HID, FC1), k_fc1),
        "b1": u(ks[5], (1, FC1), k_fc1),
        "w2": u(ks[6], (FC1, NCLS), k_fc2),
        "b2": u(ks[7], (1, NCLS), k_fc2),
    }


def _permute_gate_cols(w):
    """Reorder gate column blocks from PyTorch (i,f,g,o) to kernel (i,f,o,g)."""
    i, f, g, o = jnp.split(w, 4, axis=1)
    return jnp.concatenate([i, f, o, g], axis=1)


def prepare_params(params):
    """One-time (model-load-time) layout prep for the kernel: permute gate
    columns so the three sigmoid gates are one contiguous lane block."""
    return {
        "w_ih": _permute_gate_cols(params["w_ih"]),
        "w_hh": _permute_gate_cols(params["w_hh"]),
        "b_lstm": _permute_gate_cols(params["b_lstm"]),
        "w1": params["w1"], "b1": params["b1"],
        "w2": params["w2"], "b2": params["b2"],
    }


# --------------------------- Pure-JAX reference -------------------------------

def reference_forward(x, x_len, params):
    """Reference uses the canonical (PyTorch i,f,g,o) parameters."""
    B, T, E = x.shape
    H = HID

    def step(carry, inp):
        h, c = carry
        x_t, t = inp
        gates = x_t @ params["w_ih"] + h @ params["w_hh"] + params["b_lstm"][0]
        i = jax.nn.sigmoid(gates[:, :H])
        f = jax.nn.sigmoid(gates[:, H:2 * H])
        g = jnp.tanh(gates[:, 2 * H:3 * H])
        o = jax.nn.sigmoid(gates[:, 3 * H:])
        c_new = f * c + i * g
        h_new = o * jnp.tanh(c_new)
        valid = (t < x_len)[:, None]
        return (jnp.where(valid, h_new, h), jnp.where(valid, c_new, c)), h_new

    (_, _), hs = jax.lax.scan(
        step,
        (jnp.zeros((B, H), jnp.float32), jnp.zeros((B, H), jnp.float32)),
        (jnp.transpose(x, (1, 0, 2)), jnp.arange(T)))
    last = hs[x_len - 1, jnp.arange(B)]                    # h at t = len-1
    y1 = last @ params["w1"] + params["b1"][0]
    y2 = jnp.where(y1 > 0, y1, NEG_SLOPE * y1)
    y3 = y2 @ params["w2"] + params["b2"][0]
    return jax.nn.softmax(y3, axis=1)


# ------------------------------- Main -----------------------------------------

if __name__ == "__main__":
    # TODO(synk): the GloVe embedding table itself is never used in forward()
    # (inputs arrive pre-embedded), so it is not materialized here.
    key = jax.random.PRNGKey(0)
    k_p, k_x = jax.random.split(key)

    B, T = 2, 8
    params = init_params(k_p)
    kparams = prepare_params(params)                        # one-time gate permute
    x = jax.random.normal(k_x, (B, T, EMB), jnp.float32)    # pre-embedded sequences
    x_len = jnp.array([8, 5], dtype=jnp.int32)              # variable lengths

    probs = jax.block_until_ready(sentiment_classifier_forward(x, x_len, kparams))
    ref = jax.block_until_ready(reference_forward(x, x_len, params))

    assert probs.shape == (B, NCLS)
    assert bool(jnp.all(jnp.isfinite(probs)))
    assert bool(jnp.allclose(jnp.sum(probs, axis=1), 1.0, atol=1e-3))
    assert bool(jnp.allclose(probs, ref, atol=2e-2)), (probs, ref)
    print("KERNEL_OK")
</pallas_src>

<mosaic_0001>
module attributes {stable_mosaic.version = 11 : i64} {
  func.func @_fused_kernel(%arg0: memref<64x25xf32, #tpu.memory_space<vmem>>, %arg1: memref<8x1xi32, #tpu.memory_space<vmem>>, %arg2: memref<25x256xf32, #tpu.memory_space<vmem>>, %arg3: memref<64x256xf32, #tpu.memory_space<vmem>>, %arg4: memref<1x256xf32, #tpu.memory_space<vmem>>, %arg5: memref<64x64xf32, #tpu.memory_space<vmem>>, %arg6: memref<1x64xf32, #tpu.memory_space<vmem>>, %arg7: memref<64x3xf32, #tpu.memory_space<vmem>>, %arg8: memref<1x3xf32, #tpu.memory_space<vmem>>, %arg9: memref<8x3xf32, #tpu.memory_space<vmem>>, %arg10: memref<8x8x256xf32, #tpu.memory_space<vmem>>) attributes {dimension_semantics = [], scalar_prefetch = 0 : i64, scratch_operands = 1 : i64, tpu.core_type = #tpu.core_type<tc>} {
    %c0 = arith.constant 0 : index
    %c0_0 = arith.constant 0 : index
    %0 = vector.load %arg0[%c0, %c0_0] : memref<64x25xf32, #tpu.memory_space<vmem>>, vector<64x25xf32>
    %c0_1 = arith.constant 0 : index
    %c0_2 = arith.constant 0 : index
    %1 = vector.load %arg2[%c0_1, %c0_2] : memref<25x256xf32, #tpu.memory_space<vmem>>, vector<25x256xf32>
    %cst = arith.constant dense<0.000000e+00> : vector<64x256xf32>
    %2 = tpu.matmul %0, %1, %cst {dimension_numbers = #tpu.dot_dimension_numbers<[1], [0], [0], [1], [0, 0, 1, 1], [], []>} : vector<64x25xf32>, vector<25x256xf32>, vector<64x256xf32> -> vector<64x256xf32>
    %c0_3 = arith.constant 0 : index
    %c0_4 = arith.constant 0 : index
    %3 = vector.load %arg4[%c0_3, %c0_4] : memref<1x256xf32, #tpu.memory_space<vmem>>, vector<1x256xf32>
    %4 = vector.broadcast %3 : vector<1x256xf32> to vector<64x256xf32>
    %5 = arith.addf %2, %4 : vector<64x256xf32>
    %6 = vector.shape_cast %5 : vector<64x256xf32> to vector<8x8x256xf32>
    %c0_5 = arith.constant 0 : index
    %c0_6 = arith.constant 0 : index
    %c0_7 = arith.constant 0 : index
    %7 = vector.load %arg10[%c0_5, %c0_6, %c0_7] : memref<8x8x256xf32, #tpu.memory_space<vmem>>, vector<8x8x256xf32>
    tpu.vector_store %arg10[%c0_5, %c0_6, %c0_7], %6 {strides = array<i32>} : memref<8x8x256xf32, #tpu.memory_space<vmem>>, vector<8x8x256xf32>,
    %c0_8 = arith.constant 0 : index
    %c0_9 = arith.constant 0 : index
    %8 = vector.load %arg1[%c0_8, %c0_9] : memref<8x1xi32, #tpu.memory_space<vmem>>, vector<8x1xi32>
    %c0_10 = arith.constant 0 : index
    %c0_11 = arith.constant 0 : index
    %9 = vector.load %arg3[%c0_10, %c0_11] : memref<64x256xf32, #tpu.memory_space<vmem>>, vector<64x256xf32>
    %cst_12 = arith.constant 0.000000e+00 : f32
    %10 = vector.broadcast %cst_12 : f32 to vector<8x64xf32>
    %cst_13 = arith.constant 0.000000e+00 : f32
    %11 = vector.broadcast %cst_13 : f32 to vector<8x64xf32>
    %c0_14 = arith.constant 0 : index
    %c0_15 = arith.constant 0 : index
    %c0_16 = arith.constant 0 : index
    %12 = vector.load %arg10[%c0_14, %c0_15, %c0_16] : memref<8x8x256xf32, #tpu.memory_space<vmem>>, vector<8x1x256xf32>
    %13 = vector.shape_cast %12 : vector<8x1x256xf32> to vector<8x256xf32>
    %cst_17 = arith.constant dense<0.000000e+00> : vector<8x256xf32>
    %14 = tpu.matmul %10, %9, %cst_17 {dimension_numbers = #tpu.dot_dimension_numbers<[1], [0], [0], [1], [0, 0, 1, 1], [], []>} : vector<8x64xf32>, vector<64x256xf32>, vector<8x256xf32> -> vector<8x256xf32>
    %15 = arith.addf %13, %14 : vector<8x256xf32>
    %16 = vector.extract_strided_slice %15 {offsets = [0, 0], sizes = [8, 192], strides = [1, 1]} : vector<8x256xf32> to vector<8x192xf32>
    %17 = arith.negf %16 : vector<8x192xf32>
    %18 = math.exp %17 : vector<8x192xf32>
    %cst_18 = arith.constant 1.000000e+00 : f32
    %19 = vector.broadcast %cst_18 : f32 to vector<8x192xf32>
    %20 = arith.addf %19, %18 : vector<8x192xf32>
    %21 = arith.divf %19, %20 : vector<8x192xf32>
    %22 = vector.extract_strided_slice %15 {offsets = [0, 192], sizes = [8, 64], strides = [1, 1]} : vector<8x256xf32> to vector<8x64xf32>
    %23 = math.tanh %22 : vector<8x64xf32>
    %24 = vector.extract_strided_slice %21 {offsets = [0, 0], sizes = [8, 64], strides = [1, 1]} : vector<8x192xf32> to vector<8x64xf32>
    %25 = vector.extract_strided_slice %21 {offsets = [0, 64], sizes = [8, 64], strides = [1, 1]} : vector<8x192xf32> to vector<8x64xf32>
    %26 = vector.extract_strided_slice %21 {offsets = [0, 128], sizes = [8, 64], strides = [1, 1]} : vector<8x192xf32> to vector<8x64xf32>
    %27 = arith.mulf %25, %11 : vector<8x64xf32>
    %28 = arith.mulf %24, %23 : vector<8x64xf32>
    %29 = arith.addf %27, %28 : vector<8x64xf32>
    %30 = math.tanh %29 : vector<8x64xf32>
    %31 = arith.mulf %26, %30 : vector<8x64xf32>
    %c0_i32 = arith.constant 0 : i32
    %32 = vector.broadcast %c0_i32 : i32 to vector<8x1xi32>
    %33 = arith.cmpi sgt, %8, %32 : vector<8x1xi32>
    %34 = vector.shape_cast %33 : vector<8x1xi1> to vector<8x1xi1>
    %35 = vector.broadcast %34 : vector<8x1xi1> to vector<8x64xi1>
    %36 = arith.select %35, %31, %10 : vector<8x64xi1>, vector<8x64xf32>
    %37 = vector.shape_cast %33 : vector<8x1xi1> to vector<8x1xi1>
    %38 = vector.broadcast %37 : vector<8x1xi1> to vector<8x64xi1>
    %39 = arith.select %38, %29, %11 : vector<8x64xi1>, vector<8x64xf32>
    %c0_19 = arith.constant 0 : index
    %c1 = arith.constant 1 : index
    %c0_20 = arith.constant 0 : index
    %40 = vector.load %arg10[%c0_19, %c1, %c0_20] : memref<8x8x256xf32, #tpu.memory_space<vmem>>, vector<8x1x256xf32>
    %41 = vector.shape_cast %40 : vector<8x1x256xf32> to vector<8x256xf32>
    %cst_21 = arith.constant dense<0.000000e+00> : vector<8x256xf32>
    %42 = tpu.matmul %36, %9, %cst_21 {dimension_numbers = #tpu.dot_dimension_numbers<[1], [0], [0], [1], [0, 0, 1, 1], [], []>} : vector<8x64xf32>, vector<64x256xf32>, vector<8x256xf32> -> vector<8x256xf32>
    %43 = arith.addf %41, %42 : vector<8x256xf32>
    %44 = vector.extract_strided_slice %43 {offsets = [0, 0], sizes = [8, 192], strides = [1, 1]} : vector<8x256xf32> to vector<8x192xf32>
    %45 = arith.negf %44 : vector<8x192xf32>
    %46 = math.exp %45 : vector<8x192xf32>
    %cst_22 = arith.constant 1.000000e+00 : f32
    %47 = vector.broadcast %cst_22 : f32 to vector<8x192xf32>
    %48 = arith.addf %47, %46 : vector<8x192xf32>
    %49 = arith.divf %47, %48 : vector<8x192xf32>
    %50 = vector.extract_strided_slice %43 {offsets = [0, 192], sizes = [8, 64], strides = [1, 1]} : vector<8x256xf32> to vector<8x64xf32>
    %51 = math.tanh %50 : vector<8x64xf32>
    %52 = vector.extract_strided_slice %49 {offsets = [0, 0], sizes = [8, 64], strides = [1, 1]} : vector<8x192xf32> to vector<8x64xf32>
    %53 = vector.extract_strided_slice %49 {offsets = [0, 64], sizes = [8, 64], strides = [1, 1]} : vector<8x192xf32> to vector<8x64xf32>
    %54 = vector.extract_strided_slice %49 {offsets = [0, 128], sizes = [8, 64], strides = [1, 1]} : vector<8x192xf32> to vector<8x64xf32>
    %55 = arith.mulf %53, %39 : vector<8x64xf32>
    %56 = arith.mulf %52, %51 : vector<8x64xf32>
    %57 = arith.addf %55, %56 : vector<8x64xf32>
    %58 = math.tanh %57 : vector<8x64xf32>
    %59 = arith.mulf %54, %58 : vector<8x64xf32>
    %c1_i32 = arith.constant 1 : i32
    %60 = vector.broadcast %c1_i32 : i32 to vector<8x1xi32>
    %61 = arith.cmpi sgt, %8, %60 : vector<8x1xi32>
    %62 = vector.shape_cast %61 : vector<8x1xi1> to vector<8x1xi1>
    %63 = vector.broadcast %62 : vector<8x1xi1> to vector<8x64xi1>
    %64 = arith.select %63, %59, %36 : vector<8x64xi1>, vector<8x64xf32>
    %65 = vector.shape_cast %61 : vector<8x1xi1> to vector<8x1xi1>
    %66 = vector.broadcast %65 : vector<8x1xi1> to vector<8x64xi1>
    %67 = arith.select %66, %57, %39 : vector<8x64xi1>, vector<8x64xf32>
    %c0_23 = arith.constant 0 : index
    %c2 = arith.constant 2 : index
    %c0_24 = arith.constant 0 : index
    %68 = vector.load %arg10[%c0_23, %c2, %c0_24] : memref<8x8x256xf32, #tpu.memory_space<vmem>>, vector<8x1x256xf32>
    %69 = vector.shape_cast %68 : vector<8x1x256xf32> to vector<8x256xf32>
    %cst_25 = arith.constant dense<0.000000e+00> : vector<8x256xf32>
    %70 = tpu.matmul %64, %9, %cst_25 {dimension_numbers = #tpu.dot_dimension_numbers<[1], [0], [0], [1], [0, 0, 1, 1], [], []>} : vector<8x64xf32>, vector<64x256xf32>, vector<8x256xf32> -> vector<8x256xf32>
    %71 = arith.addf %69, %70 : vector<8x256xf32>
    %72 = vector.extract_strided_slice %71 {offsets = [0, 0], sizes = [8, 192], strides = [1, 1]} : vector<8x256xf32> to vector<8x192xf32>
    %73 = arith.negf %72 : vector<8x192xf32>
    %74 = math.exp %73 : vector<8x192xf32>
    %cst_26 = arith.constant 1.000000e+00 : f32
    %75 = vector.broadcast %cst_26 : f32 to vector<8x192xf32>
    %76 = arith.addf %75, %74 : vector<8x192xf32>
    %77 = arith.divf %75, %76 : vector<8x192xf32>
    %78 = vector.extract_strided_slice %71 {offsets = [0, 192], sizes = [8, 64], strides = [1, 1]} : vector<8x256xf32> to vector<8x64xf32>
    %79 = math.tanh %78 : vector<8x64xf32>
    %80 = vector.extract_strided_slice %77 {offsets = [0, 0], sizes = [8, 64], strides = [1, 1]} : vector<8x192xf32> to vector<8x64xf32>
    %81 = vector.extract_strided_slice %77 {offsets = [0, 64], sizes = [8, 64], strides = [1, 1]} : vector<8x192xf32> to vector<8x64xf32>
    %82 = vector.extract_strided_slice %77 {offsets = [0, 128], sizes = [8, 64], strides = [1, 1]} : vector<8x192xf32> to vector<8x64xf32>
    %83 = arith.mulf %81, %67 : vector<8x64xf32>
    %84 = arith.mulf %80, %79 : vector<8x64xf32>
    %85 = arith.addf %83, %84 : vector<8x64xf32>
    %86 = math.tanh %85 : vector<8x64xf32>
    %87 = arith.mulf %82, %86 : vector<8x64xf32>
    %c2_i32 = arith.constant 2 : i32
    %88 = vector.broadcast %c2_i32 : i32 to vector<8x1xi32>
    %89 = arith.cmpi sgt, %8, %88 : vector<8x1xi32>
    %90 = vector.shape_cast %89 : vector<8x1xi1> to vector<8x1xi1>
    %91 = vector.broadcast %90 : vector<8x1xi1> to vector<8x64xi1>
    %92 = arith.select %91, %87, %64 : vector<8x64xi1>, vector<8x64xf32>
    %93 = vector.shape_cast %89 : vector<8x1xi1> to vector<8x1xi1>
    %94 = vector.broadcast %93 : vector<8x1xi1> to vector<8x64xi1>
    %95 = arith.select %94, %85, %67 : vector<8x64xi1>, vector<8x64xf32>
    %c0_27 = arith.constant 0 : index
    %c3 = arith.constant 3 : index
    %c0_28 = arith.constant 0 : index
    %96 = vector.load %arg10[%c0_27, %c3, %c0_28] : memref<8x8x256xf32, #tpu.memory_space<vmem>>, vector<8x1x256xf32>
    %97 = vector.shape_cast %96 : vector<8x1x256xf32> to vector<8x256xf32>
    %cst_29 = arith.constant dense<0.000000e+00> : vector<8x256xf32>
    %98 = tpu.matmul %92, %9, %cst_29 {dimension_numbers = #tpu.dot_dimension_numbers<[1], [0], [0], [1], [0, 0, 1, 1], [], []>} : vector<8x64xf32>, vector<64x256xf32>, vector<8x256xf32> -> vector<8x256xf32>
    %99 = arith.addf %97, %98 : vector<8x256xf32>
    %100 = vector.extract_strided_slice %99 {offsets = [0, 0], sizes = [8, 192], strides = [1, 1]} : vector<8x256xf32> to vector<8x192xf32>
    %101 = arith.negf %100 : vector<8x192xf32>
    %102 = math.exp %101 : vector<8x192xf32>
    %cst_30 = arith.constant 1.000000e+00 : f32
    %103 = vector.broadcast %cst_30 : f32 to vector<8x192xf32>
    %104 = arith.addf %103, %102 : vector<8x192xf32>
    %105 = arith.divf %103, %104 : vector<8x192xf32>
    %106 = vector.extract_strided_slice %99 {offsets = [0, 192], sizes = [8, 64], strides = [1, 1]} : vector<8x256xf32> to vector<8x64xf32>
    %107 = math.tanh %106 : vector<8x64xf32>
    %108 = vector.extract_strided_slice %105 {offsets = [0, 0], sizes = [8, 64], strides = [1, 1]} : vector<8x192xf32> to vector<8x64xf32>
    %109 = vector.extract_strided_slice %105 {offsets = [0, 64], sizes = [8, 64], strides = [1, 1]} : vector<8x192xf32> to vector<8x64xf32>
    %110 = vector.extract_strided_slice %105 {offsets = [0, 128], sizes = [8, 64], strides = [1, 1]} : vector<8x192xf32> to vector<8x64xf32>
    %111 = arith.mulf %109, %95 : vector<8x64xf32>
    %112 = arith.mulf %108, %107 : vector<8x64xf32>
    %113 = arith.addf %111, %112 : vector<8x64xf32>
    %114 = math.tanh %113 : vector<8x64xf32>
    %115 = arith.mulf %110, %114 : vector<8x64xf32>
    %c3_i32 = arith.constant 3 : i32
    %116 = vector.broadcast %c3_i32 : i32 to vector<8x1xi32>
    %117 = arith.cmpi sgt, %8, %116 : vector<8x1xi32>
    %118 = vector.shape_cast %117 : vector<8x1xi1> to vector<8x1xi1>
    %119 = vector.broadcast %118 : vector<8x1xi1> to vector<8x64xi1>
    %120 = arith.select %119, %115, %92 : vector<8x64xi1>, vector<8x64xf32>
    %121 = vector.shape_cast %117 : vector<8x1xi1> to vector<8x1xi1>
    %122 = vector.broadcast %121 : vector<8x1xi1> to vector<8x64xi1>
    %123 = arith.select %122, %113, %95 : vector<8x64xi1>, vector<8x64xf32>
    %c0_31 = arith.constant 0 : index
    %c4 = arith.constant 4 : index
    %c0_32 = arith.constant 0 : index
    %124 = vector.load %arg10[%c0_31, %c4, %c0_32] : memref<8x8x256xf32, #tpu.memory_space<vmem>>, vector<8x1x256xf32>
    %125 = vector.shape_cast %124 : vector<8x1x256xf32> to vector<8x256xf32>
    %cst_33 = arith.constant dense<0.000000e+00> : vector<8x256xf32>
    %126 = tpu.matmul %120, %9, %cst_33 {dimension_numbers = #tpu.dot_dimension_numbers<[1], [0], [0], [1], [0, 0, 1, 1], [], []>} : vector<8x64xf32>, vector<64x256xf32>, vector<8x256xf32> -> vector<8x256xf32>
    %127 = arith.addf %125, %126 : vector<8x256xf32>
    %128 = vector.extract_strided_slice %127 {offsets = [0, 0], sizes = [8, 192], strides = [1, 1]} : vector<8x256xf32> to vector<8x192xf32>
    %129 = arith.negf %128 : vector<8x192xf32>
    %130 = math.exp %129 : vector<8x192xf32>
    %cst_34 = arith.constant 1.000000e+00 : f32
    %131 = vector.broadcast %cst_34 : f32 to vector<8x192xf32>
    %132 = arith.addf %131, %130 : vector<8x192xf32>
    %133 = arith.divf %131, %132 : vector<8x192xf32>
    %134 = vector.extract_strided_slice %127 {offsets = [0, 192], sizes = [8, 64], strides = [1, 1]} : vector<8x256xf32> to vector<8x64xf32>
    %135 = math.tanh %134 : vector<8x64xf32>
    %136 = vector.extract_strided_slice %133 {offsets = [0, 0], sizes = [8, 64], strides = [1, 1]} : vector<8x192xf32> to vector<8x64xf32>
    %137 = vector.extract_strided_slice %133 {offsets = [0, 64], sizes = [8, 64], strides = [1, 1]} : vector<8x192xf32> to vector<8x64xf32>
    %138 = vector.extract_strided_slice %133 {offsets = [0, 128], sizes = [8, 64], strides = [1, 1]} : vector<8x192xf32> to vector<8x64xf32>
    %139 = arith.mulf %137, %123 : vector<8x64xf32>
    %140 = arith.mulf %136, %135 : vector<8x64xf32>
    %141 = arith.addf %139, %140 : vector<8x64xf32>
    %142 = math.tanh %141 : vector<8x64xf32>
    %143 = arith.mulf %138, %142 : vector<8x64xf32>
    %c4_i32 = arith.constant 4 : i32
    %144 = vector.broadcast %c4_i32 : i32 to vector<8x1xi32>
    %145 = arith.cmpi sgt, %8, %144 : vector<8x1xi32>
    %146 = vector.shape_cast %145 : vector<8x1xi1> to vector<8x1xi1>
    %147 = vector.broadcast %146 : vector<8x1xi1> to vector<8x64xi1>
    %148 = arith.select %147, %143, %120 : vector<8x64xi1>, vector<8x64xf32>
    %149 = vector.shape_cast %145 : vector<8x1xi1> to vector<8x1xi1>
    %150 = vector.broadcast %149 : vector<8x1xi1> to vector<8x64xi1>
    %151 = arith.select %150, %141, %123 : vector<8x64xi1>, vector<8x64xf32>
    %c0_35 = arith.constant 0 : index
    %c5 = arith.constant 5 : index
    %c0_36 = arith.constant 0 : index
    %152 = vector.load %arg10[%c0_35, %c5, %c0_36] : memref<8x8x256xf32, #tpu.memory_space<vmem>>, vector<8x1x256xf32>
    %153 = vector.shape_cast %152 : vector<8x1x256xf32> to vector<8x256xf32>
    %cst_37 = arith.constant dense<0.000000e+00> : vector<8x256xf32>
    %154 = tpu.matmul %148, %9, %cst_37 {dimension_numbers = #tpu.dot_dimension_numbers<[1], [0], [0], [1], [0, 0, 1, 1], [], []>} : vector<8x64xf32>, vector<64x256xf32>, vector<8x256xf32> -> vector<8x256xf32>
    %155 = arith.addf %153, %154 : vector<8x256xf32>
    %156 = vector.extract_strided_slice %155 {offsets = [0, 0], sizes = [8, 192], strides = [1, 1]} : vector<8x256xf32> to vector<8x192xf32>
    %157 = arith.negf %156 : vector<8x192xf32>
    %158 = math.exp %157 : vector<8x192xf32>
    %cst_38 = arith.constant 1.000000e+00 : f32
    %159 = vector.broadcast %cst_38 : f32 to vector<8x192xf32>
    %160 = arith.addf %159, %158 : vector<8x192xf32>
    %161 = arith.divf %159, %160 : vector<8x192xf32>
    %162 = vector.extract_strided_slice %155 {offsets = [0, 192], sizes = [8, 64], strides = [1, 1]} : vector<8x256xf32> to vector<8x64xf32>
    %163 = math.tanh %162 : vector<8x64xf32>
    %164 = vector.extract_strided_slice %161 {offsets = [0, 0], sizes = [8, 64], strides = [1, 1]} : vector<8x192xf32> to vector<8x64xf32>
    %165 = vector.extract_strided_slice %161 {offsets = [0, 64], sizes = [8, 64], strides = [1, 1]} : vector<8x192xf32> to vector<8x64xf32>
    %166 = vector.extract_strided_slice %161 {offsets = [0, 128], sizes = [8, 64], strides = [1, 1]} : vector<8x192xf32> to vector<8x64xf32>
    %167 = arith.mulf %165, %151 : vector<8x64xf32>
    %168 = arith.mulf %164, %163 : vector<8x64xf32>
    %169 = arith.addf %167, %168 : vector<8x64xf32>
    %170 = math.tanh %169 : vector<8x64xf32>
    %171 = arith.mulf %166, %170 : vector<8x64xf32>
    %c5_i32 = arith.constant 5 : i32
    %172 = vector.broadcast %c5_i32 : i32 to vector<8x1xi32>
    %173 = arith.cmpi sgt, %8, %172 : vector<8x1xi32>
    %174 = vector.shape_cast %173 : vector<8x1xi1> to vector<8x1xi1>
    %175 = vector.broadcast %174 : vector<8x1xi1> to vector<8x64xi1>
    %176 = arith.select %175, %171, %148 : vector<8x64xi1>, vector<8x64xf32>
    %177 = vector.shape_cast %173 : vector<8x1xi1> to vector<8x1xi1>
    %178 = vector.broadcast %177 : vector<8x1xi1> to vector<8x64xi1>
    %179 = arith.select %178, %169, %151 : vector<8x64xi1>, vector<8x64xf32>
    %c0_39 = arith.constant 0 : index
    %c6 = arith.constant 6 : index
    %c0_40 = arith.constant 0 : index
    %180 = vector.load %arg10[%c0_39, %c6, %c0_40] : memref<8x8x256xf32, #tpu.memory_space<vmem>>, vector<8x1x256xf32>
    %181 = vector.shape_cast %180 : vector<8x1x256xf32> to vector<8x256xf32>
    %cst_41 = arith.constant dense<0.000000e+00> : vector<8x256xf32>
    %182 = tpu.matmul %176, %9, %cst_41 {dimension_numbers = #tpu.dot_dimension_numbers<[1], [0], [0], [1], [0, 0, 1, 1], [], []>} : vector<8x64xf32>, vector<64x256xf32>, vector<8x256xf32> -> vector<8x256xf32>
    %183 = arith.addf %181, %182 : vector<8x256xf32>
    %184 = vector.extract_strided_slice %183 {offsets = [0, 0], sizes = [8, 192], strides = [1, 1]} : vector<8x256xf32> to vector<8x192xf32>
    %185 = arith.negf %184 : vector<8x192xf32>
    %186 = math.exp %185 : vector<8x192xf32>
    %cst_42 = arith.constant 1.000000e+00 : f32
    %187 = vector.broadcast %cst_42 : f32 to vector<8x192xf32>
    %188 = arith.addf %187, %186 : vector<8x192xf32>
    %189 = arith.divf %187, %188 : vector<8x192xf32>
    %190 = vector.extract_strided_slice %183 {offsets = [0, 192], sizes = [8, 64], strides = [1, 1]} : vector<8x256xf32> to vector<8x64xf32>
    %191 = math.tanh %190 : vector<8x64xf32>
    %192 = vector.extract_strided_slice %189 {offsets = [0, 0], sizes = [8, 64], strides = [1, 1]} : vector<8x192xf32> to vector<8x64xf32>
    %193 = vector.extract_strided_slice %189 {offsets = [0, 64], sizes = [8, 64], strides = [1, 1]} : vector<8x192xf32> to vector<8x64xf32>
    %194 = vector.extract_strided_slice %189 {offsets = [0, 128], sizes = [8, 64], strides = [1, 1]} : vector<8x192xf32> to vector<8x64xf32>
    %195 = arith.mulf %193, %179 : vector<8x64xf32>
    %196 = arith.mulf %192, %191 : vector<8x64xf32>
    %197 = arith.addf %195, %196 : vector<8x64xf32>
    %198 = math.tanh %197 : vector<8x64xf32>
    %199 = arith.mulf %194, %198 : vector<8x64xf32>
    %c6_i32 = arith.constant 6 : i32
    %200 = vector.broadcast %c6_i32 : i32 to vector<8x1xi32>
    %201 = arith.cmpi sgt, %8, %200 : vector<8x1xi32>
    %202 = vector.shape_cast %201 : vector<8x1xi1> to vector<8x1xi1>
    %203 = vector.broadcast %202 : vector<8x1xi1> to vector<8x64xi1>
    %204 = arith.select %203, %199, %176 : vector<8x64xi1>, vector<8x64xf32>
    %205 = vector.shape_cast %201 : vector<8x1xi1> to vector<8x1xi1>
    %206 = vector.broadcast %205 : vector<8x1xi1> to vector<8x64xi1>
    %207 = arith.select %206, %197, %179 : vector<8x64xi1>, vector<8x64xf32>
    %c0_43 = arith.constant 0 : index
    %c7 = arith.constant 7 : index
    %c0_44 = arith.constant 0 : index
    %208 = vector.load %arg10[%c0_43, %c7, %c0_44] : memref<8x8x256xf32, #tpu.memory_space<vmem>>, vector<8x1x256xf32>
    %209 = vector.shape_cast %208 : vector<8x1x256xf32> to vector<8x256xf32>
    %cst_45 = arith.constant dense<0.000000e+00> : vector<8x256xf32>
    %210 = tpu.matmul %204, %9, %cst_45 {dimension_numbers = #tpu.dot_dimension_numbers<[1], [0], [0], [1], [0, 0, 1, 1], [], []>} : vector<8x64xf32>, vector<64x256xf32>, vector<8x256xf32> -> vector<8x256xf32>
    %211 = arith.addf %209, %210 : vector<8x256xf32>
    %212 = vector.extract_strided_slice %211 {offsets = [0, 0], sizes = [8, 192], strides = [1, 1]} : vector<8x256xf32> to vector<8x192xf32>
    %213 = arith.negf %212 : vector<8x192xf32>
    %214 = math.exp %213 : vector<8x192xf32>
    %cst_46 = arith.constant 1.000000e+00 : f32
    %215 = vector.broadcast %cst_46 : f32 to vector<8x192xf32>
    %216 = arith.addf %215, %214 : vector<8x192xf32>
    %217 = arith.divf %215, %216 : vector<8x192xf32>
    %218 = vector.extract_strided_slice %211 {offsets = [0, 192], sizes = [8, 64], strides = [1, 1]} : vector<8x256xf32> to vector<8x64xf32>
    %219 = math.tanh %218 : vector<8x64xf32>
    %220 = vector.extract_strided_slice %217 {offsets = [0, 0], sizes = [8, 64], strides = [1, 1]} : vector<8x192xf32> to vector<8x64xf32>
    %221 = vector.extract_strided_slice %217 {offsets = [0, 64], sizes = [8, 64], strides = [1, 1]} : vector<8x192xf32> to vector<8x64xf32>
    %222 = vector.extract_strided_slice %217 {offsets = [0, 128], sizes = [8, 64], strides = [1, 1]} : vector<8x192xf32> to vector<8x64xf32>
    %223 = arith.mulf %221, %207 : vector<8x64xf32>
    %224 = arith.mulf %220, %219 : vector<8x64xf32>
    %225 = arith.addf %223, %224 : vector<8x64xf32>
    %226 = math.tanh %225 : vector<8x64xf32>
    %227 = arith.mulf %222, %226 : vector<8x64xf32>
    %c7_i32 = arith.constant 7 : i32
    %228 = vector.broadcast %c7_i32 : i32 to vector<8x1xi32>
    %229 = arith.cmpi sgt, %8, %228 : vector<8x1xi32>
    %230 = vector.shape_cast %229 : vector<8x1xi1> to vector<8x1xi1>
    %231 = vector.broadcast %230 : vector<8x1xi1> to vector<8x64xi1>
    %232 = arith.select %231, %227, %204 : vector<8x64xi1>, vector<8x64xf32>
    %c0_47 = arith.constant 0 : index
    %c0_48 = arith.constant 0 : index
    %233 = vector.load %arg5[%c0_47, %c0_48] : memref<64x64xf32, #tpu.memory_space<vmem>>, vector<64x64xf32>
    %cst_49 = arith.constant dense<0.000000e+00> : vector<8x64xf32>
    %234 = tpu.matmul %232, %233, %cst_49 {dimension_numbers = #tpu.dot_dimension_numbers<[1], [0], [0], [1], [0, 0, 1, 1], [], []>} : vector<8x64xf32>, vector<64x64xf32>, vector<8x64xf32> -> vector<8x64xf32>
    %c0_50 = arith.constant 0 : index
    %c0_51 = arith.constant 0 : index
    %235 = vector.load %arg6[%c0_50, %c0_51] : memref<1x64xf32, #tpu.memory_space<vmem>>, vector<1x64xf32>
    %236 = vector.broadcast %235 : vector<1x64xf32> to vector<8x64xf32>
    %237 = arith.addf %234, %236 : vector<8x64xf32>
    %cst_52 = arith.constant 0.000000e+00 : f32
    %238 = vector.broadcast %cst_52 : f32 to vector<8x64xf32>
    %239 = arith.cmpf ogt, %237, %238 : vector<8x64xf32>
    %cst_53 = arith.constant 0.00999999977 : f32
    %240 = vector.broadcast %cst_53 : f32 to vector<8x64xf32>
    %241 = arith.mulf %240, %237 : vector<8x64xf32>
    %242 = arith.select %239, %237, %241 : vector<8x64xi1>, vector<8x64xf32>
    %c0_54 = arith.constant 0 : index
    %c0_55 = arith.constant 0 : index
    %243 = vector.load %arg7[%c0_54, %c0_55] : memref<64x3xf32, #tpu.memory_space<vmem>>, vector<64x3xf32>
    %cst_56 = arith.constant dense<0.000000e+00> : vector<8x3xf32>
    %244 = tpu.matmul %242, %243, %cst_56 {dimension_numbers = #tpu.dot_dimension_numbers<[1], [0], [0], [1], [0, 0, 1, 1], [], []>} : vector<8x64xf32>, vector<64x3xf32>, vector<8x3xf32> -> vector<8x3xf32>
    %c0_57 = arith.constant 0 : index
    %c0_58 = arith.constant 0 : index
    %245 = vector.load %arg8[%c0_57, %c0_58] : memref<1x3xf32, #tpu.memory_space<vmem>>, vector<1x3xf32>
    %246 = vector.broadcast %245 : vector<1x3xf32> to vector<8x3xf32>
    %247 = arith.addf %244, %246 : vector<8x3xf32>
    %cst_59 = arith.constant dense<0xFF800000> : vector<8xf32>
    %248 = vector.multi_reduction <maximumf>, %247, %cst_59 [1] : vector<8x3xf32> to vector<8xf32>
    %249 = vector.shape_cast %248 : vector<8xf32> to vector<8x1xf32>
    %250 = vector.broadcast %249 : vector<8x1xf32> to vector<8x3xf32>
    %251 = arith.subf %247, %250 : vector<8x3xf32>
    %252 = math.exp %251 : vector<8x3xf32>
    %cst_60 = arith.constant dense<0.000000e+00> : vector<8xf32>
    %253 = vector.multi_reduction <add>, %252, %cst_60 [1] : vector<8x3xf32> to vector<8xf32>
    %254 = vector.shape_cast %253 : vector<8xf32> to vector<8x1xf32>
    %255 = vector.broadcast %254 : vector<8x1xf32> to vector<8x3xf32>
    %256 = arith.divf %252, %255 : vector<8x3xf32>
    %c0_61 = arith.constant 0 : index
    %c0_62 = arith.constant 0 : index
    %257 = vector.load %arg9[%c0_61, %c0_62] : memref<8x3xf32, #tpu.memory_space<vmem>>, vector<8x3xf32>
    tpu.vector_store %arg9[%c0_61, %c0_62], %256 {strides = array<i32>} : memref<8x3xf32, #tpu.memory_space<vmem>>, vector<8x3xf32>,
    return
  }
}

</mosaic_0001>

<bundles_post_ra>
// kernel: tpu_custom_call.1
= control target key start
LH: loop header
LB: loop body
LE: loop exit
PB: predicated region body
PF: predicated region fallthrough
CT: control target
= control target key end

     0   :  { %14 = vsyncpa [#allocation4], 0  ;;  %s7225_s0 = inlined_call_operand.vmem [shape: f32[64,25], index: 0, kind: input, shape index: {}]   ;;  %s7226_s1 = inlined_call_operand.vmem [shape: s32[8,1], index: 1, kind: input, shape index: {}]   ;;  %s7227_s2 = inlined_call_operand.hbm [shape: f32[25,256], index: 2, kind: input, shape index: {}]   ;;  %s7228_s3 = inlined_call_operand.vmem [shape: f32[64,256], index: 3, kind: input, shape index: {}]   ;;  %s7229_s4 = inlined_call_operand.vmem [shape: f32[1,256], index: 4, kind: input, shape index: {}]   ;;  %s7230_s5 = inlined_call_operand.hbm [shape: f32[64,64], index: 5, kind: input, shape index: {}]   ;;  %s7231_s6 = inlined_call_operand.vmem [shape: f32[1,64], index: 6, kind: input, shape index: {}]   ;;  %s7232_s7 = inlined_call_operand.vmem [shape: f32[64,3], index: 7, kind: input, shape index: {}]   ;;  %s7233_s8 = inlined_call_operand.vmem [shape: f32[1,3], index: 8, kind: input, shape index: {}]   ;;  %s7234_s9 = inlined_call_operand.vmem [shape: f32[8,3], index: 9, kind: output, shape index: {}]  }
   0x1   :  { %15 = vsyncpa [#allocation6], 0  ;;  %s5870_s30 = smov [#allocation3]   ;;  %s5822_s13 = scalar_lea.hbm %s7227_s2, 1024 }
   0x2   :  { %s25_s10 = sshll.u32 %s5870_s30, 4  ;;  %p5823_p0 = scmp.ne.s32.totalorder %s7227_s2, %s5822_s13  ;;  %s26_s10 = int_to_ptr.vmem [resolvable:$true] %s25_s10 }
   0x3   :  { %p5826_p1 = scmp.lt.u32.totalorder %s5822_s13, %s7227_s2 }
   0x5   :  { %p5828_p2 = pnand %p5826_p1, %p5823_p0 }
   0x7   :  { %5831 = shalt.err (!%p5828_p2)
}
   0x8   :  { %s5832_s18 = scalar_lea.vmem %s26_s10, 1024  ;;  %p5837_p4 = scmp.lt.s32.totalorder %s26_s10, %s26_s10 }
   0x9   :  { %p5833_p3 = scmp.ne.s32.totalorder %s26_s10, %s5832_s18  ;;  %p5838_p5 = scmp.lt.s32.totalorder %s5832_s18, %s5832_s18 }
   0xb   :  { %p5839_p6 = por %p5838_p5, %p5837_p4 }
   0xd   :  { %p5840_p7 = pnand %p5839_p6, %p5833_p3 }
   0xf   :  { %5843 = shalt.err (!%p5840_p7)
}
  0x10   :  { %s5871_s19 = smov 256   ;;  %s5872_s20 = smov 16  }
  0x11   :  { %31 = dma.hbm_to_vmem [thread:$0]  %s7227_s2, 1024, %s26_s10, [#allocation4], %s5871_s19, %s5871_s19, %s5872_s20  }
  0x12   :  { %s5873_s23 = smov [#allocation5]   ;;  %s5844_s27 = scalar_lea.hbm %s7230_s5, 1024 }
  0x13   :  { %s41_s24 = sshll.u32 %s5873_s23, 4  ;;  %p5845_p8 = scmp.ne.s32.totalorder %s7230_s5, %s5844_s27  ;;  %s42_s24 = int_to_ptr.vmem [resolvable:$true] %s41_s24 }
  0x14   :  { %p5848_p9 = scmp.lt.u32.totalorder %s5844_s27, %s7230_s5 }
  0x16   :  { %p5850_p10 = pnand %p5848_p9, %p5845_p8 }
  0x18   :  { %5853 = shalt.err (!%p5850_p10)
}
  0x19   :  { %s5854_s12 = scalar_lea.vmem %s42_s24, 1024  ;;  %p5859_p12 = scmp.lt.s32.totalorder %s42_s24, %s42_s24 }
  0x1a   :  { %p5855_p11 = scmp.ne.s32.totalorder %s42_s24, %s5854_s12  ;;  %p5860_p13 = scmp.lt.s32.totalorder %s5854_s12, %s5854_s12 }
  0x1c   :  { %p5861_p0 = por %p5860_p13, %p5859_p12 }
  0x1e   :  { %p5862_p1 = pnand %p5861_p0, %p5855_p11 }
  0x20   :  { %5865 = shalt.err (!%p5862_p1)
}
  0x21   :  { %s5874_s2 = smov 128   ;;  %s5875_s10 = smov 8  }
  0x22   :  { %47 = dma.hbm_to_vmem [thread:$0]  %s7230_s5, 1024, %s42_s24, [#allocation6], %s5874_s2, %s5874_s2, %s5875_s10  }
  0x23   :  { %5866 = dma.done.wait [#allocation4], 1024  }
  0x24   :  { %5867 = vsyncadd [#allocation4], 4294966272 }
  0x25   :  { %5868 = dma.done.wait [#allocation6], 1024  }
  0x26   :  { %5869 = vsyncadd [#allocation6], 4294966272  ;;  %v5876_v0 = vmov 0.0   ;;  %vm113_vm0 = vcmask 1040384   ;;  %vm5877_vm1 = vmmov 1   ;;  %v69_v2 = vld [vmem:[#allocation3 + $0x8] sm:$0xff]  ;;  %v78_v46 = vlaneseq }
  0x27   :  { %184 = vmatprep.mubr.f32.mxu0 %v5876_v0  ;;  %349 = vmatprep.mubr.f32.mxu1 %v5876_v0  ;;  %vm5959_vm2 = vmpackc.low %vm113_vm0, %vm5877_vm1  ;;  %v71_v3 = vld [vmem:[#allocation3 + $0x18] sm:$0xff]  ;;  %v251_v4 = vld [vmem:[%s7228_s3 + $0x8] sm:$0xff]  ;;  %vm88_vm3 = vcmask 203776   ;;  %v5878_v55 = vmov 1966171168   ;;  %vm281_vm5 = vcmask 523264  }
  0x28   :  { %v5126_v5 = vpack.c.bf16 %v71_v3, %v69_v2  ;;  %v253_v6 = vld [vmem:[%s7228_s3 + $0x18] sm:$0xff]  ;;  %v68_v7 = vld [vmem:[#allocation3] sm:$0xff]  ;;  %v70_v8 = vld [vmem:[#allocation3 + $0x10] sm:$0xff]  ;;  %v79_v47 = vshrl.u32 %v78_v46, 7  ;;  %v361_v56 = vunpack.c.l.s4 %v5878_v55 }
  0x29   :  { %v5969_v9 = vpack.c.bf16 %v253_v6, %v251_v4  ;;  %v5128_v10 = vpack.c.bf16 %v70_v8, %v68_v7  ;;  %v250_v11 = vld [vmem:[%s7228_s3] sm:$0xff]  ;;  %v252_v12 = vld [vmem:[%s7228_s3 + $0x10] sm:$0xff]  ;;  %v73_v13 = vld [vmem:[#allocation3 + $0x28] sm:$0xff] }
  0x2a   :  { %5127 = vmatprep.subr.bf16.mxu0 %v5126_v5  ;;  %v5977_v14 = vpack.c.bf16 %v252_v12, %v250_v11  ;;  %v75_v15 = vld [vmem:[#allocation3 + $0x38] sm:$0x1]  ;;  %v255_v16 = vld [vmem:[%s7228_s3 + $0x28] sm:$0xff]  ;;  %v72_v20 = vld [vmem:[#allocation3 + $0x20] sm:$0xff]  ;;  %v80_v48 = vsub.s32 0, %v79_v47  ;;  %v84_v50 = vsub.s32 1, %v79_v47  ;;  %v362_v60 = vunpack.c.0.s8 %v361_v56 }
  0x2b   :  { %v257_v17 = vld [vmem:[%s7228_s3 + $0x38] sm:$0xff]  ;;  %5137 = vmatprep.subr.bf16.mxu1 %v5969_v9  ;;  %5129 = vmatpush1.bf16.msra.mxu0 %v5128_v10  ;;  %v5130_v18 = vpack.c.bf16 %v75_v15, %v73_v13  ;;  %v74_v21 = vld [vmem:[#allocation3 + $0x30] sm:$0x1]  ;;  %v254_v22 = vld [vmem:[%s7228_s3 + $0x20] sm:$0xff] }
  0x2c   :  { %v5986_v19 = vpack.c.bf16 %v257_v17, %v255_v16  ;;  %5139 = vmatpush1.bf16.msra.mxu1 %v5977_v14  ;;  %v5133_v23 = vpack.c.bf16 %v74_v21, %v72_v20  ;;  %v256_v24 = vld [vmem:[%s7228_s3 + $0x30] sm:$0xff]  ;;  %v259_v25 = vld [vmem:[%s7228_s3 + $0x48] sm:$0xff]  ;;  %v261_v27 = vld [vmem:[%s7228_s3 + $0x58] sm:$0xff]  ;;  %v6110_v2 = vsub.s32 %v362_v60, %v79_v47 }
  0x2d   :  { %5132 = vmatprep.subr.msk.bf16.mxu0 %vm5959_vm2, %v5130_v18  ;;  %v6001_v26 = vpack.c.bf16 %v256_v24, %v254_v22  ;;  %v258_v28 = vld [vmem:[%s7228_s3 + $0x40] sm:$0xff]  ;;  %v260_v29 = vld [vmem:[%s7228_s3 + $0x50] sm:$0xff]  ;;  %v6012_v30 = vpack.c.bf16 %v261_v27, %v259_v25  ;;  %v263_v31 = vld [vmem:[%s7228_s3 + $0x68] sm:$0xff] }
  0x2e   :  { %5141 = vmatprep.subr.bf16.mxu1 %v5986_v19  ;;  %v265_v32 = vld [vmem:[%s7228_s3 + $0x78] sm:$0xff]  ;;  %v60_v33 = vld [vmem:[%s7225_s0] sm:$0xff]  ;;  %v6026_v34 = vpack.c.bf16 %v260_v29, %v258_v28  ;;  %v264_v37 = vld [vmem:[%s7228_s3 + $0x70] sm:$0xff] }
  0x2f   :  { %5135 = vmatpush1.bf16.msk.msra.mxu0 %vm5959_vm2, %v5133_v23  ;;  %v6030_v35 = vpack.c.bf16 %v265_v32, %v263_v31  ;;  %v262_v36 = vld [vmem:[%s7228_s3 + $0x60] sm:$0xff]  ;;  %v61_v38 = vld [vmem:[%s7225_s0 + $0x8] sm:$0xff]  ;;  %v62_v40 = vld [vmem:[%s7225_s0 + $0x10] sm:$0xff] }
  0x30   :  { %5143 = vmatpush1.bf16.msra.mxu1 %v6001_v26  ;;  %5169 = vmatprep.subr.bf16.mxu0 %v5969_v9  ;;  %v6045_v39 = vpack.c.bf16 %v264_v37, %v262_v36  ;;  %v63_v41 = vld [vmem:[%s7225_s0 + $0x18] sm:$0xff]  ;;  %v64_v42 = vld [vmem:[%s7225_s0 + $0x20] sm:$0xff]  ;;  %v65_v43 = vld [vmem:[%s7225_s0 + $0x28] sm:$0xff] }
  0x31   :  { %5145 = vmatprep.subr.bf16.mxu1 %v6012_v30  ;;  %v66_v44 = vld [vmem:[%s7225_s0 + $0x30] sm:$0xff]  ;;  %v67_v45 = vld [vmem:[%s7225_s0 + $0x38] sm:$0xff]  ;;  %v76_v49 = vld [vmem:[%s7229_s4] sm:$0x3]  ;;  %s5879_s0 = smov 64  }
  0x32   :  { %4987 = vmatmul.mubr.msk.f32.vlgmr.msra.gmra.mrb[0].mxu0 %vm88_vm3, %v60_v33  ;;  %v6102_v51 = vrot.slane %v76_v49, %v80_v48  ;;  %v6104_v52 = vrot.slane %v76_v49, %v84_v50 }
  0x33   :  { %190 = vmatprep.mubr.f32.mxu0 %v5876_v0  ;;  %5171 = vmatpush1.bf16.msra.mxu0 %v5977_v14 }
  0x34   :  { %5147 = vmatpush1.bf16.msra.mxu1 %v6026_v34  ;;  %5173 = vmatprep.subr.bf16.mxu0 %v5986_v19 }
  0x35   :  { %5149 = vmatprep.subr.bf16.mxu1 %v6030_v35 }
  0x36   :  { %4988 = vmatmul.mubr.msk.f32.gmra.mrb[2].mxu0 %vm88_vm3, %v61_v38 }
  0x37   :  { %196 = vmatprep.mubr.f32.mxu0 %v5876_v0  ;;  %5175 = vmatpush1.bf16.msra.mxu0 %v6001_v26 }
  0x38   :  { %5151 = vmatpush1.bf16.msra.mxu1 %v6045_v39  ;;  %5177 = vmatprep.subr.bf16.mxu0 %v6012_v30 }
  0x39   :  { %5153 = vmatprep.subr.bf16.mxu1 %v5969_v9 }
  0x3a   :  { %4989 = vmatmul.mubr.msk.f32.gmra.mrb[4].mxu0 %vm88_vm3, %v62_v40 }
  0x3b   :  { %350 = vmatmul.mubr.f32.vlgmr.msra.gmra.mrb[0].mxu1 %v5876_v0  ;;  %202 = vmatprep.mubr.f32.mxu0 %v5876_v0 }
  0x3c   :  { %5155 = vmatpush1.bf16.msra.mxu1 %v5977_v14  ;;  %857 = vmatprep.mubr.f32.mxu1 %v5876_v0 }
  0x3d   :  { %5157 = vmatprep.subr.bf16.mxu1 %v5986_v19  ;;  %5179 = vmatpush1.bf16.msra.mxu0 %v6026_v34 }
  0x3e   :  { %4990 = vmatmul.mubr.msk.f32.gmra.mrb[6].mxu0 %vm88_vm3, %v63_v41  ;;  %5181 = vmatprep.subr.bf16.mxu0 %v6030_v35 }
  0x3f   :  { %208 = vmatprep.mubr.f32.mxu0 %v5876_v0 }
  0x40   :  { %5159 = vmatpush1.bf16.msra.mxu1 %v6001_v26 }
  0x41   :  { %5161 = vmatprep.subr.bf16.mxu1 %v6012_v30  ;;  %5183 = vmatpush1.bf16.msra.mxu0 %v6045_v39 }
  0x42   :  { %4991 = vmatmul.mubr.msk.f32.gmra.mrb[8].mxu0 %vm88_vm3, %v64_v42  ;;  %5201 = vmatprep.subr.bf16.mxu0 %v5969_v9 }
  0x43   :  { %214 = vmatprep.mubr.f32.mxu0 %v5876_v0 }
  0x44   :  { %5163 = vmatpush1.bf16.msra.mxu1 %v6026_v34 }
  0x45   :  { %5165 = vmatprep.subr.bf16.mxu1 %v6030_v35 }
  0x46   :  { %4992 = vmatmul.mubr.msk.f32.gmra.mrb[10].mxu0 %vm88_vm3, %v65_v43 }
  0x47   :  { %220 = vmatprep.mubr.f32.mxu0 %v5876_v0 }
  0x48   :  { %5167 = vmatpush1.bf16.msra.mxu1 %v6045_v39 }
  0x49   :  { %5185 = vmatprep.subr.bf16.mxu1 %v5969_v9 }
  0x4a   :  { %4993 = vmatmul.mubr.msk.f32.gmra.mrb[12].mxu0 %vm88_vm3, %v66_v44 }
  0x4b   :  { %226 = vmatprep.mubr.f32.mxu0 %v5876_v0 }
  0x4e   :  { %4994 = vmatmul.mubr.msk.f32.gmra.mrb[14].mxu0 %vm88_vm3, %v67_v45 }
  0x4f   :  { %1439 = vmatprep.mubr.f32.mxu0 %v5876_v0 }
 0x105   :  { %v186_v53 = vpop.f32.mrb[0].mxu0 }
 0x106   :  { %v187_v54 = vadd.f32 %v186_v53, %v6102_v51  ;;  %v188_v57 = vpop.f32.mrb[1].mxu0 }
 0x107   :  { %v189_v58 = vadd.f32 %v188_v57, %v6104_v52 }
 0x108   :  { %233 = vst [vmem:[#allocation2] sm:$0xff] %v187_v54 }
 0x109   :  { %234 = vst [vmem:[#allocation2 + $0x8] sm:$0xff] %v189_v58  ;;  %v192_v59 = vpop.f32.mrb[2].mxu0 }
 0x10a   :  { %v193_v61 = vadd.f32 %v192_v59, %v6102_v51  ;;  %v194_v62 = vpop.f32.mrb[3].mxu0 }
 0x10b   :  { %v195_v63 = vadd.f32 %v194_v62, %v6104_v52 }
 0x10c   :  { %235 = vst [vmem:[#allocation2 + $0x10] sm:$0xff] %v193_v61 }
 0x10d   :  { %236 = vst [vmem:[#allocation2 + $0x18] sm:$0xff] %v195_v63  ;;  %v198_v1 = vpop.f32.mrb[4].mxu0 }
 0x10e   :  { %v199_v3 = vadd.f32 %v198_v1, %v6102_v51  ;;  %v351_v4 = vpop.f32.mrb[0].mxu1  ;;  %v200_v5 = vpop.f32.mrb[5].mxu0 }
 0x10f   :  { %v201_v6 = vadd.f32 %v200_v5, %v6104_v52  ;;  %v353_v7 = vpop.f32.mrb[1].mxu1 }
 0x110   :  { %237 = vst [vmem:[#allocation2 + $0x20] sm:$0xff] %v199_v3  ;;  %v358_v8 = vcombine.low %v351_v4, %v353_v7  ;;  %v359_v10 = vcombine.high %v351_v4, %v353_v7  ;;  %v266_v21 = vld [vmem:[#allocation2] ss:$8 sm:$0x3] }
 0x111   :  { %238 = vst [vmem:[#allocation2 + $0x28] sm:$0xff] %v201_v6  ;;  %v204_v11 = vpop.f32.mrb[6].mxu0 }
 0x112   :  { %v366_v12 = vrot.slane %v358_v8, %v6110_v2  ;;  %v205_v13 = vadd.f32 %v204_v11, %v6102_v51  ;;  %v206_v15 = vpop.f32.mrb[7].mxu0  ;;  %v373_v41 = vrot.slane %v359_v10, %v6110_v2 }
 0x113   :  { %v207_v16 = vadd.f32 %v206_v15, %v6104_v52 }
 0x114   :  { %v374_v17 = vcombine.high %v366_v12, %v366_v12  ;;  %239 = vst [vmem:[#allocation2 + $0x30] sm:$0xff] %v205_v13  ;;  %v382_v18 = vrot.slane %v366_v12, %v6110_v2  ;;  %v268_v33 = vld [vmem:[#allocation2 + $0x10] ss:$8 sm:$0x3]  ;;  %v375_v48 = vcombine.high %v373_v41, %v373_v41  ;;  %v389_v49 = vrot.slane %v373_v41, %v6110_v2 }
 0x115   :  { %240 = vst [vmem:[#allocation2 + $0x38] sm:$0xff] %v207_v16  ;;  %v210_v20 = vpop.f32.mrb[8].mxu0 }
 0x116   :  { %v211_v22 = vadd.f32 %v210_v20, %v6102_v51  ;;  %v212_v23 = vpop.f32.mrb[9].mxu0  ;;  %v416_v24 = vadd.f32 %v382_v18, %v266_v21  ;;  %v404_v25 = vcombine.high %v382_v18, %v382_v18  ;;  %v396_v27 = vrot.slane %v374_v17, %v6110_v2 }
 0x117   :  { %v213_v28 = vadd.f32 %v212_v23, %v6104_v52  ;;  %v403_v59 = vrot.slane %v375_v48, %v6110_v2  ;;  %v405_v62 = vcombine.high %v389_v49, %v389_v49 }
 0x118   :  { %241 = vst [vmem:[#allocation2 + $0x40] sm:$0xff] %v211_v22  ;;  %480 = vrot.lane.b32.xlu0 %v416_v24, %s5879_s0  ;;  %v270_v29 = vld [vmem:[#allocation2 + $0x20] ss:$8 sm:$0x3]  ;;  %v406_v36 = vcombine.high %v396_v27, %v396_v27  ;;  %v417_v40 = vadd.f32 %v396_v27, %v268_v33 }
 0x119   :  { %242 = vst [vmem:[#allocation2 + $0x48] sm:$0xff] %v213_v28  ;;  %v216_v31 = vpop.f32.mrb[10].mxu0  ;;  %v418_v32 = vadd.f32 %v404_v25, %v270_v29  ;;  %v407_v3 = vcombine.high %v403_v59, %v403_v59 }
 0x11a   :  { %v217_v37 = vadd.f32 %v216_v31, %v6102_v51  ;;  %v218_v38 = vpop.f32.mrb[11].mxu0  ;;  %v4996_v5 = vmul.f32 -1.442695, %v417_v40 }
 0x11b   :  { %v219_v42 = vadd.f32 %v218_v38, %v6104_v52  ;;  %484 = vrot.lane.b32.xlu1 %v418_v32, %s5879_s0  ;;  %v4997_v6 = vmul.f32 -1.442695, %v418_v32 }
 0x11c   :  { %243 = vst [vmem:[#allocation2 + $0x50] sm:$0xff] %v217_v37  ;;  %482 = vrot.lane.b32.xlu0 %v417_v40, %s5879_s0  ;;  %v272_v43 = vld [vmem:[#allocation2 + $0x30] ss:$8 sm:$0x3] }
 0x11d   :  { %244 = vst [vmem:[#allocation2 + $0x58] sm:$0xff] %v219_v42  ;;  %v222_v44 = vpop.f32.mrb[12].mxu0  ;;  %v419_v45 = vadd.f32 %v406_v36, %v272_v43 }
 0x11e   :  { %v223_v46 = vadd.f32 %v222_v44, %v6102_v51  ;;  %v224_v47 = vpop.f32.mrb[13].mxu0 }
 0x11f   :  { %v225_v50 = vadd.f32 %v224_v47, %v6104_v52  ;;  %486 = vrot.lane.b32.xlu1 %v419_v45, %s5879_s0  ;;  %v4998_v7 = vmul.f32 -1.442695, %v419_v45 }
 0x120   :  { %245 = vst [vmem:[#allocation2 + $0x60] sm:$0xff] %v223_v46  ;;  %v274_v53 = vld [vmem:[#allocation2 + $0x40] ss:$8 sm:$0x3] }
 0x121   :  { %246 = vst [vmem:[#allocation2 + $0x68] sm:$0xff] %v225_v50  ;;  %v228_v54 = vpop.f32.mrb[14].mxu0  ;;  %v420_v55 = vadd.f32 %v389_v49, %v274_v53 }
 0x122   :  { %v229_v56 = vadd.f32 %v228_v54, %v6102_v51  ;;  %v230_v57 = vpop.f32.mrb[15].mxu0 }
 0x123   :  { %v231_v58 = vadd.f32 %v230_v57, %v6104_v52  ;;  %488 = vrot.lane.b32.xlu0 %v420_v55, %s5879_s0  ;;  %v4995_v52 = vmul.f32 -1.442695, %v416_v24  ;;  %v4999_v8 = vmul.f32 -1.442695, %v420_v55 }
 0x124   :  { %247 = vst [vmem:[#allocation2 + $0x70] sm:$0xff] %v229_v56  ;;  %v276_v60 = vld [vmem:[#allocation2 + $0x50] ss:$8 sm:$0x3] }
 0x125   :  { %248 = vst [vmem:[#allocation2 + $0x78] sm:$0xff] %v231_v58  ;;  %v421_v61 = vadd.f32 %v403_v59, %v276_v60  ;;  %5303 = vpow2.f32 %v4995_v52 }
 0x126   :  { %5305 = vpow2.f32 %v4996_v5 }
 0x127   :  { %490 = vrot.lane.b32.xlu1 %v421_v61, %s5879_s0  ;;  %5307 = vpow2.f32 %v4997_v6  ;;  %v5000_v12 = vmul.f32 -1.442695, %v421_v61 }
 0x128   :  { %v278_v63 = vld [vmem:[#allocation2 + $0x60] ss:$8 sm:$0x3]  ;;  %5309 = vpow2.f32 %v4998_v7 }
 0x129   :  { %v422_v1 = vadd.f32 %v405_v62, %v278_v63  ;;  %5311 = vpow2.f32 %v4999_v8 }
 0x12a   :  { %5313 = vpow2.f32 %v5000_v12 }
 0x12b   :  { %492 = vrot.lane.b32.xlu0 %v422_v1, %s5879_s0  ;;  %v5001_v17 = vmul.f32 -1.442695, %v422_v1 }
 0x12c   :  { %v280_v51 = vld [vmem:[#allocation2 + $0x70] ss:$8 sm:$0x3] }
 0x12d   :  { %v423_v4 = vadd.f32 %v407_v3, %v280_v51 }
 0x12f   :  { %494 = vrot.lane.b32.xlu1 %v423_v4, %s5879_s0  ;;  %v5304_v10 = vpop.eup %5303  ;;  %v5002_v24 = vmul.f32 -1.442695, %v423_v4 }
 0x130   :  { %v5306_v11 = vpop.eup %5305  ;;  %v448_v13 = vadd.f32 1.0, %v5304_v10 }
 0x131   :  { %v5308_v15 = vpop.eup %5307  ;;  %v449_v16 = vadd.f32 1.0, %v5306_v11 }
 0x132   :  { %5315 = vrcp.f32 %v448_v13  ;;  %v450_v20 = vadd.f32 1.0, %v5308_v15  ;;  %v5310_v22 = vpop.eup %5309  ;;  %v5880_v15 = vmov 0  }
 0x133   :  { %5317 = vrcp.f32 %v449_v16  ;;  %v451_v28 = vadd.f32 1.0, %v5310_v22  ;;  %v5312_v31 = vpop.eup %5311  ;;  %5301 = vset.pattern.permute.xlu0 %v5880_v15  ;;  %5302 = vset.pattern.permute.xlu1 %v5880_v15 }
 0x134   :  { %v452_v36 = vadd.f32 1.0, %v5312_v31  ;;  %v5314_v37 = vpop.eup %5313 }
 0x135   :  { %v453_v44 = vadd.f32 1.0, %v5314_v37 }
 0x13c   :  { %v6138_v38 = vpop.eup %5315 }
 0x13d   :  { %v6140_v41 = vpop.eup %5317 }
 0x18a   :  { %v481_v18 = vpop.permute.xlu0 %480 }
 0x18b   :  { %v496_v21 = vrot.slane %v481_v18, 1 }
 0x18d   :  { %5319 = vtanh.f32 %v496_v21  ;;  %v485_v23 = vpop.permute.xlu1 %484  ;;  %v521_v21 = vmul.f32 0.0, %v6140_v41 }
 0x18e   :  { %5321 = vpow2.f32 %v5001_v17  ;;  %v498_v25 = vrot.slane %v485_v23, 1  ;;  %v483_v27 = vpop.permute.xlu0 %482  ;;  %v520_v17 = vmul.f32 0.0, %v6138_v38 }
 0x18f   :  { %5323 = vrcp.f32 %v450_v20  ;;  %v497_v29 = vrot.slane %v483_v27, 1 }
 0x190   :  { %5325 = vtanh.f32 %v498_v25 }
 0x191   :  { %5327 = vtanh.f32 %v497_v29  ;;  %v487_v32 = vpop.permute.xlu1 %486 }
 0x192   :  { %5329 = vpow2.f32 %v5002_v24  ;;  %v499_v33 = vrot.slane %v487_v32, 1 }
 0x193   :  { %5331 = vrcp.f32 %v451_v28 }
 0x194   :  { %5333 = vtanh.f32 %v499_v33 }
 0x195   :  { %v489_v40 = vpop.permute.xlu0 %488  ;;  %5335 = vrcp.f32 %v452_v36 }
 0x196   :  { %v500_v42 = vrot.slane %v489_v40, 1 }
 0x197   :  { %v5320_v43 = vpop.eup %5319 }
 0x198   :  { %v5322_v45 = vpop.eup %5321  ;;  %5337 = vtanh.f32 %v500_v42  ;;  %v528_v46 = vmul.f32 %v5320_v43, %v6138_v38 }
 0x199   :  { %v6143_v47 = vpop.eup %5323  ;;  %v491_v48 = vpop.permute.xlu1 %490  ;;  %5339 = vrcp.f32 %v453_v44  ;;  %v454_v54 = vadd.f32 1.0, %v5322_v45 }
 0x19a   :  { %v5326_v49 = vpop.eup %5325  ;;  %v501_v50 = vrot.slane %v491_v48, 1  ;;  %544 = vrot.lane.b32.xlu0 %v528_v46, %s5879_s0  ;;  %v522_v22 = vmul.f32 0.0, %v6143_v47 }
 0x19b   :  { %v5328_v53 = vpop.eup %5327  ;;  %v530_v55 = vmul.f32 %v5326_v49, %v6143_v47 }
 0x19c   :  { %v5330_v56 = vpop.eup %5329  ;;  %5341 = vtanh.f32 %v501_v50  ;;  %v529_v57 = vmul.f32 %v5328_v53, %v6140_v41 }
 0x19d   :  { %v6148_v58 = vpop.eup %5331  ;;  %v493_v59 = vpop.permute.xlu0 %492  ;;  %5343 = vrcp.f32 %v454_v54  ;;  %v455_v62 = vadd.f32 1.0, %v5330_v56 }
 0x19e   :  { %v5334_v60 = vpop.eup %5333  ;;  %546 = vrot.lane.b32.xlu1 %v529_v57, %s5879_s0  ;;  %v502_v61 = vrot.slane %v493_v59, 1  ;;  %548 = vrot.lane.b32.xlu0 %v530_v55, %s5879_s0  ;;  %v523_v29 = vmul.f32 0.0, %v6148_v58 }
 0x19f   :  { %v531_v63 = vmul.f32 %v5334_v60, %v6148_v58  ;;  %v6153_v1 = vpop.eup %5335 }
 0x1a0   :  { %5345 = vtanh.f32 %v502_v61  ;;  %v524_v33 = vmul.f32 0.0, %v6153_v1 }
 0x1a1   :  { %v495_v3 = vpop.permute.xlu1 %494  ;;  %5347 = vrcp.f32 %v455_v62 }
 0x1a2   :  { %v5338_v51 = vpop.eup %5337  ;;  %v503_v4 = vrot.slane %v495_v3, 1  ;;  %550 = vrot.lane.b32.xlu1 %v531_v63, %s5879_s0 }
 0x1a3   :  { %v532_v52 = vmul.f32 %v5338_v51, %v6153_v1  ;;  %v6157_v5 = vpop.eup %5339 }
 0x1a4   :  { %5349 = vtanh.f32 %v503_v4  ;;  %v525_v45 = vmul.f32 0.0, %v6157_v5 }
 0x1a5   :  { %552 = vrot.lane.b32.xlu0 %v532_v52, %s5879_s0 }
 0x1a6   :  { %v5342_v6 = vpop.eup %5341 }
 0x1a7   :  { %v533_v7 = vmul.f32 %v5342_v6, %v6157_v5  ;;  %v6161_v8 = vpop.eup %5343  ;;  %v6192_v6 = vld [vmem:[%s7226_s1] sm:$0xff] }
 0x1a8   :  { %v526_v55 = vmul.f32 0.0, %v6161_v8  ;;  %vm648_vm4 = vcmp.gt.s32.totalorder %v6192_v6, 0  ;;  %vm1230_vm7 = vcmp.gt.s32.totalorder %v6192_v6, 1 }
 0x1a9   :  { %554 = vrot.lane.b32.xlu1 %v533_v7, %s5879_s0 }
 0x1aa   :  { %v5346_v10 = vpop.eup %5345 }
 0x1ab   :  { %v534_v11 = vmul.f32 %v5346_v10, %v6161_v8  ;;  %v6165_v12 = vpop.eup %5347 }
 0x1ac   :  { %v527_v60 = vmul.f32 0.0, %v6165_v12 }
 0x1ad   :  { %556 = vrot.lane.b32.xlu0 %v534_v11, %s5879_s0 }
 0x1ae   :  { %v5350_v13 = vpop.eup %5349 }
 0x1af   :  { %v535_v16 = vmul.f32 %v5350_v13, %v6165_v12 }
 0x1b1   :  { %558 = vrot.lane.b32.xlu1 %v535_v16, %s5879_s0  ;;  %v649_v16 = vsel %vm648_vm4, 1, %v5880_v15  ;;  %vm5882_vm4 = vmmov 0  }
 0x20c   :  { %v545_v18 = vpop.permute.xlu0 %544 }
 0x20d   :  { %v568_v20 = vadd.f32 %v545_v18, %v520_v17 }
 0x20f   :  { %5351 = vtanh.f32 %v568_v20 }
 0x210   :  { %v547_v23 = vpop.permute.xlu1 %546  ;;  %v549_v24 = vpop.permute.xlu0 %548 }
 0x211   :  { %v569_v25 = vadd.f32 %v547_v23, %v521_v21  ;;  %v570_v27 = vadd.f32 %v549_v24, %v522_v22  ;;  %v595_v24 = vrot.slane %v6148_v58, 1 }
 0x213   :  { %5353 = vtanh.f32 %v569_v25  ;;  %v721_v28 = vcombine.low %v568_v20, %v569_v25 }
 0x214   :  { %5355 = vtanh.f32 %v570_v27  ;;  %v551_v31 = vpop.permute.xlu1 %550 }
 0x215   :  { %v571_v32 = vadd.f32 %v551_v31, %v523_v29  ;;  %v731_v43 = vrot.slane %v721_v28, %v6110_v2  ;;  %v593_v28 = vrot.slane %v6140_v41, 1  ;;  %v594_v29 = vrot.slane %v6143_v47, 1 }
 0x216   :  { %v599_v41 = vrot.slane %v6165_v12, 1 }
 0x217   :  { %5357 = vtanh.f32 %v571_v32  ;;  %v722_v36 = vcombine.low %v570_v27, %v571_v32  ;;  %v553_v37 = vpop.permute.xlu0 %552  ;;  %v597_v32 = vrot.slane %v6157_v5, 1 }
 0x218   :  { %v572_v40 = vadd.f32 %v553_v37, %v524_v33  ;;  %v592_v33 = vrot.slane %v6138_v38, 1 }
 0x219   :  { %v5352_v42 = vpop.eup %5351  ;;  %v738_v44 = vrot.slane %v722_v36, %v6110_v2 }
 0x21a   :  { %5359 = vtanh.f32 %v572_v40  ;;  %616 = vrot.lane.b32.xlu0 %v5352_v42, %s5879_s0 }
 0x21b   :  { %v753_v46 = vcombine.low %v731_v43, %v738_v44  ;;  %v555_v48 = vpop.permute.xlu1 %554  ;;  %v598_v43 = vrot.slane %v6161_v8, 1 }
 0x21c   :  { %v573_v49 = vadd.f32 %v555_v48, %v525_v45 }
 0x21d   :  { %v5354_v50 = vpop.eup %5353  ;;  %v6197_v11 = vrot.slane %v753_v46, %v6110_v2 }
 0x21e   :  { %v5356_v53 = vpop.eup %5355  ;;  %5361 = vtanh.f32 %v573_v49  ;;  %v723_v54 = vcombine.low %v572_v40, %v573_v49  ;;  %618 = vrot.lane.b32.xlu1 %v5354_v50, %s5879_s0  ;;  %v596_v40 = vrot.slane %v6153_v1, 1 }
 0x21f   :  { %620 = vrot.lane.b32.xlu0 %v5356_v53, %s5879_s0  ;;  %v557_v56 = vpop.permute.xlu0 %556 }
 0x220   :  { %v574_v57 = vadd.f32 %v557_v56, %v526_v55  ;;  %v745_v4 = vrot.slane %v723_v54, %v6110_v2 }
 0x221   :  { %v5358_v59 = vpop.eup %5357 }
 0x222   :  { %5363 = vtanh.f32 %v574_v57  ;;  %622 = vrot.lane.b32.xlu1 %v5358_v59, %s5879_s0 }
 0x223   :  { %v559_v61 = vpop.permute.xlu1 %558 }
 0x224   :  { %v5360_v62 = vpop.eup %5359  ;;  %v575_v63 = vadd.f32 %v559_v61, %v527_v60 }
 0x225   :  { %624 = vrot.lane.b32.xlu0 %v5360_v62, %s5879_s0 }
 0x226   :  { %5365 = vtanh.f32 %v575_v63  ;;  %v724_v3 = vcombine.low %v574_v57, %v575_v63 }
 0x228   :  { %v5362_v51 = vpop.eup %5361  ;;  %v752_v52 = vrot.slane %v724_v3, %v6110_v2 }
 0x229   :  { %626 = vrot.lane.b32.xlu1 %v5362_v51, %s5879_s0 }
 0x22a   :  { %v754_v7 = vcombine.low %v745_v4, %v752_v52 }
 0x22c   :  { %v5364_v10 = vpop.eup %5363  ;;  %v6200_v13 = vrot.slane %v754_v7, %v6110_v2 }
 0x22d   :  { %628 = vrot.lane.b32.xlu0 %v5364_v10, %s5879_s0 }
 0x22e   :  { %v769_v17 = vcombine.low %v6197_v11, %v6200_v13 }
 0x230   :  { %v5366_v18 = vpop.eup %5365 }
 0x231   :  { %630 = vrot.lane.b32.xlu1 %v5366_v18, %s5879_s0  ;;  %651 = vperm.xlu0 %5301, %v649_v16  }
 0x28c   :  { %v617_v20 = vpop.permute.xlu0 %616 }
 0x28d   :  { %v640_v58 = vmul.f32 %v617_v20, %v592_v33  ;;  %v783_v20 = vld [vmem:[#allocation2 + $0x41] ss:$8 sm:$0x3] }
 0x290   :  { %v619_v21 = vpop.permute.xlu1 %618 }
 0x291   :  { %v621_v22 = vpop.permute.xlu0 %620  ;;  %v641_v36 = vmul.f32 %v619_v21, %v593_v28  ;;  %v775_v21 = vld [vmem:[#allocation2 + $0x1] ss:$8 sm:$0x3]  ;;  %v777_v28 = vld [vmem:[#allocation2 + $0x11] ss:$8 sm:$0x3] }
 0x292   :  { %v642_v37 = vmul.f32 %v621_v22, %v594_v29 }
 0x293   :  { %v662_v47 = vcombine.low %v640_v58, %v641_v36  ;;  %v787_v36 = vld [vmem:[#allocation2 + $0x61] ss:$8 sm:$0x3] }
 0x294   :  { %v623_v23 = vpop.permute.xlu1 %622 }
 0x295   :  { %v643_v31 = vmul.f32 %v623_v23, %v595_v24  ;;  %v672_v54 = vrot.slane %v662_v47, %v6110_v2 }
 0x297   :  { %v625_v25 = vpop.permute.xlu0 %624  ;;  %v663_v45 = vcombine.low %v642_v37, %v643_v31  ;;  %v785_v37 = vld [vmem:[#allocation2 + $0x51] ss:$8 sm:$0x3] }
 0x298   :  { %v644_v46 = vmul.f32 %v625_v25, %v596_v40 }
 0x299   :  { %v679_v38 = vrot.slane %v663_v45, %v6110_v2 }
 0x29b   :  { %v627_v27 = vpop.permute.xlu1 %626  ;;  %v694_v55 = vcombine.low %v672_v54, %v679_v38 }
 0x29c   :  { %v645_v42 = vmul.f32 %v627_v27, %v597_v32  ;;  %v779_v27 = vld [vmem:[#allocation2 + $0x21] ss:$8 sm:$0x3] }
 0x29d   :  { %v702_v12 = vrot.slane %v694_v55, %v6110_v2 }
 0x29e   :  { %v664_v49 = vcombine.low %v644_v46, %v645_v42  ;;  %v789_v46 = vld [vmem:[#allocation2 + $0x71] ss:$8 sm:$0x3] }
 0x29f   :  { %v629_v44 = vpop.permute.xlu0 %628 }
 0x2a0   :  { %v646_v50 = vmul.f32 %v629_v44, %v598_v43  ;;  %v686_v1 = vrot.slane %v664_v49, %v6110_v2  ;;  %v781_v44 = vld [vmem:[#allocation2 + $0x31] ss:$8 sm:$0x3] }
 0x2a3   :  { %v631_v48 = vpop.permute.xlu1 %630 }
 0x2a4   :  { %v647_v5 = vmul.f32 %v631_v48, %v599_v41 }
 0x2a6   :  { %v665_v53 = vcombine.low %v646_v50, %v647_v5 }
 0x2a8   :  { %v693_v8 = vrot.slane %v665_v53, %v6110_v2 }
 0x2aa   :  { %v695_v56 = vcombine.low %v686_v1, %v693_v8 }
 0x2ac   :  { %v709_v57 = vrot.slane %v695_v56, %v6110_v2 }
 0x2ae   :  { %v710_v59 = vcombine.low %v702_v12, %v709_v57 }
 0x2b0   :  { %v6221_v60 = vpop.permute.xlu0 %651 }
 0x2b1   :  { %vm653_vm6 = vcmp.eq.s32.totalorder %v6221_v60, 1 }
 0x2b2   :  { %v6226_v61 = vsel %vm653_vm6, %v710_v59, 0.0 }
 0x2b3   :  { %5003 = vmatmul.mubr.msk.f32.vlgmr.msra.gmra.mrb[2].mxu1 %vm281_vm5, %v6226_v61 }
 0x2b4   :  { %5187 = vmatpush1.bf16.msra.mxu1 %v5977_v14  ;;  %2021 = vmatprep.mubr.f32.mxu1 %v5876_v0 }
 0x2b5   :  { %5189 = vmatprep.subr.bf16.mxu1 %v5986_v19 }
 0x2b8   :  { %5191 = vmatpush1.bf16.msra.mxu1 %v6001_v26 }
 0x2b9   :  { %5193 = vmatprep.subr.bf16.mxu1 %v6012_v30 }
 0x2bc   :  { %5195 = vmatpush1.bf16.msra.mxu1 %v6026_v34 }
 0x2bd   :  { %5197 = vmatprep.subr.bf16.mxu1 %v6030_v35 }
 0x2c0   :  { %5199 = vmatpush1.bf16.msra.mxu1 %v6045_v39 }
 0x2c1   :  { %5217 = vmatprep.subr.bf16.mxu1 %v5969_v9 }
 0x386   :  { %v859_v62 = vpop.f32.mrb[2].mxu1 }
 0x387   :  { %v861_v63 = vpop.f32.mrb[3].mxu1 }
 0x388   :  { %v866_v3 = vcombine.low %v859_v62, %v861_v63  ;;  %v867_v51 = vcombine.high %v859_v62, %v861_v63 }
 0x38a   :  { %v874_v4 = vrot.slane %v866_v3, %v6110_v2  ;;  %v881_v52 = vrot.slane %v867_v51, %v6110_v2 }
 0x38c   :  { %v882_v7 = vcombine.high %v874_v4, %v874_v4  ;;  %v890_v10 = vrot.slane %v874_v4, %v6110_v2  ;;  %v897_v16 = vrot.slane %v881_v52, %v6110_v2  ;;  %v883_v18 = vcombine.high %v881_v52, %v881_v52 }
 0x38e   :  { %v928_v22 = vadd.f32 %v897_v16, %v783_v20  ;;  %v924_v23 = vadd.f32 %v890_v10, %v775_v21  ;;  %v912_v24 = vcombine.high %v890_v10, %v890_v10  ;;  %v904_v25 = vrot.slane %v882_v7, %v6110_v2 }
 0x38f   :  { %v913_v32 = vcombine.high %v897_v16, %v897_v16  ;;  %v911_v33 = vrot.slane %v883_v18, %v6110_v2 }
 0x390   :  { %996 = vrot.lane.b32.xlu0 %v928_v22, %s5879_s0  ;;  %988 = vrot.lane.b32.xlu1 %v924_v23, %s5879_s0  ;;  %v926_v29 = vadd.f32 %v912_v24, %v779_v27  ;;  %v925_v31 = vadd.f32 %v904_v25, %v777_v28  ;;  %v914_v43 = vcombine.high %v904_v25, %v904_v25  ;;  %v5004_v48 = vmul.f32 -1.442695, %v924_v23 }
 0x391   :  { %v930_v40 = vadd.f32 %v913_v32, %v787_v36  ;;  %v929_v42 = vadd.f32 %v911_v33, %v785_v37  ;;  %v915_v45 = vcombine.high %v911_v33, %v911_v33  ;;  %v5008_v5 = vmul.f32 -1.442695, %v928_v22 }
 0x392   :  { %v927_v58 = vadd.f32 %v914_v43, %v781_v44  ;;  %v5005_v49 = vmul.f32 -1.442695, %v925_v31  ;;  %5367 = vpow2.f32 %v5004_v48  ;;  %v5006_v54 = vmul.f32 -1.442695, %v926_v29 }
 0x393   :  { %v931_v41 = vadd.f32 %v915_v45, %v789_v46  ;;  %v5009_v53 = vmul.f32 -1.442695, %v929_v42  ;;  %v5010_v1 = vmul.f32 -1.442695, %v930_v40 }
 0x394   :  { %992 = vrot.lane.b32.xlu0 %v926_v29, %s5879_s0  ;;  %990 = vrot.lane.b32.xlu1 %v925_v31, %s5879_s0  ;;  %5369 = vpow2.f32 %v5005_v49 }
 0x395   :  { %5371 = vpow2.f32 %v5008_v5  ;;  %v5011_v57 = vmul.f32 -1.442695, %v931_v41 }
 0x396   :  { %5373 = vpow2.f32 %v5009_v53 }
 0x397   :  { %5375 = vpow2.f32 %v5006_v54 }
 0x398   :  { %1000 = vrot.lane.b32.xlu0 %v930_v40, %s5879_s0  ;;  %998 = vrot.lane.b32.xlu1 %v929_v42, %s5879_s0 }
 0x39c   :  { %770 = vrot.lane.b32.xlu0 %v769_v17, %s5879_s0  ;;  %994 = vrot.lane.b32.xlu1 %v927_v58, %s5879_s0  ;;  %v5007_v17 = vmul.f32 -1.442695, %v927_v58  ;;  %v5368_v55 = vpop.eup %5367 }
 0x39d   :  { %v956_v51 = vadd.f32 1.0, %v5368_v55 }
 0x39e   :  { %5377 = vpow2.f32 %v5007_v17  ;;  %v5370_v63 = vpop.eup %5369 }
 0x39f   :  { %5379 = vpow2.f32 %v5010_v1  ;;  %v5372_v7 = vpop.eup %5371  ;;  %v957_v60 = vadd.f32 1.0, %v5370_v63 }
 0x3a0   :  { %1002 = vrot.lane.b32.xlu1 %v931_v41, %s5879_s0  ;;  %5381 = vpow2.f32 %v5011_v57  ;;  %v5374_v20 = vpop.eup %5373  ;;  %v960_v22 = vadd.f32 1.0, %v5372_v7 }
 0x3a1   :  { %v5376_v25 = vpop.eup %5375  ;;  %v961_v28 = vadd.f32 1.0, %v5374_v20 }
 0x3a2   :  { %v958_v36 = vadd.f32 1.0, %v5376_v25 }
 0x3a8   :  { %v5378_v32 = vpop.eup %5377 }
 0x3a9   :  { %v5380_v40 = vpop.eup %5379  ;;  %v959_v43 = vadd.f32 1.0, %v5378_v32 }
 0x3aa   :  { %v5382_v46 = vpop.eup %5381  ;;  %v962_v41 = vadd.f32 1.0, %v5380_v40 }
 0x3ab   :  { %v963_v53 = vadd.f32 1.0, %v5382_v46 }
 0x402   :  { %v997_v47 = vpop.permute.xlu0 %996  ;;  %v989_v50 = vpop.permute.xlu1 %988 }
 0x403   :  { %v1004_v3 = vrot.slane %v989_v50, 1  ;;  %v1008_v21 = vrot.slane %v997_v47, 1 }
 0x405   :  { %5383 = vtanh.f32 %v1004_v3 }
 0x406   :  { %v6257_v38 = vpop.permute.xlu0 %992  ;;  %v991_v11 = vpop.permute.xlu1 %990  ;;  %5385 = vrcp.f32 %v956_v51 }
 0x407   :  { %v1005_v10 = vrot.slane %v991_v11, 1  ;;  %v1006_v33 = vrot.slane %v6257_v38, 1 }
 0x409   :  { %5387 = vtanh.f32 %v1005_v10 }
 0x40a   :  { %v6259_v13 = vpop.permute.xlu0 %1000  ;;  %v999_v12 = vpop.permute.xlu1 %998  ;;  %5389 = vrcp.f32 %v957_v60 }
 0x40b   :  { %v1009_v27 = vrot.slane %v999_v12, 1  ;;  %5391 = vtanh.f32 %v1008_v21  ;;  %v1010_v45 = vrot.slane %v6259_v13, 1 }
 0x40c   :  { %5393 = vrcp.f32 %v960_v22 }
 0x40d   :  { %5395 = vtanh.f32 %v1009_v27 }
 0x40e   :  { %v771_v8 = vpop.permute.xlu0 %770  ;;  %v995_v23 = vpop.permute.xlu1 %994  ;;  %5397 = vrcp.f32 %v961_v28 }
 0x40f   :  { %v6263_v56 = vsel %vm653_vm6, %v771_v8, 0.0  ;;  %v1007_v42 = vrot.slane %v995_v23, 1  ;;  %5399 = vtanh.f32 %v1006_v33  ;;  %v5384_v47 = vpop.eup %5383 }
 0x410   :  { %v1029_v59 = vcombine.high %v6263_v56, %v6263_v56  ;;  %v1036_v62 = vrot.slane %v6263_v56, %v6110_v2  ;;  %5401 = vrcp.f32 %v958_v36  ;;  %v6282_v50 = vpop.eup %5385 }
 0x411   :  { %5403 = vtanh.f32 %v1007_v42  ;;  %v1110_v11 = vmul.f32 %v6282_v50, %v5384_v47 }
 0x412   :  { %v1052_v4 = vrot.slane %v1036_v62, %v6110_v2  ;;  %v1044_v52 = vcombine.high %v1036_v62, %v1036_v62  ;;  %v1043_v18 = vrot.slane %v1029_v59, %v6110_v2  ;;  %v1003_v44 = vpop.permute.xlu1 %1002  ;;  %5405 = vrcp.f32 %v959_v43 }
 0x413   :  { %v1011_v49 = vrot.slane %v1003_v44, 1  ;;  %v5388_v38 = vpop.eup %5387  ;;  %5407 = vtanh.f32 %v1010_v45 }
 0x414   :  { %1078 = vrot.lane.b32.xlu1 %v1052_v4, %s5879_s0  ;;  %v1066_v16 = vrot.slane %v1044_v52, %v6110_v2  ;;  %v1074_v24 = vcombine.high %v1052_v4, %v1052_v4  ;;  %v1045_v31 = vcombine.high %v1043_v18, %v1043_v18  ;;  %v1059_v37 = vrot.slane %v1043_v18, %v6110_v2  ;;  %v6285_v54 = vpop.eup %5389 }
 0x415   :  { %5409 = vrcp.f32 %v962_v41  ;;  %v5392_v13 = vpop.eup %5391  ;;  %v1111_v1 = vmul.f32 %v6285_v54, %v5388_v38 }
 0x416   :  { %1080 = vrot.lane.b32.xlu0 %v1066_v16, %s5879_s0  ;;  %v1076_v29 = vcombine.high %v1066_v16, %v1066_v16  ;;  %v1073_v58 = vrot.slane %v1045_v31, %v6110_v2  ;;  %v1075_v48 = vcombine.high %v1059_v37, %v1059_v37  ;;  %5411 = vtanh.f32 %v1011_v49  ;;  %v6289_v17 = vpop.eup %5393 }
 0x417   :  { %v5396_v8 = vpop.eup %5395  ;;  %5413 = vrcp.f32 %v963_v53  ;;  %v1114_v57 = vmul.f32 %v6289_v17, %v5392_v13 }
 0x418   :  { %1082 = vrot.lane.b32.xlu1 %v1074_v24, %s5879_s0  ;;  %v1077_v5 = vcombine.high %v1073_v58, %v1073_v58  ;;  %v6293_v55 = vpop.eup %5397 }
 0x419   :  { %v5400_v12 = vpop.eup %5399  ;;  %v1115_v62 = vmul.f32 %v6293_v55, %v5396_v8 }
 0x41a   :  { %1084 = vrot.lane.b32.xlu0 %v1076_v29, %s5879_s0  ;;  %v6297_v59 = vpop.eup %5401 }
 0x41b   :  { %v5404_v63 = vpop.eup %5403  ;;  %v1112_v51 = vmul.f32 %v6297_v59, %v5400_v12 }
 0x41c   :  { %1086 = vrot.lane.b32.xlu1 %v1059_v37, %s5879_s0  ;;  %v6301_v3 = vpop.eup %5405 }
 0x41d   :  { %v5408_v4 = vpop.eup %5407  ;;  %v1113_v7 = vmul.f32 %v6301_v3, %v5404_v63  ;;  %v1177_v6 = vrot.slane %v6301_v3, 1 }
 0x41e   :  { %1088 = vrot.lane.b32.xlu0 %v1073_v58, %s5879_s0 }
 0x41f   :  { %v6305_v52 = vpop.eup %5409 }
 0x420   :  { %1090 = vrot.lane.b32.xlu1 %v1075_v48, %s5879_s0  ;;  %v5412_v10 = vpop.eup %5411  ;;  %v1116_v60 = vmul.f32 %v6305_v52, %v5408_v4 }
 0x421   :  { %v6311_v16 = vpop.eup %5413 }
 0x422   :  { %1092 = vrot.lane.b32.xlu0 %v1077_v5, %s5879_s0  ;;  %v1117_v18 = vmul.f32 %v6311_v16, %v5412_v10 }
 0x424   :  { %1126 = vrot.lane.b32.xlu1 %v1110_v11, %s5879_s0 }
 0x426   :  { %1128 = vrot.lane.b32.xlu0 %v1111_v1, %s5879_s0 }
 0x428   :  { %1134 = vrot.lane.b32.xlu1 %v1114_v57, %s5879_s0 }
 0x42a   :  { %1136 = vrot.lane.b32.xlu0 %v1115_v62, %s5879_s0 }
 0x42c   :  { %1130 = vrot.lane.b32.xlu1 %v1112_v51, %s5879_s0 }
 0x42e   :  { %1132 = vrot.lane.b32.xlu0 %v1113_v7, %s5879_s0 }
 0x430   :  { %1138 = vrot.lane.b32.xlu1 %v1116_v60, %s5879_s0 }
 0x432   :  { %1140 = vrot.lane.b32.xlu0 %v1117_v18, %s5879_s0 }
 0x486   :  { %v1079_v20 = vpop.permute.xlu1 %1078 }
 0x487   :  { %v1102_v29 = vmul.f32 %v6282_v50, %v1079_v20 }
 0x488   :  { %v1081_v21 = vpop.permute.xlu0 %1080 }
 0x489   :  { %v1103_v32 = vmul.f32 %v6285_v54, %v1081_v21 }
 0x48a   :  { %v1083_v22 = vpop.permute.xlu1 %1082 }
 0x48b   :  { %v1104_v46 = vmul.f32 %v6297_v59, %v1083_v22 }
 0x48c   :  { %v1085_v23 = vpop.permute.xlu0 %1084 }
 0x48d   :  { %v1105_v47 = vmul.f32 %v6301_v3, %v1085_v23 }
 0x48e   :  { %v1087_v24 = vpop.permute.xlu1 %1086 }
 0x48f   :  { %v1106_v37 = vmul.f32 %v6289_v17, %v1087_v24 }
 0x490   :  { %v1089_v25 = vpop.permute.xlu0 %1088 }
 0x491   :  { %v1107_v43 = vmul.f32 %v6293_v55, %v1089_v25 }
 0x492   :  { %v1091_v27 = vpop.permute.xlu1 %1090 }
 0x493   :  { %v1108_v53 = vmul.f32 %v6305_v52, %v1091_v27 }
 0x494   :  { %v1093_v28 = vpop.permute.xlu0 %1092 }
 0x495   :  { %v1109_v8 = vmul.f32 %v6311_v16, %v1093_v28 }
 0x496   :  { %v1127_v31 = vpop.permute.xlu1 %1126 }
 0x497   :  { %v1150_v33 = vadd.f32 %v1127_v31, %v1102_v29 }
 0x498   :  { %v1129_v36 = vpop.permute.xlu0 %1128 }
 0x499   :  { %5415 = vtanh.f32 %v1150_v33  ;;  %v1151_v40 = vadd.f32 %v1129_v36, %v1103_v32 }
 0x49a   :  { %v1135_v42 = vpop.permute.xlu1 %1134 }
 0x49b   :  { %5417 = vtanh.f32 %v1151_v40  ;;  %v1303_v44 = vcombine.low %v1150_v33, %v1151_v40  ;;  %v1154_v58 = vadd.f32 %v1135_v42, %v1106_v37  ;;  %v1231_v33 = vsel %vm1230_vm7, 1, %v5880_v15 }
 0x49c   :  { %v1137_v45 = vpop.permute.xlu0 %1136 }
 0x49d   :  { %5419 = vtanh.f32 %v1154_v58  ;;  %v1155_v41 = vadd.f32 %v1137_v45, %v1107_v43  ;;  %v1313_v51 = vrot.slane %v1303_v44, %v6110_v2  ;;  %v1179_v44 = vrot.slane %v6293_v55, 1 }
 0x49e   :  { %v1131_v48 = vpop.permute.xlu1 %1130  ;;  %v1181_v55 = vrot.slane %v6311_v16, 1 }
 0x49f   :  { %5421 = vtanh.f32 %v1155_v41  ;;  %v1305_v49 = vcombine.low %v1154_v58, %v1155_v41  ;;  %v1152_v5 = vadd.f32 %v1131_v48, %v1104_v46  ;;  %v1178_v58 = vrot.slane %v6289_v17, 1 }
 0x4a0   :  { %v1133_v38 = vpop.permute.xlu0 %1132  ;;  %v1175_v46 = vrot.slane %v6285_v54, 1  ;;  %v1176_v48 = vrot.slane %v6297_v59, 1 }
 0x4a1   :  { %5423 = vtanh.f32 %v1152_v5  ;;  %v1153_v11 = vadd.f32 %v1133_v38, %v1105_v47  ;;  %v1327_v21 = vrot.slane %v1305_v49, %v6110_v2  ;;  %v1174_v49 = vrot.slane %v6282_v50, 1 }
 0x4a2   :  { %v1139_v13 = vpop.permute.xlu1 %1138 }
 0x4a3   :  { %v5416_v1 = vpop.eup %5415  ;;  %5425 = vtanh.f32 %v1153_v11  ;;  %v1304_v57 = vcombine.low %v1152_v5, %v1153_v11  ;;  %v1156_v12 = vadd.f32 %v1139_v13, %v1108_v53  ;;  %v1180_v5 = vrot.slane %v6305_v52, 1 }
 0x4a4   :  { %1198 = vrot.lane.b32.xlu1 %v5416_v1, %s5879_s0  ;;  %v1141_v62 = vpop.permute.xlu0 %1140 }
 0x4a5   :  { %v5418_v63 = vpop.eup %5417  ;;  %v1320_v4 = vrot.slane %v1304_v57, %v6110_v2  ;;  %5427 = vtanh.f32 %v1156_v12  ;;  %v1157_v7 = vadd.f32 %v1141_v62, %v1109_v8 }
 0x4a6   :  { %1200 = vrot.lane.b32.xlu0 %v5418_v63, %s5879_s0 }
 0x4a7   :  { %v5420_v10 = vpop.eup %5419  ;;  %v1335_v60 = vcombine.low %v1313_v51, %v1320_v4  ;;  %5429 = vtanh.f32 %v1157_v7  ;;  %v1306_v18 = vcombine.low %v1156_v12, %v1157_v7 }
 0x4a8   :  { %1206 = vrot.lane.b32.xlu1 %v5420_v10, %s5879_s0 }
 0x4a9   :  { %v5422_v20 = vpop.eup %5421  ;;  %v1334_v22 = vrot.slane %v1306_v18, %v6110_v2  ;;  %v6334_v27 = vrot.slane %v1335_v60, %v6110_v2 }
 0x4aa   :  { %1208 = vrot.lane.b32.xlu0 %v5422_v20, %s5879_s0 }
 0x4ab   :  { %v5424_v23 = vpop.eup %5423  ;;  %v1336_v24 = vcombine.low %v1327_v21, %v1334_v22 }
 0x4ac   :  { %1202 = vrot.lane.b32.xlu1 %v5424_v23, %s5879_s0 }
 0x4ad   :  { %v5426_v25 = vpop.eup %5425  ;;  %v6337_v28 = vrot.slane %v1336_v24, %v6110_v2 }
 0x4ae   :  { %1204 = vrot.lane.b32.xlu0 %v5426_v25, %s5879_s0 }
 0x4af   :  { %v5428_v29 = vpop.eup %5427  ;;  %v1351_v31 = vcombine.low %v6334_v27, %v6337_v28 }
 0x4b0   :  { %1210 = vrot.lane.b32.xlu1 %v5428_v29, %s5879_s0 }
 0x4b1   :  { %v5430_v32 = vpop.eup %5429 }
 0x4b2   :  { %1212 = vrot.lane.b32.xlu0 %v5430_v32, %s5879_s0 }
 0x4b4   :  { %1233 = vperm.xlu1 %5302, %v1231_v33   ;;  %v1357_v33 = vld [vmem:[#allocation2 + $0x2] ss:$8 sm:$0x3] }
 0x516   :  { %v1199_v36 = vpop.permute.xlu1 %1198 }
 0x517   :  { %v1222_v3 = vmul.f32 %v1199_v36, %v1174_v49 }
 0x518   :  { %v1201_v37 = vpop.permute.xlu0 %1200 }
 0x519   :  { %v1223_v53 = vmul.f32 %v1201_v37, %v1175_v46  ;;  %v1367_v46 = vld [vmem:[#allocation2 + $0x52] ss:$8 sm:$0x3] }
 0x51a   :  { %v1207_v40 = vpop.permute.xlu1 %1206 }
 0x51b   :  { %v1226_v11 = vmul.f32 %v1207_v40, %v1178_v58  ;;  %v1244_v12 = vcombine.low %v1222_v3, %v1223_v53  ;;  %v1371_v3 = vld [vmem:[#allocation2 + $0x72] ss:$8 sm:$0x3] }
 0x51c   :  { %v1209_v42 = vpop.permute.xlu0 %1208 }
 0x51d   :  { %v1227_v41 = vmul.f32 %v1209_v42, %v1179_v44  ;;  %v1254_v63 = vrot.slane %v1244_v12, %v6110_v2  ;;  %v1359_v42 = vld [vmem:[#allocation2 + $0x12] ss:$8 sm:$0x3] }
 0x51e   :  { %v1203_v43 = vpop.permute.xlu1 %1202 }
 0x51f   :  { %v1224_v13 = vmul.f32 %v1203_v43, %v1176_v48  ;;  %v1246_v17 = vcombine.low %v1226_v11, %v1227_v41 }
 0x520   :  { %v1205_v45 = vpop.permute.xlu0 %1204 }
 0x521   :  { %v1225_v47 = vmul.f32 %v1205_v45, %v1177_v6  ;;  %v1268_v59 = vrot.slane %v1246_v17, %v6110_v2  ;;  %v1365_v6 = vld [vmem:[#allocation2 + $0x42] ss:$8 sm:$0x3] }
 0x522   :  { %v1211_v38 = vpop.permute.xlu1 %1210 }
 0x523   :  { %v1245_v8 = vcombine.low %v1224_v13, %v1225_v47  ;;  %v1228_v57 = vmul.f32 %v1211_v38, %v1180_v5  ;;  %v1361_v47 = vld [vmem:[#allocation2 + $0x22] ss:$8 sm:$0x3]  ;;  %v1363_v38 = vld [vmem:[#allocation2 + $0x32] ss:$8 sm:$0x3] }
 0x524   :  { %v1213_v1 = vpop.permute.xlu0 %1212  ;;  %v1369_v13 = vld [vmem:[#allocation2 + $0x62] ss:$8 sm:$0x3] }
 0x525   :  { %v1229_v54 = vmul.f32 %v1213_v1, %v1181_v55  ;;  %v1261_v50 = vrot.slane %v1245_v8, %v6110_v2 }
 0x527   :  { %v1247_v62 = vcombine.low %v1228_v57, %v1229_v54  ;;  %v1276_v4 = vcombine.low %v1254_v63, %v1261_v50 }
 0x529   :  { %v1275_v52 = vrot.slane %v1247_v62, %v6110_v2  ;;  %v1284_v7 = vrot.slane %v1276_v4, %v6110_v2 }
 0x52b   :  { %v1277_v51 = vcombine.low %v1268_v59, %v1275_v52 }
 0x52d   :  { %v1291_v16 = vrot.slane %v1277_v51, %v6110_v2 }
 0x52f   :  { %v1292_v60 = vcombine.low %v1284_v7, %v1291_v16 }
 0x533   :  { %v6360_v10 = vpop.permute.xlu1 %1233 }
 0x534   :  { %vm1235_vm8 = vcmp.eq.s32.totalorder %v6360_v10, 1 }
 0x535   :  { %v6366_v18 = vsel %vm1235_vm8, %v1292_v60, %v6226_v61 }
 0x536   :  { %5012 = vmatmul.mubr.msk.f32.vlgmr.msra.gmra.mrb[16].mxu0 %vm281_vm5, %v6366_v18 }
 0x537   :  { %5203 = vmatpush1.bf16.msra.mxu0 %v5977_v14  ;;  %2603 = vmatprep.mubr.f32.mxu0 %v5876_v0 }
 0x538   :  { %5205 = vmatprep.subr.bf16.mxu0 %v5986_v19 }
 0x53b   :  { %5207 = vmatpush1.bf16.msra.mxu0 %v6001_v26 }
 0x53c   :  { %5209 = vmatprep.subr.bf16.mxu0 %v6012_v30 }
 0x53f   :  { %5211 = vmatpush1.bf16.msra.mxu0 %v6026_v34 }
 0x540   :  { %5213 = vmatprep.subr.bf16.mxu0 %v6030_v35 }
 0x543   :  { %5215 = vmatpush1.bf16.msra.mxu0 %v6045_v39 }
 0x544   :  { %5233 = vmatprep.subr.bf16.mxu0 %v5969_v9 }
 0x609   :  { %v1441_v61 = vpop.f32.mrb[16].mxu0 }
 0x60a   :  { %v1443_v20 = vpop.f32.mrb[17].mxu0 }
 0x60b   :  { %v1448_v21 = vcombine.low %v1441_v61, %v1443_v20  ;;  %v1449_v22 = vcombine.high %v1441_v61, %v1443_v20 }
 0x60d   :  { %v1456_v23 = vrot.slane %v1448_v21, %v6110_v2  ;;  %v1463_v24 = vrot.slane %v1449_v22, %v6110_v2 }
 0x60f   :  { %v1464_v25 = vcombine.high %v1456_v23, %v1456_v23  ;;  %v1465_v29 = vcombine.high %v1463_v24, %v1463_v24  ;;  %v1472_v32 = vrot.slane %v1456_v23, %v6110_v2  ;;  %v1479_v36 = vrot.slane %v1463_v24, %v6110_v2 }
 0x611   :  { %v1506_v37 = vadd.f32 %v1472_v32, %v1357_v33  ;;  %v1486_v40 = vrot.slane %v1464_v25, %v6110_v2  ;;  %v1493_v44 = vrot.slane %v1465_v29, %v6110_v2  ;;  %v1510_v58 = vadd.f32 %v1479_v36, %v1365_v6 }
 0x612   :  { %v1494_v45 = vcombine.high %v1472_v32, %v1472_v32  ;;  %v1495_v5 = vcombine.high %v1479_v36, %v1479_v36 }
 0x613   :  { %1570 = vrot.lane.b32.xlu0 %v1506_v37, %s5879_s0  ;;  %v1507_v43 = vadd.f32 %v1486_v40, %v1359_v42  ;;  %v1511_v41 = vadd.f32 %v1493_v44, %v1367_v46  ;;  %v1496_v48 = vcombine.high %v1486_v40, %v1486_v40  ;;  %v1497_v11 = vcombine.high %v1493_v44, %v1493_v44 }
 0x614   :  { %v1508_v49 = vadd.f32 %v1494_v45, %v1361_v47  ;;  %v1512_v55 = vadd.f32 %v1495_v5, %v1369_v13  ;;  %v5013_v8 = vmul.f32 -1.442695, %v1506_v37  ;;  %v5017_v12 = vmul.f32 -1.442695, %v1510_v58 }
 0x615   :  { %1572 = vrot.lane.b32.xlu1 %v1507_v43, %s5879_s0  ;;  %v1509_v53 = vadd.f32 %v1496_v48, %v1363_v38  ;;  %v1513_v1 = vadd.f32 %v1497_v11, %v1371_v3  ;;  %v5014_v54 = vmul.f32 -1.442695, %v1507_v43  ;;  %v5018_v59 = vmul.f32 -1.442695, %v1511_v41 }
 0x616   :  { %5431 = vpow2.f32 %v5013_v8  ;;  %v5015_v50 = vmul.f32 -1.442695, %v1508_v49  ;;  %v5019_v27 = vmul.f32 -1.442695, %v1512_v55 }
 0x617   :  { %1578 = vrot.lane.b32.xlu0 %v1510_v58, %s5879_s0  ;;  %5433 = vpow2.f32 %v5014_v54  ;;  %v5016_v51 = vmul.f32 -1.442695, %v1509_v53  ;;  %v5020_v16 = vmul.f32 -1.442695, %v1513_v1 }
 0x618   :  { %5435 = vpow2.f32 %v5017_v12 }
 0x619   :  { %1580 = vrot.lane.b32.xlu1 %v1511_v41, %s5879_s0  ;;  %5437 = vpow2.f32 %v5018_v59 }
 0x61a   :  { %5439 = vpow2.f32 %v5015_v50 }
 0x61b   :  { %1574 = vrot.lane.b32.xlu0 %v1508_v49, %s5879_s0  ;;  %5441 = vpow2.f32 %v5016_v51 }
 0x61c   :  { %5443 = vpow2.f32 %v5019_v27 }
 0x61d   :  { %1576 = vrot.lane.b32.xlu1 %v1509_v53, %s5879_s0  ;;  %5445 = vpow2.f32 %v5020_v16 }
 0x61f   :  { %1582 = vrot.lane.b32.xlu0 %v1512_v55, %s5879_s0 }
 0x621   :  { %1584 = vrot.lane.b32.xlu1 %v1513_v1, %s5879_s0 }
 0x623   :  { %1352 = vrot.lane.b32.xlu0 %v1351_v31, %s5879_s0  ;;  %v5432_v31 = vpop.eup %5431 }
 0x624   :  { %v5434_v20 = vpop.eup %5433  ;;  %v1538_v22 = vadd.f32 1.0, %v5432_v31 }
 0x625   :  { %v5436_v25 = vpop.eup %5435  ;;  %v1539_v10 = vadd.f32 1.0, %v5434_v20 }
 0x626   :  { %v5438_v33 = vpop.eup %5437  ;;  %v1542_v37 = vadd.f32 1.0, %v5436_v25 }
 0x627   :  { %v5440_v43 = vpop.eup %5439  ;;  %v1543_v6 = vadd.f32 1.0, %v5438_v33 }
 0x628   :  { %v5442_v46 = vpop.eup %5441  ;;  %v1540_v48 = vadd.f32 1.0, %v5440_v43 }
 0x629   :  { %v5444_v49 = vpop.eup %5443  ;;  %v1541_v38 = vadd.f32 1.0, %v5442_v46 }
 0x62a   :  { %v5446_v55 = vpop.eup %5445  ;;  %v1544_v3 = vadd.f32 1.0, %v5444_v49 }
 0x685   :  { %v1571_v17 = vpop.permute.xlu0 %1570 }
 0x686   :  { %v1586_v21 = vrot.slane %v1571_v17, 1 }
 0x687   :  { %v1573_v52 = vpop.permute.xlu1 %1572 }
 0x688   :  { %v1587_v29 = vrot.slane %v1573_v52, 1  ;;  %5447 = vtanh.f32 %v1586_v21 }
 0x689   :  { %v1579_v57 = vpop.permute.xlu0 %1578  ;;  %5449 = vrcp.f32 %v1538_v22 }
 0x68a   :  { %v1590_v36 = vrot.slane %v1579_v57, 1  ;;  %5451 = vtanh.f32 %v1587_v29 }
 0x68b   :  { %v1581_v7 = vpop.permute.xlu1 %1580  ;;  %5453 = vrcp.f32 %v1539_v10 }
 0x68c   :  { %v1591_v44 = vrot.slane %v1581_v7, 1  ;;  %5455 = vtanh.f32 %v1590_v36 }
 0x68d   :  { %v6397_v62 = vpop.permute.xlu0 %1574  ;;  %5457 = vrcp.f32 %v1542_v37 }
 0x68e   :  { %v1588_v41 = vrot.slane %v6397_v62, 1  ;;  %5459 = vtanh.f32 %v1591_v44  ;;  %v1545_v62 = vadd.f32 1.0, %v5446_v55 }
 0x68f   :  { %v1577_v40 = vpop.permute.xlu1 %1576  ;;  %5461 = vrcp.f32 %v1543_v6 }
 0x690   :  { %v1589_v5 = vrot.slane %v1577_v40, 1  ;;  %5463 = vtanh.f32 %v1588_v41 }
 0x691   :  { %v6399_v63 = vpop.permute.xlu0 %1582  ;;  %5465 = vrcp.f32 %v1540_v48 }
 0x692   :  { %v1592_v13 = vrot.slane %v6399_v63, 1  ;;  %v5448_v17 = vpop.eup %5447  ;;  %5467 = vtanh.f32 %v1589_v5 }
 0x693   :  { %v1585_v53 = vpop.permute.xlu1 %1584  ;;  %v6423_v57 = vpop.eup %5449  ;;  %5469 = vrcp.f32 %v1541_v38 }
 0x694   :  { %v1593_v8 = vrot.slane %v1585_v53, 1  ;;  %v5452_v12 = vpop.eup %5451  ;;  %5471 = vtanh.f32 %v1592_v13  ;;  %v1692_v50 = vmul.f32 %v6423_v57, %v5448_v17 }
 0x695   :  { %v1353_v28 = vpop.permute.xlu0 %1352  ;;  %v6426_v59 = vpop.eup %5453  ;;  %5473 = vrcp.f32 %v1544_v3 }
 0x696   :  { %v6404_v4 = vsel %vm1235_vm8, %v1353_v28, %v6263_v56  ;;  %v5456_v52 = vpop.eup %5455  ;;  %5475 = vtanh.f32 %v1593_v8  ;;  %v1693_v51 = vmul.f32 %v6426_v59, %v5452_v12  ;;  %vm4966_vm8 = vcmask 23552  }
 0x697   :  { %v1611_v60 = vcombine.high %v6404_v4, %v6404_v4  ;;  %v1618_v61 = vrot.slane %v6404_v4, %v6110_v2  ;;  %v6430_v63 = vpop.eup %5457  ;;  %5477 = vrcp.f32 %v1545_v62 }
 0x698   :  { %v5460_v27 = vpop.eup %5459  ;;  %v1696_v31 = vmul.f32 %v6430_v63, %v5456_v52 }
 0x699   :  { %v1634_v23 = vrot.slane %v1618_v61, %v6110_v2  ;;  %v1626_v24 = vcombine.high %v1618_v61, %v1618_v61  ;;  %v1625_v32 = vrot.slane %v1611_v60, %v6110_v2  ;;  %v6434_v28 = vpop.eup %5461 }
 0x69a   :  { %v5464_v16 = vpop.eup %5463  ;;  %v1697_v60 = vmul.f32 %v6434_v28, %v5460_v27 }
 0x69b   :  { %1660 = vrot.lane.b32.xlu1 %v1634_v23, %s5879_s0  ;;  %v1648_v56 = vrot.slane %v1626_v24, %v6110_v2  ;;  %v1656_v42 = vcombine.high %v1634_v23, %v1634_v23  ;;  %v1627_v45 = vcombine.high %v1625_v32, %v1625_v32  ;;  %v1641_v47 = vrot.slane %v1625_v32, %v6110_v2  ;;  %v6438_v7 = vpop.eup %5465 }
 0x69c   :  { %v5468_v61 = vpop.eup %5467  ;;  %v1694_v21 = vmul.f32 %v6438_v7, %v5464_v16 }
 0x69d   :  { %1662 = vrot.lane.b32.xlu0 %v1648_v56, %s5879_s0  ;;  %v1658_v58 = vcombine.high %v1648_v56, %v1648_v56  ;;  %v1655_v11 = vrot.slane %v1627_v45, %v6110_v2  ;;  %v1657_v1 = vcombine.high %v1641_v47, %v1641_v47  ;;  %v6442_v20 = vpop.eup %5469 }
 0x69e   :  { %v5472_v22 = vpop.eup %5471  ;;  %v1695_v24 = vmul.f32 %v6442_v20, %v5468_v61 }
 0x69f   :  { %1664 = vrot.lane.b32.xlu1 %v1656_v42, %s5879_s0  ;;  %v1659_v54 = vcombine.high %v1655_v11, %v1655_v11  ;;  %v6446_v23 = vpop.eup %5473 }
 0x6a0   :  { %v5476_v25 = vpop.eup %5475  ;;  %v1698_v29 = vmul.f32 %v6446_v23, %v5472_v22 }
 0x6a1   :  { %1666 = vrot.lane.b32.xlu0 %v1658_v58, %s5879_s0  ;;  %v6452_v10 = vpop.eup %5477 }
 0x6a2   :  { %v1699_v56 = vmul.f32 %v6452_v10, %v5476_v25 }
 0x6a3   :  { %1668 = vrot.lane.b32.xlu1 %v1641_v47, %s5879_s0 }
 0x6a5   :  { %1670 = vrot.lane.b32.xlu0 %v1655_v11, %s5879_s0 }
 0x6a7   :  { %1672 = vrot.lane.b32.xlu1 %v1657_v1, %s5879_s0 }
 0x6a9   :  { %1674 = vrot.lane.b32.xlu0 %v1659_v54, %s5879_s0 }
 0x6ab   :  { %1708 = vrot.lane.b32.xlu1 %v1692_v50, %s5879_s0 }
 0x6ad   :  { %1710 = vrot.lane.b32.xlu0 %v1693_v51, %s5879_s0 }
 0x6af   :  { %1716 = vrot.lane.b32.xlu1 %v1696_v31, %s5879_s0 }
 0x6b1   :  { %1718 = vrot.lane.b32.xlu0 %v1697_v60, %s5879_s0 }
 0x6b3   :  { %1712 = vrot.lane.b32.xlu1 %v1694_v21, %s5879_s0 }
 0x6b5   :  { %1714 = vrot.lane.b32.xlu0 %v1695_v24, %s5879_s0 }
 0x6b7   :  { %1720 = vrot.lane.b32.xlu1 %v1698_v29, %s5879_s0 }
 0x6b9   :  { %1722 = vrot.lane.b32.xlu0 %v1699_v56, %s5879_s0 }
 0x70d   :  { %v1661_v32 = vpop.permute.xlu1 %1660 }
 0x70e   :  { %v1684_v6 = vmul.f32 %v6423_v57, %v1661_v32 }
 0x70f   :  { %v1663_v33 = vpop.permute.xlu0 %1662 }
 0x710   :  { %v1685_v45 = vmul.f32 %v6426_v59, %v1663_v33 }
 0x711   :  { %v1665_v36 = vpop.permute.xlu1 %1664 }
 0x712   :  { %v1686_v13 = vmul.f32 %v6438_v7, %v1665_v36 }
 0x713   :  { %v1667_v37 = vpop.permute.xlu0 %1666 }
 0x714   :  { %v1687_v1 = vmul.f32 %v6442_v20, %v1667_v37 }
 0x715   :  { %v1669_v40 = vpop.permute.xlu1 %1668 }
 0x716   :  { %v1688_v48 = vmul.f32 %v6430_v63, %v1669_v40 }
 0x717   :  { %v1671_v42 = vpop.permute.xlu0 %1670 }
 0x718   :  { %v1689_v5 = vmul.f32 %v6434_v28, %v1671_v42 }
 0x719   :  { %v1673_v43 = vpop.permute.xlu1 %1672 }
 0x71a   :  { %v1690_v12 = vmul.f32 %v6446_v23, %v1673_v43 }
 0x71b   :  { %v1675_v44 = vpop.permute.xlu0 %1674 }
 0x71c   :  { %v1691_v51 = vmul.f32 %v6452_v10, %v1675_v44  ;;  %v6484_v44 = vld [vmem:[%s7226_s1] sm:$0xff] }
 0x71d   :  { %v1709_v58 = vpop.permute.xlu1 %1708  ;;  %vm1812_vm9 = vcmp.gt.s32.totalorder %v6484_v44, 2  ;;  %vm2394_vm11 = vcmp.gt.s32.totalorder %v6484_v44, 3 }
 0x71e   :  { %v1732_v46 = vadd.f32 %v1709_v58, %v1684_v6 }
 0x71f   :  { %v1711_v41 = vpop.permute.xlu0 %1710 }
 0x720   :  { %5479 = vtanh.f32 %v1732_v46  ;;  %v1733_v47 = vadd.f32 %v1711_v41, %v1685_v45 }
 0x721   :  { %v1717_v49 = vpop.permute.xlu1 %1716 }
 0x722   :  { %5481 = vtanh.f32 %v1733_v47  ;;  %v1885_v38 = vcombine.low %v1732_v46, %v1733_v47  ;;  %v1736_v53 = vadd.f32 %v1717_v49, %v1688_v48  ;;  %v1813_v46 = vsel %vm1812_vm9, 1, %v5880_v15 }
 0x723   :  { %v1719_v11 = vpop.permute.xlu0 %1718 }
 0x724   :  { %5483 = vtanh.f32 %v1736_v53  ;;  %v1737_v55 = vadd.f32 %v1719_v11, %v1689_v5  ;;  %v1895_v61 = vrot.slane %v1885_v38, %v6110_v2  ;;  %v1761_v38 = vrot.slane %v6434_v28, 1 }
 0x725   :  { %v1713_v3 = vpop.permute.xlu1 %1712  ;;  %v1760_v11 = vrot.slane %v6430_v63, 1  ;;  %v1763_v28 = vrot.slane %v6452_v10, 1 }
 0x726   :  { %5485 = vtanh.f32 %v1737_v55  ;;  %v1887_v17 = vcombine.low %v1736_v53, %v1737_v55  ;;  %v1734_v8 = vadd.f32 %v1713_v3, %v1686_v13  ;;  %v1759_v53 = vrot.slane %v6442_v20, 1 }
 0x727   :  { %v1715_v54 = vpop.permute.xlu0 %1714  ;;  %v1757_v55 = vrot.slane %v6426_v59, 1 }
 0x728   :  { %5487 = vtanh.f32 %v1734_v8  ;;  %v1735_v62 = vadd.f32 %v1715_v54, %v1687_v1  ;;  %v1909_v32 = vrot.slane %v1887_v17, %v6110_v2  ;;  %v1758_v1 = vrot.slane %v6438_v7, 1 }
 0x729   :  { %v1721_v50 = vpop.permute.xlu1 %1720  ;;  %v1762_v54 = vrot.slane %v6446_v23, 1 }
 0x72a   :  { %v5480_v52 = vpop.eup %5479  ;;  %5489 = vtanh.f32 %v1735_v62  ;;  %v1886_v27 = vcombine.low %v1734_v8, %v1735_v62  ;;  %v1738_v31 = vadd.f32 %v1721_v50, %v1690_v12  ;;  %v1756_v8 = vrot.slane %v6423_v57, 1 }
 0x72b   :  { %1780 = vrot.lane.b32.xlu1 %v5480_v52, %s5879_s0  ;;  %v1723_v16 = vpop.permute.xlu0 %1722 }
 0x72c   :  { %v5482_v60 = vpop.eup %5481  ;;  %v1902_v21 = vrot.slane %v1886_v27, %v6110_v2  ;;  %5491 = vtanh.f32 %v1738_v31  ;;  %v1739_v22 = vadd.f32 %v1723_v16, %v1691_v51 }
 0x72d   :  { %1782 = vrot.lane.b32.xlu0 %v5482_v60, %s5879_s0 }
 0x72e   :  { %v5484_v24 = vpop.eup %5483  ;;  %v1917_v25 = vcombine.low %v1895_v61, %v1902_v21  ;;  %5493 = vtanh.f32 %v1739_v22  ;;  %v1888_v29 = vcombine.low %v1738_v31, %v1739_v22 }
 0x72f   :  { %1788 = vrot.lane.b32.xlu1 %v5484_v24, %s5879_s0 }
 0x730   :  { %v5486_v56 = vpop.eup %5485  ;;  %v1916_v33 = vrot.slane %v1888_v29, %v6110_v2  ;;  %v6475_v42 = vrot.slane %v1917_v25, %v6110_v2 }
 0x731   :  { %1790 = vrot.lane.b32.xlu0 %v5486_v56, %s5879_s0 }
 0x732   :  { %v5488_v36 = vpop.eup %5487  ;;  %v1918_v37 = vcombine.low %v1909_v32, %v1916_v33 }
 0x733   :  { %1784 = vrot.lane.b32.xlu1 %v5488_v36, %s5879_s0 }
 0x734   :  { %v5490_v40 = vpop.eup %5489  ;;  %v6478_v43 = vrot.slane %v1918_v37, %v6110_v2 }
 0x735   :  { %1786 = vrot.lane.b32.xlu0 %v5490_v40, %s5879_s0 }
 0x736   :  { %v5492_v6 = vpop.eup %5491  ;;  %v1933_v58 = vcombine.low %v6475_v42, %v6478_v43 }
 0x737   :  { %1792 = vrot.lane.b32.xlu1 %v5492_v6, %s5879_s0 }
 0x738   :  { %v5494_v45 = vpop.eup %5493 }
 0x739   :  { %1794 = vrot.lane.b32.xlu0 %v5494_v45, %s5879_s0 }
 0x73b   :  { %1815 = vperm.xlu1 %5302, %v1813_v46  }
 0x79d   :  { %v1781_v41 = vpop.permute.xlu1 %1780 }
 0x79e   :  { %v1804_v20 = vmul.f32 %v1781_v41, %v1756_v8  ;;  %v1939_v41 = vld [vmem:[#allocation2 + $0x3] ss:$8 sm:$0x3] }
 0x79f   :  { %v1783_v48 = vpop.permute.xlu0 %1782 }
 0x7a0   :  { %v1805_v62 = vmul.f32 %v1783_v48, %v1757_v55  ;;  %v1949_v55 = vld [vmem:[#allocation2 + $0x53] ss:$8 sm:$0x3] }
 0x7a1   :  { %v1789_v47 = vpop.permute.xlu1 %1788 }
 0x7a2   :  { %v1808_v50 = vmul.f32 %v1789_v47, %v1760_v11  ;;  %v1826_v16 = vcombine.low %v1804_v20, %v1805_v62  ;;  %v1953_v20 = vld [vmem:[#allocation2 + $0x73] ss:$8 sm:$0x3] }
 0x7a3   :  { %v1791_v49 = vpop.permute.xlu0 %1790 }
 0x7a4   :  { %v1809_v3 = vmul.f32 %v1791_v49, %v1761_v38  ;;  %v1836_v61 = vrot.slane %v1826_v16, %v6110_v2 }
 0x7a5   :  { %v1785_v5 = vpop.permute.xlu1 %1784 }
 0x7a6   :  { %v1806_v52 = vmul.f32 %v1785_v5, %v1758_v1  ;;  %v1828_v63 = vcombine.low %v1808_v50, %v1809_v3  ;;  %v1941_v5 = vld [vmem:[#allocation2 + $0x13] ss:$8 sm:$0x3] }
 0x7a7   :  { %v1787_v13 = vpop.permute.xlu0 %1786 }
 0x7a8   :  { %v1807_v17 = vmul.f32 %v1787_v13, %v1759_v53  ;;  %v1850_v7 = vrot.slane %v1828_v63, %v6110_v2  ;;  %v1947_v53 = vld [vmem:[#allocation2 + $0x43] ss:$8 sm:$0x3] }
 0x7a9   :  { %v1793_v12 = vpop.permute.xlu1 %1792 }
 0x7aa   :  { %v1827_v27 = vcombine.low %v1806_v52, %v1807_v17  ;;  %v1810_v31 = vmul.f32 %v1793_v12, %v1762_v54  ;;  %v1943_v17 = vld [vmem:[#allocation2 + $0x23] ss:$8 sm:$0x3]  ;;  %v1945_v12 = vld [vmem:[#allocation2 + $0x33] ss:$8 sm:$0x3] }
 0x7ab   :  { %v1795_v51 = vpop.permute.xlu0 %1794  ;;  %v1951_v52 = vld [vmem:[#allocation2 + $0x63] ss:$8 sm:$0x3] }
 0x7ac   :  { %v1811_v59 = vmul.f32 %v1795_v51, %v1763_v28  ;;  %v1843_v57 = vrot.slane %v1827_v27, %v6110_v2 }
 0x7ae   :  { %v1829_v60 = vcombine.low %v1810_v31, %v1811_v59  ;;  %v1858_v22 = vcombine.low %v1836_v61, %v1843_v57 }
 0x7b0   :  { %v1857_v23 = vrot.slane %v1829_v60, %v6110_v2  ;;  %v1866_v24 = vrot.slane %v1858_v22, %v6110_v2 }
 0x7b2   :  { %v1859_v21 = vcombine.low %v1850_v7, %v1857_v23 }
 0x7b4   :  { %v1873_v10 = vrot.slane %v1859_v21, %v6110_v2 }
 0x7b6   :  { %v1874_v29 = vcombine.low %v1866_v24, %v1873_v10 }
 0x7ba   :  { %v6506_v25 = vpop.permute.xlu1 %1815 }
 0x7bb   :  { %vm1817_vm10 = vcmp.eq.s32.totalorder %v6506_v25, 1 }
 0x7bc   :  { %v6512_v56 = vsel %vm1817_vm10, %v1874_v29, %v6366_v18 }
 0x7bd   :  { %5021 = vmatmul.mubr.msk.f32.vlgmr.msra.gmra.mrb[4].mxu1 %vm281_vm5, %v6512_v56 }
 0x7be   :  { %5219 = vmatpush1.bf16.msra.mxu1 %v5977_v14  ;;  %3185 = vmatprep.mubr.f32.mxu1 %v5876_v0 }
 0x7bf   :  { %5221 = vmatprep.subr.bf16.mxu1 %v5986_v19 }
 0x7c2   :  { %5223 = vmatpush1.bf16.msra.mxu1 %v6001_v26 }
 0x7c3   :  { %5225 = vmatprep.subr.bf16.mxu1 %v6012_v30 }
 0x7c6   :  { %5227 = vmatpush1.bf16.msra.mxu1 %v6026_v34 }
 0x7c7   :  { %5229 = vmatprep.subr.bf16.mxu1 %v6030_v35 }
 0x7ca   :  { %5231 = vmatpush1.bf16.msra.mxu1 %v6045_v39 }
 0x7cb   :  { %5249 = vmatprep.subr.bf16.mxu1 %v5969_v9 }
 0x890   :  { %v2023_v18 = vpop.f32.mrb[4].mxu1 }
 0x891   :  { %v2025_v32 = vpop.f32.mrb[5].mxu1 }
 0x892   :  { %v2030_v33 = vcombine.low %v2023_v18, %v2025_v32  ;;  %v2031_v36 = vcombine.high %v2023_v18, %v2025_v32 }
 0x894   :  { %v2038_v37 = vrot.slane %v2030_v33, %v6110_v2  ;;  %v2045_v40 = vrot.slane %v2031_v36, %v6110_v2 }
 0x896   :  { %v2046_v6 = vcombine.high %v2038_v37, %v2038_v37  ;;  %v2047_v45 = vcombine.high %v2045_v40, %v2045_v40  ;;  %v2054_v46 = vrot.slane %v2038_v37, %v6110_v2  ;;  %v2061_v48 = vrot.slane %v2045_v40, %v6110_v2 }
 0x898   :  { %v2088_v47 = vadd.f32 %v2054_v46, %v1939_v41  ;;  %v2068_v49 = vrot.slane %v2046_v6, %v6110_v2  ;;  %v2075_v38 = vrot.slane %v2047_v45, %v6110_v2  ;;  %v2092_v11 = vadd.f32 %v2061_v48, %v1947_v53 }
 0x899   :  { %v2076_v13 = vcombine.high %v2054_v46, %v2054_v46  ;;  %v2077_v8 = vcombine.high %v2061_v48, %v2061_v48 }
 0x89a   :  { %2152 = vrot.lane.b32.xlu0 %v2088_v47, %s5879_s0  ;;  %v2089_v9 = vadd.f32 %v2068_v49, %v1941_v5  ;;  %v2078_v3 = vcombine.high %v2068_v49, %v2068_v49  ;;  %v2093_v1 = vadd.f32 %v2075_v38, %v1949_v55  ;;  %v2079_v62 = vcombine.high %v2075_v38, %v2075_v38 }
 0x89b   :  { %v2090_v54 = vadd.f32 %v2076_v13, %v1943_v17  ;;  %v2094_v28 = vadd.f32 %v2077_v8, %v1951_v52  ;;  %v5022_v27 = vmul.f32 -1.442695, %v2088_v47  ;;  %v5026_v16 = vmul.f32 -1.442695, %v2092_v11 }
 0x89c   :  { %2154 = vrot.lane.b32.xlu1 %v2089_v9, %s5879_s0  ;;  %v2091_v50 = vadd.f32 %v2078_v3, %v1945_v12  ;;  %v2095_v51 = vadd.f32 %v2079_v62, %v1953_v20  ;;  %v5023_v59 = vmul.f32 -1.442695, %v2089_v9  ;;  %v5027_v7 = vmul.f32 -1.442695, %v2093_v1 }
 0x89d   :  { %5495 = vpow2.f32 %v5022_v27  ;;  %v5024_v57 = vmul.f32 -1.442695, %v2090_v54  ;;  %v5028_v42 = vmul.f32 -1.442695, %v2094_v28 }
 0x89e   :  { %2160 = vrot.lane.b32.xlu0 %v2092_v11, %s5879_s0  ;;  %5497 = vpow2.f32 %v5023_v59  ;;  %v5025_v21 = vmul.f32 -1.442695, %v2091_v50  ;;  %v5029_v10 = vmul.f32 -1.442695, %v2095_v51 }
 0x89f   :  { %5499 = vpow2.f32 %v5026_v16 }
 0x8a0   :  { %2162 = vrot.lane.b32.xlu1 %v2093_v1, %s5879_s0  ;;  %5501 = vpow2.f32 %v5027_v7 }
 0x8a1   :  { %5503 = vpow2.f32 %v5024_v57 }
 0x8a2   :  { %2156 = vrot.lane.b32.xlu0 %v2090_v54, %s5879_s0  ;;  %5505 = vpow2.f32 %v5025_v21 }
 0x8a3   :  { %5507 = vpow2.f32 %v5028_v42 }
 0x8a4   :  { %2158 = vrot.lane.b32.xlu1 %v2091_v50, %s5879_s0  ;;  %5509 = vpow2.f32 %v5029_v10 }
 0x8a6   :  { %2164 = vrot.lane.b32.xlu0 %v2094_v28, %s5879_s0 }
 0x8a8   :  { %2166 = vrot.lane.b32.xlu1 %v2095_v51, %s5879_s0 }
 0x8aa   :  { %1934 = vrot.lane.b32.xlu0 %v1933_v58, %s5879_s0  ;;  %v5496_v58 = vpop.eup %5495 }
 0x8ab   :  { %v5498_v32 = vpop.eup %5497  ;;  %v2120_v36 = vadd.f32 1.0, %v5496_v58 }
 0x8ac   :  { %v5500_v6 = vpop.eup %5499  ;;  %v2121_v25 = vadd.f32 1.0, %v5498_v32 }
 0x8ad   :  { %v5502_v41 = vpop.eup %5501  ;;  %v2124_v47 = vadd.f32 1.0, %v5500_v6 }
 0x8ae   :  { %v5504_v9 = vpop.eup %5503  ;;  %v2125_v53 = vadd.f32 1.0, %v5502_v41 }
 0x8af   :  { %v5506_v55 = vpop.eup %5505  ;;  %v2122_v1 = vadd.f32 1.0, %v5504_v9 }
 0x8b0   :  { %v5508_v8 = vpop.eup %5507  ;;  %v2123_v12 = vadd.f32 1.0, %v5506_v55 }
 0x8b1   :  { %v5510_v28 = vpop.eup %5509  ;;  %v2126_v20 = vadd.f32 1.0, %v5508_v8 }
 0x90c   :  { %v2153_v63 = vpop.permute.xlu0 %2152 }
 0x90d   :  { %v2168_v33 = vrot.slane %v2153_v63, 1 }
 0x90e   :  { %v2155_v23 = vpop.permute.xlu1 %2154 }
 0x90f   :  { %v2169_v45 = vrot.slane %v2155_v23, 1  ;;  %5511 = vtanh.f32 %v2168_v33 }
 0x910   :  { %v2161_v31 = vpop.permute.xlu0 %2160  ;;  %5513 = vrcp.f32 %v2120_v36 }
 0x911   :  { %v2172_v48 = vrot.slane %v2161_v31, 1  ;;  %5515 = vtanh.f32 %v2169_v45 }
 0x912   :  { %v2163_v24 = vpop.permute.xlu1 %2162  ;;  %5517 = vrcp.f32 %v2121_v25 }
 0x913   :  { %v2173_v38 = vrot.slane %v2163_v24, 1  ;;  %5519 = vtanh.f32 %v2172_v48 }
 0x914   :  { %v6543_v60 = vpop.permute.xlu0 %2156  ;;  %5521 = vrcp.f32 %v2124_v47 }
 0x915   :  { %v2170_v3 = vrot.slane %v6543_v60, 1  ;;  %5523 = vtanh.f32 %v2173_v38  ;;  %v2127_v60 = vadd.f32 1.0, %v5510_v28 }
 0x916   :  { %v2159_v49 = vpop.permute.xlu1 %2158  ;;  %5525 = vrcp.f32 %v2125_v53 }
 0x917   :  { %v2171_v54 = vrot.slane %v2159_v49, 1  ;;  %5527 = vtanh.f32 %v2170_v3 }
 0x918   :  { %v6545_v61 = vpop.permute.xlu0 %2164  ;;  %5529 = vrcp.f32 %v2122_v1 }
 0x919   :  { %v2174_v52 = vrot.slane %v6545_v61, 1  ;;  %v5512_v63 = vpop.eup %5511  ;;  %5531 = vtanh.f32 %v2171_v54 }
 0x91a   :  { %v2167_v62 = vpop.permute.xlu1 %2166  ;;  %v6569_v31 = vpop.eup %5513  ;;  %5533 = vrcp.f32 %v2123_v12 }
 0x91b   :  { %v2175_v27 = vrot.slane %v2167_v62, 1  ;;  %v5516_v16 = vpop.eup %5515  ;;  %5535 = vtanh.f32 %v2174_v52  ;;  %v2274_v57 = vmul.f32 %v6569_v31, %v5512_v63 }
 0x91c   :  { %v1935_v43 = vpop.permute.xlu0 %1934  ;;  %v6572_v7 = vpop.eup %5517  ;;  %5537 = vrcp.f32 %v2126_v20 }
 0x91d   :  { %v6550_v22 = vsel %vm1817_vm10, %v1935_v43, %v6404_v4  ;;  %v5520_v23 = vpop.eup %5519  ;;  %5539 = vtanh.f32 %v2175_v27  ;;  %v2275_v21 = vmul.f32 %v6572_v7, %v5516_v16 }
 0x91e   :  { %v2193_v29 = vcombine.high %v6550_v22, %v6550_v22  ;;  %v2200_v18 = vrot.slane %v6550_v22, %v6110_v2  ;;  %v6576_v61 = vpop.eup %5521  ;;  %5541 = vrcp.f32 %v2127_v60 }
 0x91f   :  { %v5524_v42 = vpop.eup %5523  ;;  %v2278_v58 = vmul.f32 %v6576_v61, %v5520_v23 }
 0x920   :  { %v2208_v37 = vcombine.high %v2200_v18, %v2200_v18  ;;  %v2216_v40 = vrot.slane %v2200_v18, %v6110_v2  ;;  %v2207_v4 = vrot.slane %v2193_v29, %v6110_v2  ;;  %v6580_v43 = vpop.eup %5525 }
 0x921   :  { %v5528_v10 = vpop.eup %5527  ;;  %v2279_v29 = vmul.f32 %v6580_v43, %v5524_v42 }
 0x922   :  { %2242 = vrot.lane.b32.xlu1 %v2216_v40, %s5879_s0  ;;  %v2230_v46 = vrot.slane %v2208_v37, %v6110_v2  ;;  %v2238_v5 = vcombine.high %v2216_v40, %v2216_v40  ;;  %v2209_v11 = vcombine.high %v2207_v4, %v2207_v4  ;;  %v2223_v17 = vrot.slane %v2207_v4, %v6110_v2  ;;  %v6584_v24 = vpop.eup %5529 }
 0x923   :  { %v5532_v18 = vpop.eup %5531  ;;  %v2276_v33 = vmul.f32 %v6584_v24, %v5528_v10 }
 0x924   :  { %2244 = vrot.lane.b32.xlu0 %v2230_v46, %s5879_s0  ;;  %v2240_v13 = vcombine.high %v2230_v46, %v2230_v46  ;;  %v2237_v50 = vrot.slane %v2209_v11, %v6110_v2  ;;  %v2239_v51 = vcombine.high %v2223_v17, %v2223_v17  ;;  %v6588_v32 = vpop.eup %5533 }
 0x925   :  { %v5536_v36 = vpop.eup %5535  ;;  %v2277_v40 = vmul.f32 %v6588_v32, %v5532_v18  ;;  %v2341_v44 = vrot.slane %v6588_v32, 1 }
 0x926   :  { %2246 = vrot.lane.b32.xlu1 %v2238_v5, %s5879_s0  ;;  %v2241_v59 = vcombine.high %v2237_v50, %v2237_v50  ;;  %v6592_v37 = vpop.eup %5537 }
 0x927   :  { %v5540_v6 = vpop.eup %5539  ;;  %v2280_v45 = vmul.f32 %v6592_v37, %v5536_v36 }
 0x928   :  { %2248 = vrot.lane.b32.xlu0 %v2240_v13, %s5879_s0  ;;  %v6598_v25 = vpop.eup %5541 }
 0x929   :  { %v2281_v4 = vmul.f32 %v6598_v25, %v5540_v6 }
 0x92a   :  { %2250 = vrot.lane.b32.xlu1 %v2223_v17, %s5879_s0 }
 0x92c   :  { %2252 = vrot.lane.b32.xlu0 %v2237_v50, %s5879_s0 }
 0x92e   :  { %2254 = vrot.lane.b32.xlu1 %v2239_v51, %s5879_s0 }
 0x930   :  { %2256 = vrot.lane.b32.xlu0 %v2241_v59, %s5879_s0 }
 0x932   :  { %2290 = vrot.lane.b32.xlu1 %v2274_v57, %s5879_s0 }
 0x934   :  { %2292 = vrot.lane.b32.xlu0 %v2275_v21, %s5879_s0 }
 0x936   :  { %2298 = vrot.lane.b32.xlu1 %v2278_v58, %s5879_s0 }
 0x938   :  { %2300 = vrot.lane.b32.xlu0 %v2279_v29, %s5879_s0 }
 0x93a   :  { %2294 = vrot.lane.b32.xlu1 %v2276_v33, %s5879_s0 }
 0x93c   :  { %2296 = vrot.lane.b32.xlu0 %v2277_v40, %s5879_s0 }
 0x93e   :  { %2302 = vrot.lane.b32.xlu1 %v2280_v45, %s5879_s0 }
 0x940   :  { %2304 = vrot.lane.b32.xlu0 %v2281_v4, %s5879_s0 }
 0x994   :  { %v2243_v46 = vpop.permute.xlu1 %2242 }
 0x995   :  { %v2266_v53 = vmul.f32 %v6569_v31, %v2243_v46 }
 0x996   :  { %v2245_v41 = vpop.permute.xlu0 %2244 }
 0x997   :  { %v2267_v13 = vmul.f32 %v6572_v7, %v2245_v41 }
 0x998   :  { %v2247_v48 = vpop.permute.xlu1 %2246 }
 0x999   :  { %v2268_v52 = vmul.f32 %v6584_v24, %v2247_v48 }
 0x99a   :  { %v2249_v47 = vpop.permute.xlu0 %2248 }
 0x99b   :  { %v2269_v51 = vmul.f32 %v6588_v32, %v2249_v47 }
 0x99c   :  { %v2251_v49 = vpop.permute.xlu1 %2250 }
 0x99d   :  { %v2270_v1 = vmul.f32 %v6576_v61, %v2251_v49 }
 0x99e   :  { %v2253_v5 = vpop.permute.xlu0 %2252 }
 0x99f   :  { %v2271_v54 = vmul.f32 %v6580_v43, %v2253_v5 }
 0x9a0   :  { %v2255_v9 = vpop.permute.xlu1 %2254 }
 0x9a1   :  { %v2272_v16 = vmul.f32 %v6592_v37, %v2255_v9 }
 0x9a2   :  { %v2257_v38 = vpop.permute.xlu0 %2256 }
 0x9a3   :  { %v2273_v21 = vmul.f32 %v6598_v25, %v2257_v38 }
 0x9a4   :  { %v2291_v11 = vpop.permute.xlu1 %2290 }
 0x9a5   :  { %v2314_v55 = vadd.f32 %v2291_v11, %v2266_v53 }
 0x9a6   :  { %v2293_v3 = vpop.permute.xlu0 %2292 }
 0x9a7   :  { %5543 = vtanh.f32 %v2314_v55  ;;  %v2315_v17 = vadd.f32 %v2293_v3, %v2267_v13  ;;  %v2395_v13 = vsel %vm2394_vm11, 1, %v5880_v15 }
 0x9a8   :  { %v2299_v8 = vpop.permute.xlu1 %2298 }
 0x9a9   :  { %5545 = vtanh.f32 %v2315_v17  ;;  %v2467_v12 = vcombine.low %v2314_v55, %v2315_v17  ;;  %v2318_v62 = vadd.f32 %v2299_v8, %v2270_v1 }
 0x9aa   :  { %v2301_v50 = vpop.permute.xlu0 %2300 }
 0x9ab   :  { %5547 = vtanh.f32 %v2318_v62  ;;  %v2319_v28 = vadd.f32 %v2301_v50, %v2271_v54  ;;  %v2477_v18 = vrot.slane %v2467_v12, %v6110_v2  ;;  %v2343_v54 = vrot.slane %v6580_v43, 1 }
 0x9ac   :  { %v2295_v20 = vpop.permute.xlu1 %2294  ;;  %v2342_v12 = vrot.slane %v6576_v61, 1  ;;  %v2339_v50 = vrot.slane %v6572_v7, 1  ;;  %v2345_v43 = vrot.slane %v6598_v25, 1 }
 0x9ad   :  { %5549 = vtanh.f32 %v2319_v28  ;;  %v2469_v63 = vcombine.low %v2318_v62, %v2319_v28  ;;  %v2316_v27 = vadd.f32 %v2295_v20, %v2268_v52  ;;  %v2340_v28 = vrot.slane %v6584_v24, 1 }
 0x9ae   :  { %v2297_v59 = vpop.permute.xlu0 %2296 }
 0x9af   :  { %5551 = vtanh.f32 %v2316_v27  ;;  %v2317_v60 = vadd.f32 %v2297_v59, %v2269_v51  ;;  %v2491_v46 = vrot.slane %v2469_v63, %v6110_v2  ;;  %v2338_v51 = vrot.slane %v6569_v31, 1 }
 0x9b0   :  { %v2303_v57 = vpop.permute.xlu1 %2302  ;;  %v2344_v63 = vrot.slane %v6592_v37, 1 }
 0x9b1   :  { %v5544_v23 = vpop.eup %5543  ;;  %5553 = vtanh.f32 %v2317_v60  ;;  %v2468_v42 = vcombine.low %v2316_v27, %v2317_v60  ;;  %v2320_v58 = vadd.f32 %v2303_v57, %v2272_v16 }
 0x9b2   :  { %2362 = vrot.lane.b32.xlu1 %v5544_v23, %s5879_s0  ;;  %v2305_v10 = vpop.permute.xlu0 %2304 }
 0x9b3   :  { %v5546_v29 = vpop.eup %5545  ;;  %v2484_v33 = vrot.slane %v2468_v42, %v6110_v2  ;;  %5555 = vtanh.f32 %v2320_v58  ;;  %v2321_v36 = vadd.f32 %v2305_v10, %v2273_v21 }
 0x9b4   :  { %2364 = vrot.lane.b32.xlu0 %v5546_v29, %s5879_s0 }
 0x9b5   :  { %v5548_v40 = vpop.eup %5547  ;;  %v2499_v6 = vcombine.low %v2477_v18, %v2484_v33  ;;  %5557 = vtanh.f32 %v2321_v36  ;;  %v2470_v45 = vcombine.low %v2320_v58, %v2321_v36 }
 0x9b6   :  { %2370 = vrot.lane.b32.xlu1 %v5548_v40, %s5879_s0 }
 0x9b7   :  { %v5550_v4 = vpop.eup %5549  ;;  %v2498_v41 = vrot.slane %v2470_v45, %v6110_v2  ;;  %v6621_v5 = vrot.slane %v2499_v6, %v6110_v2 }
 0x9b8   :  { %2372 = vrot.lane.b32.xlu0 %v5550_v4, %s5879_s0 }
 0x9b9   :  { %v5552_v48 = vpop.eup %5551  ;;  %v2500_v47 = vcombine.low %v2491_v46, %v2498_v41 }
 0x9ba   :  { %2366 = vrot.lane.b32.xlu1 %v5552_v48, %s5879_s0 }
 0x9bb   :  { %v5554_v49 = vpop.eup %5553  ;;  %v6624_v9 = vrot.slane %v2500_v47, %v6110_v2 }
 0x9bc   :  { %2368 = vrot.lane.b32.xlu0 %v5554_v49, %s5879_s0 }
 0x9bd   :  { %v5556_v38 = vpop.eup %5555  ;;  %v2515_v53 = vcombine.low %v6621_v5, %v6624_v9 }
 0x9be   :  { %2374 = vrot.lane.b32.xlu1 %v5556_v38, %s5879_s0 }
 0x9bf   :  { %v5558_v11 = vpop.eup %5557 }
 0x9c0   :  { %2376 = vrot.lane.b32.xlu0 %v5558_v11, %s5879_s0 }
 0x9c2   :  { %2397 = vperm.xlu1 %5302, %v2395_v13   ;;  %v2521_v13 = vld [vmem:[#allocation2 + $0x4] ss:$8 sm:$0x3] }
 0xa24   :  { %v2363_v55 = vpop.permute.xlu1 %2362 }
 0xa25   :  { %v2386_v32 = vmul.f32 %v2363_v55, %v2338_v51 }
 0xa26   :  { %v2365_v3 = vpop.permute.xlu0 %2364 }
 0xa27   :  { %v2387_v59 = vmul.f32 %v2365_v3, %v2339_v50 }
 0xa28   :  { %v2371_v1 = vpop.permute.xlu1 %2370 }
 0xa29   :  { %v2390_v16 = vmul.f32 %v2371_v1, %v2342_v12  ;;  %v2408_v42 = vcombine.low %v2386_v32, %v2387_v59  ;;  %v2523_v1 = vld [vmem:[#allocation2 + $0x14] ss:$8 sm:$0x3] }
 0xa2a   :  { %v2373_v17 = vpop.permute.xlu0 %2372 }
 0xa2b   :  { %v2391_v52 = vmul.f32 %v2373_v17, %v2343_v54  ;;  %v2418_v10 = vrot.slane %v2408_v42, %v6110_v2  ;;  %v2529_v54 = vld [vmem:[#allocation2 + $0x44] ss:$8 sm:$0x3] }
 0xa2c   :  { %v2367_v8 = vpop.permute.xlu1 %2366 }
 0xa2d   :  { %v2388_v60 = vmul.f32 %v2367_v8, %v2340_v28  ;;  %v2410_v61 = vcombine.low %v2390_v16, %v2391_v52  ;;  %v2525_v28 = vld [vmem:[#allocation2 + $0x24] ss:$8 sm:$0x3] }
 0xa2e   :  { %v2369_v62 = vpop.permute.xlu0 %2368  ;;  %v2533_v16 = vld [vmem:[#allocation2 + $0x64] ss:$8 sm:$0x3] }
 0xa2f   :  { %v2389_v20 = vmul.f32 %v2369_v62, %v2341_v44  ;;  %v2432_v24 = vrot.slane %v2410_v61, %v6110_v2  ;;  %v2531_v62 = vld [vmem:[#allocation2 + $0x54] ss:$8 sm:$0x3] }
 0xa30   :  { %v2375_v27 = vpop.permute.xlu1 %2374 }
 0xa31   :  { %v2409_v23 = vcombine.low %v2388_v60, %v2389_v20  ;;  %v2392_v21 = vmul.f32 %v2375_v27, %v2344_v63  ;;  %v2527_v63 = vld [vmem:[#allocation2 + $0x34] ss:$8 sm:$0x3] }
 0xa32   :  { %v2377_v57 = vpop.permute.xlu0 %2376 }
 0xa33   :  { %v2393_v7 = vmul.f32 %v2377_v57, %v2345_v43  ;;  %v2425_v31 = vrot.slane %v2409_v23, %v6110_v2  ;;  %v2535_v43 = vld [vmem:[#allocation2 + $0x74] ss:$8 sm:$0x3] }
 0xa35   :  { %v2411_v58 = vcombine.low %v2392_v21, %v2393_v7  ;;  %v2440_v18 = vcombine.low %v2418_v10, %v2425_v31 }
 0xa37   :  { %v2439_v37 = vrot.slane %v2411_v58, %v6110_v2  ;;  %v2448_v33 = vrot.slane %v2440_v18, %v6110_v2 }
 0xa39   :  { %v2441_v29 = vcombine.low %v2432_v24, %v2439_v37 }
 0xa3b   :  { %v2455_v25 = vrot.slane %v2441_v29, %v6110_v2 }
 0xa3d   :  { %v2456_v40 = vcombine.low %v2448_v33, %v2455_v25 }
 0xa41   :  { %v6647_v36 = vpop.permute.xlu1 %2397 }
 0xa42   :  { %vm2399_vm12 = vcmp.eq.s32.totalorder %v6647_v36, 1 }
 0xa43   :  { %v6653_v6 = vsel %vm2399_vm12, %v2456_v40, %v6512_v56 }
 0xa44   :  { %5030 = vmatmul.mubr.msk.f32.vlgmr.msra.gmra.mrb[18].mxu0 %vm281_vm5, %v6653_v6 }
 0xa45   :  { %5235 = vmatpush1.bf16.msra.mxu0 %v5977_v14  ;;  %3767 = vmatprep.mubr.f32.mxu0 %v5876_v0 }
 0xa46   :  { %5237 = vmatprep.subr.bf16.mxu0 %v5986_v19 }
 0xa49   :  { %5239 = vmatpush1.bf16.msra.mxu0 %v6001_v26 }
 0xa4a   :  { %5241 = vmatprep.subr.bf16.mxu0 %v6012_v30 }
 0xa4d   :  { %5243 = vmatpush1.bf16.msra.mxu0 %v6026_v34 }
 0xa4e   :  { %5245 = vmatprep.subr.bf16.mxu0 %v6030_v35 }
 0xa51   :  { %5247 = vmatpush1.bf16.msra.mxu0 %v6045_v39 }
 0xb17   :  { %v2605_v56 = vpop.f32.mrb[18].mxu0 }
 0xb18   :  { %v2607_v45 = vpop.f32.mrb[19].mxu0 }
 0xb19   :  { %v2612_v4 = vcombine.low %v2605_v56, %v2607_v45  ;;  %v2613_v46 = vcombine.high %v2605_v56, %v2607_v45 }
 0xb1b   :  { %v2620_v41 = vrot.slane %v2612_v4, %v6110_v2  ;;  %v2627_v48 = vrot.slane %v2613_v46, %v6110_v2 }
 0xb1d   :  { %v2628_v47 = vcombine.high %v2620_v41, %v2620_v41  ;;  %v2629_v49 = vcombine.high %v2627_v48, %v2627_v48  ;;  %v2636_v38 = vrot.slane %v2620_v41, %v6110_v2  ;;  %v2643_v55 = vrot.slane %v2627_v48, %v6110_v2 }
 0xb1f   :  { %v2650_v11 = vrot.slane %v2628_v47, %v6110_v2  ;;  %v2670_v3 = vadd.f32 %v2636_v38, %v2521_v13  ;;  %v2657_v17 = vrot.slane %v2629_v49, %v6110_v2  ;;  %v2658_v44 = vcombine.high %v2636_v38, %v2636_v38 }
 0xb20   :  { %v2674_v12 = vadd.f32 %v2643_v55, %v2529_v54  ;;  %v2659_v20 = vcombine.high %v2643_v55, %v2643_v55 }
 0xb21   :  { %v2671_v8 = vadd.f32 %v2650_v11, %v2523_v1  ;;  %2734 = vrot.lane.b32.xlu0 %v2670_v3, %s5879_s0  ;;  %v2675_v50 = vadd.f32 %v2657_v17, %v2531_v62  ;;  %v2660_v52 = vcombine.high %v2650_v11, %v2650_v11  ;;  %v2672_v51 = vadd.f32 %v2658_v44, %v2525_v28 }
 0xb22   :  { %v2661_v59 = vcombine.high %v2657_v17, %v2657_v17  ;;  %v2676_v60 = vadd.f32 %v2659_v20, %v2533_v16  ;;  %v5031_v61 = vmul.f32 -1.442695, %v2670_v3  ;;  %v5035_v7 = vmul.f32 -1.442695, %v2674_v12 }
 0xb23   :  { %2736 = vrot.lane.b32.xlu1 %v2671_v8, %s5879_s0  ;;  %v2673_v27 = vadd.f32 %v2660_v52, %v2527_v63  ;;  %v5032_v21 = vmul.f32 -1.442695, %v2671_v8  ;;  %v5036_v58 = vmul.f32 -1.442695, %v2675_v50  ;;  %v5033_v24 = vmul.f32 -1.442695, %v2672_v51 }
 0xb24   :  { %v2677_v32 = vadd.f32 %v2661_v59, %v2535_v43  ;;  %5559 = vpow2.f32 %v5031_v61  ;;  %v5037_v5 = vmul.f32 -1.442695, %v2676_v60 }
 0xb25   :  { %2742 = vrot.lane.b32.xlu0 %v2674_v12, %s5879_s0  ;;  %5561 = vpow2.f32 %v5032_v21  ;;  %v5034_v10 = vmul.f32 -1.442695, %v2673_v27 }
 0xb26   :  { %5563 = vpow2.f32 %v5035_v7  ;;  %v5038_v18 = vmul.f32 -1.442695, %v2677_v32 }
 0xb27   :  { %2744 = vrot.lane.b32.xlu1 %v2675_v50, %s5879_s0  ;;  %5565 = vpow2.f32 %v5036_v58 }
 0xb28   :  { %5567 = vpow2.f32 %v5033_v24 }
 0xb29   :  { %2738 = vrot.lane.b32.xlu0 %v2672_v51, %s5879_s0  ;;  %5569 = vpow2.f32 %v5034_v10 }
 0xb2a   :  { %5571 = vpow2.f32 %v5037_v5 }
 0xb2b   :  { %2740 = vrot.lane.b32.xlu1 %v2673_v27, %s5879_s0  ;;  %5573 = vpow2.f32 %v5038_v18 }
 0xb2d   :  { %2746 = vrot.lane.b32.xlu0 %v2676_v60, %s5879_s0 }
 0xb2f   :  { %2748 = vrot.lane.b32.xlu1 %v2677_v32, %s5879_s0 }
 0xb31   :  { %2516 = vrot.lane.b32.xlu0 %v2515_v53, %s5879_s0  ;;  %v5560_v53 = vpop.eup %5559 }
 0xb32   :  { %v5562_v56 = vpop.eup %5561  ;;  %v2702_v4 = vadd.f32 1.0, %v5560_v53 }
 0xb33   :  { %v5564_v48 = vpop.eup %5563  ;;  %v2703_v36 = vadd.f32 1.0, %v5562_v56 }
 0xb34   :  { %v5566_v38 = vpop.eup %5565  ;;  %v2706_v13 = vadd.f32 1.0, %v5564_v48 }
 0xb35   :  { %v5568_v1 = vpop.eup %5567  ;;  %v2707_v8 = vadd.f32 1.0, %v5566_v38 }
 0xb36   :  { %v5570_v12 = vpop.eup %5569  ;;  %v2704_v50 = vadd.f32 1.0, %v5568_v1 }
 0xb37   :  { %v5572_v28 = vpop.eup %5571  ;;  %v2705_v51 = vadd.f32 1.0, %v5570_v12 }
 0xb38   :  { %v5574_v16 = vpop.eup %5573  ;;  %v2708_v60 = vadd.f32 1.0, %v5572_v28 }
 0xb39   :  { %v2709_v7 = vadd.f32 1.0, %v5574_v16 }
 0xb93   :  { %v2735_v57 = vpop.permute.xlu0 %2734 }
 0xb94   :  { %v2750_v45 = vrot.slane %v2735_v57, 1 }
 0xb95   :  { %v2737_v31 = vpop.permute.xlu1 %2736 }
 0xb96   :  { %v2751_v47 = vrot.slane %v2737_v31, 1  ;;  %5575 = vtanh.f32 %v2750_v45 }
 0xb97   :  { %v2743_v23 = vpop.permute.xlu0 %2742  ;;  %5577 = vrcp.f32 %v2702_v4 }
 0xb98   :  { %v2754_v11 = vrot.slane %v2743_v23, 1  ;;  %5579 = vtanh.f32 %v2751_v47 }
 0xb99   :  { %v2745_v25 = vpop.permute.xlu1 %2744  ;;  %5581 = vrcp.f32 %v2703_v36 }
 0xb9a   :  { %v2755_v17 = vrot.slane %v2745_v25, 1  ;;  %5583 = vtanh.f32 %v2754_v11 }
 0xb9b   :  { %v6683_v42 = vpop.permute.xlu0 %2738  ;;  %5585 = vrcp.f32 %v2706_v13 }
 0xb9c   :  { %v2752_v62 = vrot.slane %v6683_v42, 1  ;;  %5587 = vtanh.f32 %v2755_v17 }
 0xb9d   :  { %v2741_v55 = vpop.permute.xlu1 %2740  ;;  %5589 = vrcp.f32 %v2707_v8 }
 0xb9e   :  { %v2753_v20 = vrot.slane %v2741_v55, 1  ;;  %5591 = vtanh.f32 %v2752_v62 }
 0xb9f   :  { %v6685_v37 = vpop.permute.xlu0 %2746  ;;  %5593 = vrcp.f32 %v2704_v50 }
 0xba0   :  { %v2756_v59 = vrot.slane %v6685_v37, 1  ;;  %v5576_v32 = vpop.eup %5575  ;;  %5595 = vtanh.f32 %v2753_v20 }
 0xba1   :  { %v2749_v63 = vpop.permute.xlu1 %2748  ;;  %v6709_v61 = vpop.eup %5577  ;;  %5597 = vrcp.f32 %v2705_v51 }
 0xba2   :  { %v2757_v57 = vrot.slane %v2749_v63, 1  ;;  %v5580_v21 = vpop.eup %5579  ;;  %5599 = vtanh.f32 %v2756_v59  ;;  %v2856_v58 = vmul.f32 %v6709_v61, %v5576_v32 }
 0xba3   :  { %v2517_v9 = vpop.permute.xlu0 %2516  ;;  %v6712_v42 = vpop.eup %5581  ;;  %5601 = vrcp.f32 %v2708_v60 }
 0xba4   :  { %v6690_v29 = vsel %vm2399_vm12, %v2517_v9, %v6550_v22  ;;  %v5584_v24 = vpop.eup %5583  ;;  %5603 = vtanh.f32 %v2757_v57  ;;  %v2857_v37 = vmul.f32 %v6712_v42, %v5580_v21 }
 0xba5   :  { %v2775_v33 = vcombine.high %v6690_v29, %v6690_v29  ;;  %v2782_v40 = vrot.slane %v6690_v29, %v6110_v2  ;;  %v6716_v31 = vpop.eup %5585  ;;  %5605 = vrcp.f32 %v2709_v7 }
 0xba6   :  { %v5588_v10 = vpop.eup %5587  ;;  %v2860_v9 = vmul.f32 %v6716_v31, %v5584_v24 }
 0xba7   :  { %v2790_v46 = vcombine.high %v2782_v40, %v2782_v40  ;;  %v2798_v41 = vrot.slane %v2782_v40, %v6110_v2  ;;  %v2789_v22 = vrot.slane %v2775_v33, %v6110_v2  ;;  %v6720_v5 = vpop.eup %5589 }
 0xba8   :  { %v5592_v53 = vpop.eup %5591  ;;  %v2861_v25 = vmul.f32 %v6720_v5, %v5588_v10 }
 0xba9   :  { %2824 = vrot.lane.b32.xlu1 %v2798_v41, %s5879_s0  ;;  %v2812_v49 = vrot.slane %v2790_v46, %v6110_v2  ;;  %v2820_v3 = vcombine.high %v2798_v41, %v2798_v41  ;;  %v2791_v54 = vcombine.high %v2789_v22, %v2789_v22  ;;  %v2805_v52 = vrot.slane %v2789_v22, %v6110_v2  ;;  %v6724_v18 = vpop.eup %5593 }
 0xbaa   :  { %v5596_v33 = vpop.eup %5595  ;;  %v2858_v56 = vmul.f32 %v6724_v18, %v5592_v53 }
 0xbab   :  { %2826 = vrot.lane.b32.xlu0 %v2812_v49, %s5879_s0  ;;  %v2822_v44 = vcombine.high %v2812_v49, %v2812_v49  ;;  %v2819_v27 = vrot.slane %v2791_v54, %v6110_v2  ;;  %v2821_v43 = vcombine.high %v2805_v52, %v2805_v52  ;;  %v6728_v40 = vpop.eup %5597 }
 0xbac   :  { %v5600_v45 = vpop.eup %5599  ;;  %v2859_v46 = vmul.f32 %v6728_v40, %v5596_v33 }
 0xbad   :  { %2828 = vrot.lane.b32.xlu1 %v2820_v3, %s5879_s0  ;;  %v2823_v23 = vcombine.high %v2819_v27, %v2819_v27  ;;  %v6732_v4 = vpop.eup %5601 }
 0xbae   :  { %v5604_v41 = vpop.eup %5603  ;;  %v2862_v48 = vmul.f32 %v6732_v4, %v5600_v45 }
 0xbaf   :  { %2830 = vrot.lane.b32.xlu0 %v2822_v44, %s5879_s0  ;;  %v6738_v47 = vpop.eup %5605 }
 0xbb0   :  { %v2863_v36 = vmul.f32 %v6738_v47, %v5604_v41 }
 0xbb1   :  { %2832 = vrot.lane.b32.xlu1 %v2805_v52, %s5879_s0 }
 0xbb3   :  { %2834 = vrot.lane.b32.xlu0 %v2819_v27, %s5879_s0 }
 0xbb5   :  { %2836 = vrot.lane.b32.xlu1 %v2821_v43, %s5879_s0 }
 0xbb7   :  { %2838 = vrot.lane.b32.xlu0 %v2823_v23, %s5879_s0 }
 0xbb9   :  { %2872 = vrot.lane.b32.xlu1 %v2856_v58, %s5879_s0 }
 0xbbb   :  { %2874 = vrot.lane.b32.xlu0 %v2857_v37, %s5879_s0 }
 0xbbd   :  { %2880 = vrot.lane.b32.xlu1 %v2860_v9, %s5879_s0 }
 0xbbf   :  { %2882 = vrot.lane.b32.xlu0 %v2861_v25, %s5879_s0 }
 0xbc1   :  { %2876 = vrot.lane.b32.xlu1 %v2858_v56, %s5879_s0 }
 0xbc3   :  { %2878 = vrot.lane.b32.xlu0 %v2859_v46, %s5879_s0 }
 0xbc5   :  { %2884 = vrot.lane.b32.xlu1 %v2862_v48, %s5879_s0 }
 0xbc7   :  { %2886 = vrot.lane.b32.xlu0 %v2863_v36, %s5879_s0 }
 0xc1b   :  { %v2825_v22 = vpop.permute.xlu1 %2824 }
 0xc1c   :  { %v2848_v17 = vmul.f32 %v6709_v61, %v2825_v22 }
 0xc1d   :  { %v2827_v49 = vpop.permute.xlu0 %2826 }
 0xc1e   :  { %v2849_v54 = vmul.f32 %v6712_v42, %v2827_v49 }
 0xc1f   :  { %v2829_v38 = vpop.permute.xlu1 %2828 }
 0xc20   :  { %v2850_v27 = vmul.f32 %v6724_v18, %v2829_v38 }
 0xc21   :  { %v2831_v11 = vpop.permute.xlu0 %2830 }
 0xc22   :  { %v2851_v60 = vmul.f32 %v6728_v40, %v2831_v11 }
 0xc23   :  { %v2833_v13 = vpop.permute.xlu1 %2832 }
 0xc24   :  { %v2852_v62 = vmul.f32 %v6716_v31, %v2833_v13 }
 0xc25   :  { %v2835_v55 = vpop.permute.xlu0 %2834 }
 0xc26   :  { %v2853_v28 = vmul.f32 %v6720_v5, %v2835_v55 }
 0xc27   :  { %v2837_v3 = vpop.permute.xlu1 %2836 }
 0xc28   :  { %v2854_v23 = vmul.f32 %v6732_v4, %v2837_v3  ;;  %v6770_v3 = vld [vmem:[%s7226_s1] sm:$0xff] }
 0xc29   :  { %v2839_v1 = vpop.permute.xlu0 %2838  ;;  %vm2976_vm13 = vcmp.gt.s32.totalorder %v6770_v3, 4  ;;  %vm3558_vm15 = vcmp.gt.s32.totalorder %v6770_v3, 5 }
 0xc2a   :  { %v2855_v24 = vmul.f32 %v6738_v47, %v2839_v1 }
 0xc2b   :  { %v2873_v8 = vpop.permute.xlu1 %2872 }
 0xc2c   :  { %v2896_v44 = vadd.f32 %v2873_v8, %v2848_v17 }
 0xc2d   :  { %v2875_v12 = vpop.permute.xlu0 %2874 }
 0xc2e   :  { %5607 = vtanh.f32 %v2896_v44  ;;  %v2897_v50 = vadd.f32 %v2875_v12, %v2849_v54  ;;  %v2977_v54 = vsel %vm2976_vm13, 1, %v5880_v15 }
 0xc2f   :  { %v2881_v52 = vpop.permute.xlu1 %2880 }
 0xc30   :  { %5609 = vtanh.f32 %v2897_v50  ;;  %v3049_v20 = vcombine.low %v2896_v44, %v2897_v50  ;;  %v2900_v51 = vadd.f32 %v2881_v52, %v2852_v62 }
 0xc31   :  { %v2883_v63 = vpop.permute.xlu0 %2882 }
 0xc32   :  { %5611 = vtanh.f32 %v2900_v51  ;;  %v2901_v59 = vadd.f32 %v2883_v63, %v2853_v28  ;;  %v3059_v25 = vrot.slane %v3049_v20, %v6110_v2  ;;  %v2925_v28 = vrot.slane %v6720_v5, 1 }
 0xc33   :  { %v2877_v16 = vpop.permute.xlu1 %2876  ;;  %v2923_v20 = vrot.slane %v6728_v40, 1  ;;  %v2927_v5 = vrot.slane %v6738_v47, 1 }
 0xc34   :  { %5613 = vtanh.f32 %v2901_v59  ;;  %v3051_v43 = vcombine.low %v2900_v51, %v2901_v59  ;;  %v2898_v32 = vadd.f32 %v2877_v16, %v2850_v27  ;;  %v2921_v51 = vrot.slane %v6712_v42, 1 }
 0xc35   :  { %v2879_v57 = vpop.permute.xlu0 %2878  ;;  %v2924_v27 = vrot.slane %v6716_v31, 1  ;;  %v2922_v16 = vrot.slane %v6724_v18, 1 }
 0xc36   :  { %5615 = vtanh.f32 %v2898_v32  ;;  %v2899_v21 = vadd.f32 %v2879_v57, %v2851_v60  ;;  %v3073_v36 = vrot.slane %v3051_v43, %v6110_v2  ;;  %v2920_v43 = vrot.slane %v6709_v61, 1 }
 0xc37   :  { %v2885_v7 = vpop.permute.xlu1 %2884 }
 0xc38   :  { %v5608_v58 = vpop.eup %5607  ;;  %5617 = vtanh.f32 %v2899_v21  ;;  %v3050_v37 = vcombine.low %v2898_v32, %v2899_v21  ;;  %v2902_v10 = vadd.f32 %v2885_v7, %v2854_v23  ;;  %v2926_v32 = vrot.slane %v6732_v4, 1 }
 0xc39   :  { %2944 = vrot.lane.b32.xlu1 %v5608_v58, %s5879_s0  ;;  %v2887_v9 = vpop.permute.xlu0 %2886 }
 0xc3a   :  { %v5610_v53 = vpop.eup %5609  ;;  %v3066_v33 = vrot.slane %v3050_v37, %v6110_v2  ;;  %5619 = vtanh.f32 %v2902_v10  ;;  %v2903_v56 = vadd.f32 %v2887_v9, %v2855_v24 }
 0xc3b   :  { %2946 = vrot.lane.b32.xlu0 %v5610_v53, %s5879_s0 }
 0xc3c   :  { %v5612_v45 = vpop.eup %5611  ;;  %v3081_v46 = vcombine.low %v3059_v25, %v3066_v33  ;;  %5621 = vtanh.f32 %v2903_v56  ;;  %v3052_v41 = vcombine.low %v2902_v10, %v2903_v56 }
 0xc3d   :  { %2952 = vrot.lane.b32.xlu1 %v5612_v45, %s5879_s0 }
 0xc3e   :  { %v5614_v48 = vpop.eup %5613  ;;  %v3080_v22 = vrot.slane %v3052_v41, %v6110_v2  ;;  %v6761_v13 = vrot.slane %v3081_v46, %v6110_v2 }
 0xc3f   :  { %2954 = vrot.lane.b32.xlu0 %v5614_v48, %s5879_s0 }
 0xc40   :  { %v5616_v49 = vpop.eup %5615  ;;  %v3082_v38 = vcombine.low %v3073_v36, %v3080_v22 }
 0xc41   :  { %2948 = vrot.lane.b32.xlu1 %v5616_v49, %s5879_s0 }
 0xc42   :  { %v5618_v11 = vpop.eup %5617  ;;  %v6764_v55 = vrot.slane %v3082_v38, %v6110_v2 }
 0xc43   :  { %2950 = vrot.lane.b32.xlu0 %v5618_v11, %s5879_s0  ;;  %v3103_v11 = vld [vmem:[#allocation2 + $0x5] ss:$8 sm:$0x3] }
 0xc44   :  { %v5620_v1 = vpop.eup %5619  ;;  %v3097_v17 = vcombine.low %v6761_v13, %v6764_v55 }
 0xc45   :  { %2956 = vrot.lane.b32.xlu1 %v5620_v1, %s5879_s0  ;;  %v3105_v1 = vld [vmem:[#allocation2 + $0x15] ss:$8 sm:$0x3] }
 0xc46   :  { %v5622_v8 = vpop.eup %5621 }
 0xc47   :  { %2958 = vrot.lane.b32.xlu0 %v5622_v8, %s5879_s0 }
 0xc49   :  { %2979 = vperm.xlu1 %5302, %v2977_v54   ;;  %v3111_v54 = vld [vmem:[#allocation2 + $0x45] ss:$8 sm:$0x3] }
 0xcab   :  { %v2945_v44 = vpop.permute.xlu1 %2944 }
 0xcac   :  { %v2968_v40 = vmul.f32 %v2945_v44, %v2920_v43  ;;  %v3117_v43 = vld [vmem:[#allocation2 + $0x75] ss:$8 sm:$0x3] }
 0xcad   :  { %v2947_v12 = vpop.permute.xlu0 %2946 }
 0xcae   :  { %v2969_v23 = vmul.f32 %v2947_v12, %v2921_v51 }
 0xcaf   :  { %v2953_v62 = vpop.permute.xlu1 %2952 }
 0xcb0   :  { %v2972_v21 = vmul.f32 %v2953_v62, %v2924_v27  ;;  %v2990_v10 = vcombine.low %v2968_v40, %v2969_v23  ;;  %v3113_v62 = vld [vmem:[#allocation2 + $0x55] ss:$8 sm:$0x3] }
 0xcb1   :  { %v2955_v50 = vpop.permute.xlu0 %2954 }
 0xcb2   :  { %v2973_v59 = vmul.f32 %v2955_v50, %v2925_v28  ;;  %v3000_v53 = vrot.slane %v2990_v10, %v6110_v2  ;;  %v3107_v28 = vld [vmem:[#allocation2 + $0x25] ss:$8 sm:$0x3] }
 0xcb3   :  { %v2949_v52 = vpop.permute.xlu1 %2948 }
 0xcb4   :  { %v2970_v7 = vmul.f32 %v2949_v52, %v2922_v16  ;;  %v2992_v42 = vcombine.low %v2972_v21, %v2973_v59  ;;  %v3115_v16 = vld [vmem:[#allocation2 + $0x65] ss:$8 sm:$0x3] }
 0xcb5   :  { %v2951_v63 = vpop.permute.xlu0 %2950 }
 0xcb6   :  { %v2971_v60 = vmul.f32 %v2951_v63, %v2923_v20  ;;  %v3014_v18 = vrot.slane %v2992_v42, %v6110_v2  ;;  %v3109_v63 = vld [vmem:[#allocation2 + $0x35] ss:$8 sm:$0x3] }
 0xcb7   :  { %v2957_v57 = vpop.permute.xlu1 %2956 }
 0xcb8   :  { %v2991_v24 = vcombine.low %v2970_v7, %v2971_v60  ;;  %v2974_v37 = vmul.f32 %v2957_v57, %v2926_v32 }
 0xcb9   :  { %v2959_v58 = vpop.permute.xlu0 %2958 }
 0xcba   :  { %v2975_v31 = vmul.f32 %v2959_v58, %v2927_v5  ;;  %v3007_v61 = vrot.slane %v2991_v24, %v6110_v2 }
 0xcbc   :  { %v2993_v9 = vcombine.low %v2974_v37, %v2975_v31  ;;  %v3022_v33 = vcombine.low %v3000_v53, %v3007_v61 }
 0xcbe   :  { %v3021_v4 = vrot.slane %v2993_v9, %v6110_v2  ;;  %v3030_v56 = vrot.slane %v3022_v33, %v6110_v2 }
 0xcc0   :  { %v3023_v25 = vcombine.low %v3014_v18, %v3021_v4 }
 0xcc2   :  { %v3037_v47 = vrot.slane %v3023_v25, %v6110_v2 }
 0xcc4   :  { %v3038_v46 = vcombine.low %v3030_v56, %v3037_v47 }
 0xcc8   :  { %v6792_v45 = vpop.permute.xlu1 %2979 }
 0xcc9   :  { %vm2981_vm14 = vcmp.eq.s32.totalorder %v6792_v45, 1 }
 0xcca   :  { %v6798_v41 = vsel %vm2981_vm14, %v3038_v46, %v6653_v6 }
 0xccb   :  { %5039 = vmatmul.mubr.msk.f32.vlgmr.msra.gmra.mrb[6].mxu1 %vm281_vm5, %v6798_v41 }
 0xccc   :  { %5251 = vmatpush1.bf16.msra.mxu1 %v5977_v14  ;;  %4349 = vmatprep.mubr.f32.mxu1 %v5876_v0 }
 0xccd   :  { %5253 = vmatprep.subr.bf16.mxu1 %v5986_v19 }
 0xcd0   :  { %5255 = vmatpush1.bf16.msra.mxu1 %v6001_v26 }
 0xcd1   :  { %5257 = vmatprep.subr.bf16.mxu1 %v6012_v30 }
 0xcd4   :  { %5259 = vmatpush1.bf16.msra.mxu1 %v6026_v34 }
 0xcd5   :  { %5261 = vmatprep.subr.bf16.mxu1 %v6030_v35 }
 0xcd8   :  { %5263 = vmatpush1.bf16.msra.mxu1 %v6045_v39 }
 0xd9e   :  { %v3187_v6 = vpop.f32.mrb[6].mxu1 }
 0xd9f   :  { %v3189_v48 = vpop.f32.mrb[7].mxu1 }
 0xda0   :  { %v3194_v36 = vcombine.low %v3187_v6, %v3189_v48  ;;  %v3195_v22 = vcombine.high %v3187_v6, %v3189_v48 }
 0xda2   :  { %v3202_v14 = vrot.slane %v3194_v36, %v6110_v2  ;;  %v3209_v49 = vrot.slane %v3195_v22, %v6110_v2 }
 0xda4   :  { %v3210_v38 = vcombine.high %v3202_v14, %v3202_v14  ;;  %v3211_v19 = vcombine.high %v3209_v49, %v3209_v49  ;;  %v3218_v26 = vrot.slane %v3202_v14, %v6110_v2  ;;  %v3225_v34 = vrot.slane %v3209_v49, %v6110_v2 }
 0xda6   :  { %v3232_v30 = vrot.slane %v3210_v38, %v6110_v2  ;;  %v3252_v35 = vadd.f32 %v3218_v26, %v3103_v11  ;;  %v3239_v39 = vrot.slane %v3211_v19, %v6110_v2  ;;  %v3240_v44 = vcombine.high %v3218_v26, %v3218_v26 }
 0xda7   :  { %v3256_v12 = vadd.f32 %v3225_v34, %v3111_v54  ;;  %v3241_v20 = vcombine.high %v3225_v34, %v3225_v34 }
 0xda8   :  { %v3253_v8 = vadd.f32 %v3232_v30, %v3105_v1  ;;  %3316 = vrot.lane.b32.xlu0 %v3252_v35, %s5879_s0  ;;  %v3257_v50 = vadd.f32 %v3239_v39, %v3113_v62  ;;  %v3242_v52 = vcombine.high %v3232_v30, %v3232_v30  ;;  %v3254_v51 = vadd.f32 %v3240_v44, %v3107_v28 }
 0xda9   :  { %v3243_v59 = vcombine.high %v3239_v39, %v3239_v39  ;;  %v3258_v60 = vadd.f32 %v3241_v20, %v3115_v16  ;;  %v5040_v23 = vmul.f32 -1.442695, %v3252_v35  ;;  %v5044_v5 = vmul.f32 -1.442695, %v3256_v12 }
 0xdaa   :  { %3318 = vrot.lane.b32.xlu1 %v3253_v8, %s5879_s0  ;;  %v3255_v27 = vadd.f32 %v3242_v52, %v3109_v63  ;;  %v5041_v7 = vmul.f32 -1.442695, %v3253_v8  ;;  %v5045_v58 = vmul.f32 -1.442695, %v3257_v50  ;;  %v5042_v42 = vmul.f32 -1.442695, %v3254_v51 }
 0xdab   :  { %v3259_v32 = vadd.f32 %v3243_v59, %v3117_v43  ;;  %5623 = vpow2.f32 %v5040_v23  ;;  %v5046_v13 = vmul.f32 -1.442695, %v3258_v60 }
 0xdac   :  { %3324 = vrot.lane.b32.xlu0 %v3256_v12, %s5879_s0  ;;  %5625 = vpow2.f32 %v5041_v7  ;;  %v5043_v31 = vmul.f32 -1.442695, %v3255_v27 }
 0xdad   :  { %5627 = vpow2.f32 %v5044_v5  ;;  %v5047_v9 = vmul.f32 -1.442695, %v3259_v32 }
 0xdae   :  { %3326 = vrot.lane.b32.xlu1 %v3257_v50, %s5879_s0  ;;  %5629 = vpow2.f32 %v5045_v58 }
 0xdaf   :  { %5631 = vpow2.f32 %v5042_v42 }
 0xdb0   :  { %3320 = vrot.lane.b32.xlu0 %v3254_v51, %s5879_s0  ;;  %5633 = vpow2.f32 %v5043_v31 }
 0xdb1   :  { %5635 = vpow2.f32 %v5046_v13 }
 0xdb2   :  { %3322 = vrot.lane.b32.xlu1 %v3255_v27, %s5879_s0  ;;  %5637 = vpow2.f32 %v5047_v9 }
 0xdb4   :  { %3328 = vrot.lane.b32.xlu0 %v3258_v60, %s5879_s0 }
 0xdb6   :  { %3330 = vrot.lane.b32.xlu1 %v3259_v32, %s5879_s0 }
 0xdb8   :  { %3098 = vrot.lane.b32.xlu0 %v3097_v17, %s5879_s0  ;;  %v5624_v17 = vpop.eup %5623 }
 0xdb9   :  { %v5626_v53 = vpop.eup %5625  ;;  %v3284_v33 = vadd.f32 1.0, %v5624_v17 }
 0xdba   :  { %v5628_v46 = vpop.eup %5627  ;;  %v3285_v45 = vadd.f32 1.0, %v5626_v53 }
 0xdbb   :  { %v5630_v36 = vpop.eup %5629  ;;  %v3288_v14 = vadd.f32 1.0, %v5628_v46 }
 0xdbc   :  { %v5632_v19 = vpop.eup %5631  ;;  %v3289_v30 = vadd.f32 1.0, %v5630_v36 }
 0xdbd   :  { %v5634_v35 = vpop.eup %5633  ;;  %v3286_v39 = vadd.f32 1.0, %v5632_v19 }
 0xdbe   :  { %v5636_v54 = vpop.eup %5635  ;;  %v3287_v12 = vadd.f32 1.0, %v5634_v35 }
 0xdbf   :  { %v5638_v28 = vpop.eup %5637  ;;  %v3290_v20 = vadd.f32 1.0, %v5636_v54 }
 0xdc0   :  { %v3291_v43 = vadd.f32 1.0, %v5638_v28 }
 0xe1a   :  { %v3317_v57 = vpop.permute.xlu0 %3316 }
 0xe1b   :  { %v3332_v25 = vrot.slane %v3317_v57, 1 }
 0xe1c   :  { %v3319_v24 = vpop.permute.xlu1 %3318 }
 0xe1d   :  { %v3333_v6 = vrot.slane %v3319_v24, 1  ;;  %5639 = vtanh.f32 %v3332_v25 }
 0xe1e   :  { %v3325_v21 = vpop.permute.xlu0 %3324  ;;  %5641 = vrcp.f32 %v3284_v33 }
 0xe1f   :  { %v3336_v22 = vrot.slane %v3325_v21, 1  ;;  %5643 = vtanh.f32 %v3333_v6 }
 0xe20   :  { %v3327_v18 = vpop.permute.xlu1 %3326  ;;  %5645 = vrcp.f32 %v3285_v45 }
 0xe21   :  { %v3337_v26 = vrot.slane %v3327_v18, 1  ;;  %5647 = vtanh.f32 %v3336_v22 }
 0xe22   :  { %v6828_v40 = vpop.permute.xlu0 %3320  ;;  %5649 = vrcp.f32 %v3288_v14 }
 0xe23   :  { %v3334_v1 = vrot.slane %v6828_v40, 1  ;;  %5651 = vtanh.f32 %v3337_v26 }
 0xe24   :  { %v3323_v49 = vpop.permute.xlu1 %3322  ;;  %5653 = vrcp.f32 %v3289_v30 }
 0xe25   :  { %v3335_v44 = vrot.slane %v3323_v49, 1  ;;  %5655 = vtanh.f32 %v3334_v1 }
 0xe26   :  { %v6830_v37 = vpop.permute.xlu0 %3328  ;;  %5657 = vrcp.f32 %v3286_v39 }
 0xe27   :  { %v3338_v52 = vrot.slane %v6830_v37, 1  ;;  %v5640_v63 = vpop.eup %5639  ;;  %5659 = vtanh.f32 %v3335_v44 }
 0xe28   :  { %v3331_v62 = vpop.permute.xlu1 %3330  ;;  %v6854_v59 = vpop.eup %5641  ;;  %5661 = vrcp.f32 %v3287_v12 }
 0xe29   :  { %v3339_v27 = vrot.slane %v3331_v62, 1  ;;  %v5644_v60 = vpop.eup %5643  ;;  %5663 = vtanh.f32 %v3338_v52  ;;  %v3438_v57 = vmul.f32 %v6854_v59, %v5640_v63 }
 0xe2a   :  { %v3099_v55 = vpop.permute.xlu0 %3098  ;;  %v6857_v32 = vpop.eup %5645  ;;  %5665 = vrcp.f32 %v3290_v20 }
 0xe2b   :  { %v6835_v10 = vsel %vm2981_vm14, %v3099_v55, %v6690_v29  ;;  %v5648_v23 = vpop.eup %5647  ;;  %5667 = vtanh.f32 %v3339_v27  ;;  %v3439_v7 = vmul.f32 %v6857_v32, %v5644_v60 }
 0xe2c   :  { %v3357_v61 = vcombine.high %v6835_v10, %v6835_v10  ;;  %v3364_v4 = vrot.slane %v6835_v10, %v6110_v2  ;;  %v6861_v21 = vpop.eup %5649  ;;  %5669 = vrcp.f32 %v3291_v43 }
 0xe2d   :  { %v5652_v5 = vpop.eup %5651  ;;  %v3442_v58 = vmul.f32 %v6861_v21, %v5648_v23 }
 0xe2e   :  { %v3372_v47 = vcombine.high %v3364_v4, %v3364_v4  ;;  %v3380_v56 = vrot.slane %v3364_v4, %v6110_v2  ;;  %v3371_v29 = vrot.slane %v3357_v61, %v6110_v2  ;;  %v6865_v40 = vpop.eup %5653 }
 0xe2f   :  { %v5656_v42 = vpop.eup %5655  ;;  %v3443_v37 = vmul.f32 %v6865_v40, %v5652_v5 }
 0xe30   :  { %3406 = vrot.lane.b32.xlu1 %v3380_v56, %s5879_s0  ;;  %v3394_v48 = vrot.slane %v3372_v47, %v6110_v2  ;;  %v3402_v38 = vcombine.high %v3380_v56, %v3380_v56  ;;  %v3373_v11 = vcombine.high %v3371_v29, %v3371_v29  ;;  %v3387_v8 = vrot.slane %v3371_v29, %v6110_v2  ;;  %v6869_v24 = vpop.eup %5657 }
 0xe31   :  { %v5660_v31 = vpop.eup %5659  ;;  %v3440_v55 = vmul.f32 %v6869_v24, %v5656_v42 }
 0xe32   :  { %3408 = vrot.lane.b32.xlu0 %v3394_v48, %s5879_s0  ;;  %v3404_v34 = vcombine.high %v3394_v48, %v3394_v48  ;;  %v3401_v50 = vrot.slane %v3373_v11, %v6110_v2  ;;  %v3403_v51 = vcombine.high %v3387_v8, %v3387_v8  ;;  %v6873_v13 = vpop.eup %5661 }
 0xe33   :  { %v5664_v17 = vpop.eup %5663  ;;  %v3441_v18 = vmul.f32 %v6873_v13, %v5660_v31  ;;  %v3505_v3 = vrot.slane %v6873_v13, 1 }
 0xe34   :  { %3410 = vrot.lane.b32.xlu1 %v3402_v38, %s5879_s0  ;;  %v3405_v16 = vcombine.high %v3401_v50, %v3401_v50  ;;  %v6877_v9 = vpop.eup %5665 }
 0xe35   :  { %v5668_v61 = vpop.eup %5667  ;;  %v3444_v4 = vmul.f32 %v6877_v9, %v5664_v17 }
 0xe36   :  { %3412 = vrot.lane.b32.xlu0 %v3404_v34, %s5879_s0  ;;  %v6883_v53 = vpop.eup %5669 }
 0xe37   :  { %v3445_v25 = vmul.f32 %v6883_v53, %v5668_v61 }
 0xe38   :  { %3414 = vrot.lane.b32.xlu1 %v3387_v8, %s5879_s0 }
 0xe3a   :  { %3416 = vrot.lane.b32.xlu0 %v3401_v50, %s5879_s0 }
 0xe3c   :  { %3418 = vrot.lane.b32.xlu1 %v3403_v51, %s5879_s0 }
 0xe3e   :  { %3420 = vrot.lane.b32.xlu0 %v3405_v16, %s5879_s0 }
 0xe40   :  { %3454 = vrot.lane.b32.xlu1 %v3438_v57, %s5879_s0 }
 0xe42   :  { %3456 = vrot.lane.b32.xlu0 %v3439_v7, %s5879_s0 }
 0xe44   :  { %3462 = vrot.lane.b32.xlu1 %v3442_v58, %s5879_s0 }
 0xe46   :  { %3464 = vrot.lane.b32.xlu0 %v3443_v37, %s5879_s0 }
 0xe48   :  { %3458 = vrot.lane.b32.xlu1 %v3440_v55, %s5879_s0 }
 0xe4a   :  { %3460 = vrot.lane.b32.xlu0 %v3441_v18, %s5879_s0 }
 0xe4c   :  { %3466 = vrot.lane.b32.xlu1 %v3444_v4, %s5879_s0 }
 0xe4e   :  { %3468 = vrot.lane.b32.xlu0 %v3445_v25, %s5879_s0 }
 0xea2   :  { %v3407_v33 = vpop.permute.xlu1 %3406 }
 0xea3   :  { %v3430_v36 = vmul.f32 %v6854_v59, %v3407_v33 }
 0xea4   :  { %v3409_v47 = vpop.permute.xlu0 %3408 }
 0xea5   :  { %v3431_v14 = vmul.f32 %v6857_v32, %v3409_v47 }
 0xea6   :  { %v3411_v56 = vpop.permute.xlu1 %3410 }
 0xea7   :  { %v3432_v39 = vmul.f32 %v6869_v24, %v3411_v56 }
 0xea8   :  { %v3413_v46 = vpop.permute.xlu0 %3412 }
 0xea9   :  { %v3433_v44 = vmul.f32 %v6873_v13, %v3413_v46  ;;  %v3559_v46 = vsel %vm3558_vm15, 1, %v5880_v15 }
 0xeaa   :  { %v3415_v6 = vpop.permute.xlu1 %3414 }
 0xeab   :  { %v3434_v19 = vmul.f32 %v6861_v21, %v3415_v6 }
 0xeac   :  { %v3417_v45 = vpop.permute.xlu0 %3416 }
 0xead   :  { %v3435_v11 = vmul.f32 %v6865_v40, %v3417_v45 }
 0xeae   :  { %v3419_v29 = vpop.permute.xlu1 %3418 }
 0xeaf   :  { %v3436_v52 = vmul.f32 %v6877_v9, %v3419_v29 }
 0xeb0   :  { %v3421_v48 = vpop.permute.xlu0 %3420 }
 0xeb1   :  { %v3437_v63 = vmul.f32 %v6883_v53, %v3421_v48 }
 0xeb2   :  { %v3455_v22 = vpop.permute.xlu1 %3454 }
 0xeb3   :  { %v3478_v49 = vadd.f32 %v3455_v22, %v3430_v36  ;;  %v3507_v22 = vrot.slane %v6865_v40, 1  ;;  %v3509_v40 = vrot.slane %v6883_v53, 1 }
 0xeb4   :  { %v3457_v38 = vpop.permute.xlu0 %3456 }
 0xeb5   :  { %5671 = vtanh.f32 %v3478_v49  ;;  %v3479_v26 = vadd.f32 %v3457_v38, %v3431_v14  ;;  %v3503_v14 = vrot.slane %v6857_v32, 1  ;;  %v3506_v38 = vrot.slane %v6861_v21, 1 }
 0xeb6   :  { %v3463_v30 = vpop.permute.xlu1 %3462 }
 0xeb7   :  { %5673 = vtanh.f32 %v3479_v26  ;;  %v3631_v34 = vcombine.low %v3478_v49, %v3479_v26  ;;  %v3482_v35 = vadd.f32 %v3463_v30, %v3434_v19  ;;  %v3504_v26 = vrot.slane %v6869_v24, 1 }
 0xeb8   :  { %v3465_v1 = vpop.permute.xlu0 %3464 }
 0xeb9   :  { %5675 = vtanh.f32 %v3482_v35  ;;  %v3483_v8 = vadd.f32 %v3465_v1, %v3435_v11  ;;  %v3641_v57 = vrot.slane %v3631_v34, %v6110_v2  ;;  %v3502_v11 = vrot.slane %v6854_v59, 1 }
 0xeba   :  { %v3459_v54 = vpop.permute.xlu1 %3458  ;;  %v3508_v34 = vrot.slane %v6877_v9, 1 }
 0xebb   :  { %5677 = vtanh.f32 %v3483_v8  ;;  %v3633_v12 = vcombine.low %v3482_v35, %v3483_v8  ;;  %v3480_v62 = vadd.f32 %v3459_v54, %v3432_v39 }
 0xebc   :  { %v3461_v50 = vpop.permute.xlu0 %3460 }
 0xebd   :  { %5679 = vtanh.f32 %v3480_v62  ;;  %v3481_v28 = vadd.f32 %v3461_v50, %v3433_v44  ;;  %v3655_v31 = vrot.slane %v3633_v12, %v6110_v2 }
 0xebe   :  { %v3467_v20 = vpop.permute.xlu1 %3466 }
 0xebf   :  { %v5672_v51 = vpop.eup %5671  ;;  %5681 = vtanh.f32 %v3481_v28  ;;  %v3632_v27 = vcombine.low %v3480_v62, %v3481_v28  ;;  %v3484_v16 = vadd.f32 %v3467_v20, %v3436_v52 }
 0xec0   :  { %3526 = vrot.lane.b32.xlu1 %v5672_v51, %s5879_s0  ;;  %v3469_v60 = vpop.permute.xlu0 %3468 }
 0xec1   :  { %v5674_v43 = vpop.eup %5673  ;;  %v3648_v23 = vrot.slane %v3632_v27, %v6110_v2  ;;  %5683 = vtanh.f32 %v3484_v16  ;;  %v3485_v7 = vadd.f32 %v3469_v60, %v3437_v63 }
 0xec2   :  { %3528 = vrot.lane.b32.xlu0 %v5674_v43, %s5879_s0 }
 0xec3   :  { %v5676_v5 = vpop.eup %5675  ;;  %v3663_v58 = vcombine.low %v3641_v57, %v3648_v23  ;;  %5685 = vtanh.f32 %v3485_v7  ;;  %v3634_v42 = vcombine.low %v3484_v16, %v3485_v7 }
 0xec4   :  { %3534 = vrot.lane.b32.xlu1 %v5676_v5, %s5879_s0 }
 0xec5   :  { %v5678_v37 = vpop.eup %5677  ;;  %v3662_v55 = vrot.slane %v3634_v42, %v6110_v2  ;;  %v6906_v4 = vrot.slane %v3663_v58, %v6110_v2 }
 0xec6   :  { %3536 = vrot.lane.b32.xlu0 %v5678_v37, %s5879_s0 }
 0xec7   :  { %v5680_v17 = vpop.eup %5679  ;;  %v3664_v18 = vcombine.low %v3655_v31, %v3662_v55  ;;  %v3685_v55 = vld [vmem:[#allocation2 + $0x6] ss:$8 sm:$0x3] }
 0xec8   :  { %3530 = vrot.lane.b32.xlu1 %v5680_v17, %s5879_s0 }
 0xec9   :  { %v5682_v61 = vpop.eup %5681  ;;  %v6909_v25 = vrot.slane %v3664_v18, %v6110_v2  ;;  %v3687_v18 = vld [vmem:[#allocation2 + $0x16] ss:$8 sm:$0x3] }
 0xeca   :  { %3532 = vrot.lane.b32.xlu0 %v5682_v61, %s5879_s0 }
 0xecb   :  { %v5684_v33 = vpop.eup %5683  ;;  %v3679_v47 = vcombine.low %v6906_v4, %v6909_v25 }
 0xecc   :  { %3538 = vrot.lane.b32.xlu1 %v5684_v33, %s5879_s0 }
 0xecd   :  { %v5686_v56 = vpop.eup %5685 }
 0xece   :  { %3540 = vrot.lane.b32.xlu0 %v5686_v56, %s5879_s0  ;;  %v3693_v56 = vld [vmem:[#allocation2 + $0x46] ss:$8 sm:$0x3] }
 0xed0   :  { %3561 = vperm.xlu1 %5302, %v3559_v46  }
 0xf32   :  { %v3527_v6 = vpop.permute.xlu1 %3526 }
 0xf33   :  { %v3550_v13 = vmul.f32 %v3527_v6, %v3502_v11 }
 0xf34   :  { %v3529_v45 = vpop.permute.xlu0 %3528 }
 0xf35   :  { %v3551_v1 = vmul.f32 %v3529_v45, %v3503_v14  ;;  %v3695_v45 = vld [vmem:[#allocation2 + $0x56] ss:$8 sm:$0x3] }
 0xf36   :  { %v3535_v29 = vpop.permute.xlu1 %3534  ;;  %v3691_v14 = vld [vmem:[#allocation2 + $0x36] ss:$8 sm:$0x3] }
 0xf37   :  { %v3554_v39 = vmul.f32 %v3535_v29, %v3506_v38  ;;  %v3572_v62 = vcombine.low %v3550_v13, %v3551_v1 }
 0xf38   :  { %v3537_v48 = vpop.permute.xlu0 %3536 }
 0xf39   :  { %v3555_v19 = vmul.f32 %v3537_v48, %v3507_v22  ;;  %v3582_v52 = vrot.slane %v3572_v62, %v6110_v2 }
 0xf3a   :  { %v3531_v36 = vpop.permute.xlu1 %3530 }
 0xf3b   :  { %v3552_v8 = vmul.f32 %v3531_v36, %v3504_v26  ;;  %v3574_v32 = vcombine.low %v3554_v39, %v3555_v19  ;;  %v3689_v36 = vld [vmem:[#allocation2 + $0x26] ss:$8 sm:$0x3] }
 0xf3c   :  { %v3533_v49 = vpop.permute.xlu0 %3532  ;;  %v3697_v19 = vld [vmem:[#allocation2 + $0x66] ss:$8 sm:$0x3] }
 0xf3d   :  { %v3553_v30 = vmul.f32 %v3533_v49, %v3505_v3  ;;  %v3596_v24 = vrot.slane %v3574_v32, %v6110_v2 }
 0xf3e   :  { %v3539_v35 = vpop.permute.xlu1 %3538 }
 0xf3f   :  { %v3573_v44 = vcombine.low %v3552_v8, %v3553_v30  ;;  %v3556_v12 = vmul.f32 %v3539_v35, %v3508_v34  ;;  %v3699_v30 = vld [vmem:[#allocation2 + $0x76] ss:$8 sm:$0x3] }
 0xf40   :  { %v3541_v54 = vpop.permute.xlu0 %3540 }
 0xf41   :  { %v3557_v21 = vmul.f32 %v3541_v54, %v3509_v40  ;;  %v3589_v59 = vrot.slane %v3573_v44, %v6110_v2 }
 0xf43   :  { %v3575_v50 = vcombine.low %v3556_v12, %v3557_v21  ;;  %v3604_v20 = vcombine.low %v3582_v52, %v3589_v59 }
 0xf45   :  { %v3603_v9 = vrot.slane %v3575_v50, %v6110_v2  ;;  %v3612_v51 = vrot.slane %v3604_v20, %v6110_v2 }
 0xf47   :  { %v3605_v28 = vcombine.low %v3596_v24, %v3603_v9 }
 0xf49   :  { %v3619_v53 = vrot.slane %v3605_v28, %v6110_v2 }
 0xf4b   :  { %v3620_v27 = vcombine.low %v3612_v51, %v3619_v53 }
 0xf4f   :  { %v6932_v63 = vpop.permute.xlu1 %3561 }
 0xf50   :  { %vm3563_vm0 = vcmp.eq.s32.totalorder %v6932_v63, 1 }
 0xf51   :  { %v6938_v16 = vsel %vm3563_vm0, %v3620_v27, %v6798_v41 }
 0xf52   :  { %5048 = vmatmul.mubr.msk.f32.vlgmr.msra.gmra.mrb[20].mxu0 %vm281_vm5, %v6938_v16 }
 0xf53   :  { %5104 = vmatprep.mubr.msk.f32.mxu0 %vm5882_vm4, %v5876_v0 }
0x1025   :  { %v3769_v60 = vpop.f32.mrb[20].mxu0 }
0x1026   :  { %v3771_v43 = vpop.f32.mrb[21].mxu0 }
0x1027   :  { %v3776_v57 = vcombine.low %v3769_v60, %v3771_v43  ;;  %v3777_v23 = vcombine.high %v3769_v60, %v3771_v43 }
0x1029   :  { %v3784_v7 = vrot.slane %v3776_v57, %v6110_v2  ;;  %v3791_v5 = vrot.slane %v3777_v23, %v6110_v2 }
0x102b   :  { %v3792_v58 = vcombine.high %v3784_v7, %v3784_v7  ;;  %v3793_v42 = vcombine.high %v3791_v5, %v3791_v5  ;;  %v3800_v37 = vrot.slane %v3784_v7, %v6110_v2  ;;  %v3807_v41 = vrot.slane %v3791_v5, %v6110_v2 }
0x102d   :  { %v3814_v31 = vrot.slane %v3792_v58, %v6110_v2  ;;  %v3834_v17 = vadd.f32 %v3800_v37, %v3685_v55  ;;  %v3821_v61 = vrot.slane %v3793_v42, %v6110_v2  ;;  %v3822_v46 = vcombine.high %v3800_v37, %v3800_v37 }
0x102e   :  { %v3838_v6 = vadd.f32 %v3807_v41, %v3693_v56  ;;  %v3823_v22 = vcombine.high %v3807_v41, %v3807_v41 }
0x102f   :  { %v3835_v33 = vadd.f32 %v3814_v31, %v3687_v18  ;;  %3898 = vrot.lane.b32.xlu0 %v3834_v17, %s5879_s0  ;;  %v3839_v29 = vadd.f32 %v3821_v61, %v3695_v45  ;;  %v3824_v48 = vcombine.high %v3814_v31, %v3814_v31  ;;  %v3836_v3 = vadd.f32 %v3822_v46, %v3689_v36 }
0x1030   :  { %v3825_v38 = vcombine.high %v3821_v61, %v3821_v61  ;;  %v3840_v26 = vadd.f32 %v3823_v22, %v3697_v19  ;;  %v5049_v35 = vmul.f32 -1.442695, %v3834_v17  ;;  %v5053_v8 = vmul.f32 -1.442695, %v3838_v6 }
0x1031   :  { %3900 = vrot.lane.b32.xlu1 %v3835_v33, %s5879_s0  ;;  %v3837_v49 = vadd.f32 %v3824_v48, %v3691_v14  ;;  %v5050_v39 = vmul.f32 -1.442695, %v3835_v33  ;;  %v5054_v13 = vmul.f32 -1.442695, %v3839_v29  ;;  %v5051_v54 = vmul.f32 -1.442695, %v3836_v3 }
0x1032   :  { %v3841_v11 = vadd.f32 %v3825_v38, %v3699_v30  ;;  %5687 = vpow2.f32 %v5049_v35  ;;  %v5055_v4 = vmul.f32 -1.442695, %v3840_v26 }
0x1033   :  { %3906 = vrot.lane.b32.xlu0 %v3838_v6, %s5879_s0  ;;  %5689 = vpow2.f32 %v5050_v39  ;;  %v5052_v12 = vmul.f32 -1.442695, %v3837_v49 }
0x1034   :  { %5691 = vpow2.f32 %v5053_v8  ;;  %v5056_v62 = vmul.f32 -1.442695, %v3841_v11 }
0x1035   :  { %3908 = vrot.lane.b32.xlu1 %v3839_v29, %s5879_s0  ;;  %5693 = vpow2.f32 %v5054_v13 }
0x1036   :  { %5695 = vpow2.f32 %v5051_v54 }
0x1037   :  { %3902 = vrot.lane.b32.xlu0 %v3836_v3, %s5879_s0  ;;  %5697 = vpow2.f32 %v5052_v12 }
0x1038   :  { %5699 = vpow2.f32 %v5055_v4 }
0x1039   :  { %3904 = vrot.lane.b32.xlu1 %v3837_v49, %s5879_s0  ;;  %5701 = vpow2.f32 %v5056_v62 }
0x103b   :  { %3910 = vrot.lane.b32.xlu0 %v3840_v26, %s5879_s0 }
0x103d   :  { %3912 = vrot.lane.b32.xlu1 %v3841_v11, %s5879_s0 }
0x103f   :  { %3680 = vrot.lane.b32.xlu0 %v3679_v47, %s5879_s0  ;;  %v5688_v47 = vpop.eup %5687 }
0x1040   :  { %v5690_v9 = vpop.eup %5689  ;;  %v3866_v28 = vadd.f32 1.0, %v5688_v47 }
0x1041   :  { %v5692_v51 = vpop.eup %5691  ;;  %v3867_v63 = vadd.f32 1.0, %v5690_v9 }
0x1042   :  { %v5694_v43 = vpop.eup %5693  ;;  %v3870_v23 = vadd.f32 1.0, %v5692_v51 }
0x1043   :  { %v5696_v58 = vpop.eup %5695  ;;  %v3871_v37 = vadd.f32 1.0, %v5694_v43 }
0x1044   :  { %v5698_v41 = vpop.eup %5697  ;;  %v3868_v18 = vadd.f32 1.0, %v5696_v58 }
0x1045   :  { %v5700_v33 = vpop.eup %5699  ;;  %v3869_v46 = vadd.f32 1.0, %v5698_v41 }
0x1046   :  { %v5702_v48 = vpop.eup %5701  ;;  %v3872_v36 = vadd.f32 1.0, %v5700_v33 }
0x1047   :  { %v3873_v26 = vadd.f32 1.0, %v5702_v48 }
0x10a1   :  { %v3899_v34 = vpop.permute.xlu0 %3898 }
0x10a2   :  { %v3914_v52 = vrot.slane %v3899_v34, 1 }
0x10a3   :  { %v3901_v32 = vpop.permute.xlu1 %3900 }
0x10a4   :  { %v3915_v27 = vrot.slane %v3901_v32, 1  ;;  %5703 = vtanh.f32 %v3914_v52 }
0x10a5   :  { %v3907_v1 = vpop.permute.xlu0 %3906  ;;  %5705 = vrcp.f32 %v3866_v28 }
0x10a6   :  { %v3918_v57 = vrot.slane %v3907_v1, 1  ;;  %5707 = vtanh.f32 %v3915_v27 }
0x10a7   :  { %v3909_v50 = vpop.permute.xlu1 %3908  ;;  %5709 = vrcp.f32 %v3867_v63 }
0x10a8   :  { %v3919_v42 = vrot.slane %v3909_v50, 1  ;;  %5711 = vtanh.f32 %v3918_v57 }
0x10a9   :  { %v6960_v40 = vpop.permute.xlu0 %3902  ;;  %5713 = vrcp.f32 %v3870_v23 }
0x10aa   :  { %v3916_v17 = vrot.slane %v6960_v40, 1  ;;  %5715 = vtanh.f32 %v3919_v42 }
0x10ab   :  { %v3905_v7 = vpop.permute.xlu1 %3904  ;;  %5717 = vrcp.f32 %v3871_v37 }
0x10ac   :  { %v3917_v56 = vrot.slane %v3905_v7, 1  ;;  %5719 = vtanh.f32 %v3916_v17 }
0x10ad   :  { %v6962_v44 = vpop.permute.xlu0 %3910  ;;  %5721 = vrcp.f32 %v3868_v18 }
0x10ae   :  { %v3920_v29 = vrot.slane %v6962_v44, 1  ;;  %v5704_v3 = vpop.eup %5703  ;;  %5723 = vtanh.f32 %v3917_v56 }
0x10af   :  { %v3913_v6 = vpop.permute.xlu1 %3912  ;;  %v6986_v49 = vpop.eup %5705  ;;  %5725 = vrcp.f32 %v3869_v46 }
0x10b0   :  { %v3921_v14 = vrot.slane %v3913_v6, 1  ;;  %v5708_v19 = vpop.eup %5707  ;;  %5727 = vtanh.f32 %v3920_v29  ;;  %v4020_v11 = vmul.f32 %v6986_v49, %v5704_v3 }
0x10b1   :  { %v3681_v25 = vpop.permute.xlu0 %3680  ;;  %v6989_v30 = vpop.eup %5709  ;;  %5729 = vrcp.f32 %v3872_v36 }
0x10b2   :  { %v6967_v21 = vsel %vm3563_vm0, %v3681_v25, %v6835_v10  ;;  %v5712_v34 = vpop.eup %5711  ;;  %5731 = vtanh.f32 %v3921_v14  ;;  %v4021_v1 = vmul.f32 %v6989_v30, %v5708_v19 }
0x10b3   :  { %v3939_v24 = vcombine.high %v6967_v21, %v6967_v21  ;;  %v3946_v59 = vrot.slane %v6967_v21, %v6110_v2  ;;  %v6993_v35 = vpop.eup %5713  ;;  %5733 = vrcp.f32 %v3873_v26 }
0x10b4   :  { %v5716_v39 = vpop.eup %5715  ;;  %v4024_v40 = vmul.f32 %v6993_v35, %v5712_v34 }
0x10b5   :  { %v3954_v20 = vcombine.high %v3946_v59, %v3946_v59  ;;  %v3962_v53 = vrot.slane %v3946_v59, %v6110_v2  ;;  %v3953_v10 = vrot.slane %v3939_v24, %v6110_v2  ;;  %v6997_v8 = vpop.eup %5717 }
0x10b6   :  { %v5720_v13 = vpop.eup %5719  ;;  %v4025_v32 = vmul.f32 %v6997_v8, %v5716_v39 }
0x10b7   :  { %3988 = vrot.lane.b32.xlu1 %v3962_v53, %s5879_s0  ;;  %v3976_v60 = vrot.slane %v3954_v20, %v6110_v2  ;;  %v3984_v5 = vcombine.high %v3962_v53, %v3962_v53  ;;  %v3955_v31 = vcombine.high %v3953_v10, %v3953_v10  ;;  %v3969_v61 = vrot.slane %v3953_v10, %v6110_v2  ;;  %v7001_v54 = vpop.eup %5721 }
0x10b8   :  { %v5724_v44 = vpop.eup %5723  ;;  %v4022_v4 = vmul.f32 %v7001_v54, %v5720_v13 }
0x10b9   :  { %3990 = vrot.lane.b32.xlu0 %v3976_v60, %s5879_s0  ;;  %v3986_v55 = vcombine.high %v3976_v60, %v3976_v60  ;;  %v3983_v45 = vrot.slane %v3955_v31, %v6110_v2  ;;  %v3985_v22 = vcombine.high %v3969_v61, %v3969_v61  ;;  %v7005_v12 = vpop.eup %5725 }
0x10ba   :  { %v5728_v25 = vpop.eup %5727  ;;  %v4023_v62 = vmul.f32 %v7005_v12, %v5724_v44 }
0x10bb   :  { %3992 = vrot.lane.b32.xlu1 %v3984_v5, %s5879_s0  ;;  %v3987_v38 = vcombine.high %v3983_v45, %v3983_v45  ;;  %v7009_v47 = vpop.eup %5729 }
0x10bc   :  { %v5732_v50 = vpop.eup %5731  ;;  %v4026_v24 = vmul.f32 %v7009_v47, %v5728_v25 }
0x10bd   :  { %3994 = vrot.lane.b32.xlu0 %v3986_v55, %s5879_s0  ;;  %v7015_v59 = vpop.eup %5733 }
0x10be   :  { %v4027_v9 = vmul.f32 %v7015_v59, %v5732_v50 }
0x10bf   :  { %3996 = vrot.lane.b32.xlu1 %v3969_v61, %s5879_s0 }
0x10c1   :  { %3998 = vrot.lane.b32.xlu0 %v3983_v45, %s5879_s0 }
0x10c3   :  { %4000 = vrot.lane.b32.xlu1 %v3985_v22, %s5879_s0 }
0x10c5   :  { %4002 = vrot.lane.b32.xlu0 %v3987_v38, %s5879_s0 }
0x10c7   :  { %4036 = vrot.lane.b32.xlu1 %v4020_v11, %s5879_s0 }
0x10c9   :  { %4038 = vrot.lane.b32.xlu0 %v4021_v1, %s5879_s0 }
0x10cb   :  { %4044 = vrot.lane.b32.xlu1 %v4024_v40, %s5879_s0 }
0x10cd   :  { %4046 = vrot.lane.b32.xlu0 %v4025_v32, %s5879_s0 }
0x10cf   :  { %4040 = vrot.lane.b32.xlu1 %v4022_v4, %s5879_s0 }
0x10d1   :  { %4042 = vrot.lane.b32.xlu0 %v4023_v62, %s5879_s0 }
0x10d3   :  { %4048 = vrot.lane.b32.xlu1 %v4026_v24, %s5879_s0 }
0x10d5   :  { %4050 = vrot.lane.b32.xlu0 %v4027_v9, %s5879_s0  ;;  %v7047_v9 = vld [vmem:[%s7226_s1] sm:$0xff] }
0x10d6   :  { %vm4140_vm1 = vcmp.gt.s32.totalorder %v7047_v9, 6  ;;  %vm4722_vm3 = vcmp.gt.s32.totalorder %v7047_v9, 7 }
0x1129   :  { %v3989_v52 = vpop.permute.xlu1 %3988 }
0x112a   :  { %v4012_v60 = vmul.f32 %v6986_v49, %v3989_v52 }
0x112b   :  { %v3991_v28 = vpop.permute.xlu0 %3990 }
0x112c   :  { %v4013_v57 = vmul.f32 %v6989_v30, %v3991_v28 }
0x112d   :  { %v3993_v20 = vpop.permute.xlu1 %3992 }
0x112e   :  { %v4014_v17 = vmul.f32 %v7001_v54, %v3993_v20 }
0x112f   :  { %v3995_v53 = vpop.permute.xlu0 %3994 }
0x1130   :  { %v4015_v33 = vmul.f32 %v7005_v12, %v3995_v53  ;;  %v4141_v53 = vsel %vm4140_vm1, 1, %v5880_v15 }
0x1131   :  { %v3997_v51 = vpop.permute.xlu1 %3996 }
0x1132   :  { %v4016_v5 = vmul.f32 %v6993_v35, %v3997_v51 }
0x1133   :  { %v3999_v27 = vpop.permute.xlu0 %3998 }
0x1134   :  { %v4017_v37 = vmul.f32 %v6997_v8, %v3999_v27 }
0x1135   :  { %v4001_v63 = vpop.permute.xlu1 %4000 }
0x1136   :  { %v4018_v45 = vmul.f32 %v7009_v47, %v4001_v63 }
0x1137   :  { %v4003_v10 = vpop.permute.xlu0 %4002 }
0x1138   :  { %v4019_v22 = vmul.f32 %v7015_v59, %v4003_v10 }
0x1139   :  { %v4037_v43 = vpop.permute.xlu1 %4036 }
0x113a   :  { %v4060_v23 = vadd.f32 %v4037_v43, %v4012_v60  ;;  %v4089_v43 = vrot.slane %v6997_v8, 1  ;;  %v4091_v8 = vrot.slane %v7015_v59, 1 }
0x113b   :  { %v4039_v7 = vpop.permute.xlu0 %4038 }
0x113c   :  { %5735 = vtanh.f32 %v4060_v23  ;;  %v4061_v58 = vadd.f32 %v4039_v7, %v4013_v57  ;;  %v4087_v57 = vrot.slane %v7005_v12, 1 }
0x113d   :  { %v4045_v42 = vpop.permute.xlu1 %4044 }
0x113e   :  { %5737 = vtanh.f32 %v4061_v58  ;;  %v4213_v31 = vcombine.low %v4060_v23, %v4061_v58  ;;  %v4064_v55 = vadd.f32 %v4045_v42, %v4016_v5  ;;  %v4085_v23 = vrot.slane %v6989_v30, 1 }
0x113f   :  { %v4047_v41 = vpop.permute.xlu0 %4046  ;;  %v4088_v5 = vrot.slane %v6993_v35, 1  ;;  %v4086_v42 = vrot.slane %v7001_v54, 1 }
0x1140   :  { %5739 = vtanh.f32 %v4064_v55  ;;  %v4065_v18 = vadd.f32 %v4047_v41, %v4017_v37  ;;  %v4223_v26 = vrot.slane %v4213_v31, %v6110_v2  ;;  %v4084_v31 = vrot.slane %v6986_v49, 1 }
0x1141   :  { %v4041_v61 = vpop.permute.xlu1 %4040 }
0x1142   :  { %5741 = vtanh.f32 %v4065_v18  ;;  %v4215_v56 = vcombine.low %v4064_v55, %v4065_v18  ;;  %v4062_v46 = vadd.f32 %v4041_v61, %v4014_v17  ;;  %v4090_v55 = vrot.slane %v7009_v47, 1 }
0x1143   :  { %v4043_v6 = vpop.permute.xlu0 %4042 }
0x1144   :  { %5743 = vtanh.f32 %v4062_v46  ;;  %v4063_v29 = vadd.f32 %v4043_v6, %v4015_v33  ;;  %v4237_v32 = vrot.slane %v4215_v56, %v6110_v2 }
0x1145   :  { %v4049_v48 = vpop.permute.xlu1 %4048 }
0x1146   :  { %v5736_v36 = vpop.eup %5735  ;;  %5745 = vtanh.f32 %v4063_v29  ;;  %v4214_v3 = vcombine.low %v4062_v46, %v4063_v29  ;;  %v4066_v14 = vadd.f32 %v4049_v48, %v4018_v45 }
0x1147   :  { %4108 = vrot.lane.b32.xlu1 %v5736_v36, %s5879_s0  ;;  %v4051_v38 = vpop.permute.xlu0 %4050 }
0x1148   :  { %v5738_v19 = vpop.eup %5737  ;;  %v4230_v11 = vrot.slane %v4214_v3, %v6110_v2  ;;  %5747 = vtanh.f32 %v4066_v14  ;;  %v4067_v34 = vadd.f32 %v4051_v38, %v4019_v22 }
0x1149   :  { %4110 = vrot.lane.b32.xlu0 %v5738_v19, %s5879_s0 }
0x114a   :  { %v5740_v1 = vpop.eup %5739  ;;  %v4245_v39 = vcombine.low %v4223_v26, %v4230_v11  ;;  %5749 = vtanh.f32 %v4067_v34  ;;  %v4216_v40 = vcombine.low %v4066_v14, %v4067_v34 }
0x114b   :  { %4116 = vrot.lane.b32.xlu1 %v5740_v1, %s5879_s0 }
0x114c   :  { %v5742_v13 = vpop.eup %5741  ;;  %v4244_v44 = vrot.slane %v4216_v40, %v6110_v2  ;;  %v7038_v50 = vrot.slane %v4245_v39, %v6110_v2 }
0x114d   :  { %4118 = vrot.lane.b32.xlu0 %v5742_v13, %s5879_s0 }
0x114e   :  { %v5744_v4 = vpop.eup %5743  ;;  %v4246_v25 = vcombine.low %v4237_v32, %v4244_v44 }
0x114f   :  { %4112 = vrot.lane.b32.xlu1 %v5744_v4, %s5879_s0  ;;  %v4267_v4 = vld [vmem:[#allocation2 + $0x7] ss:$8 sm:$0x3] }
0x1150   :  { %v5746_v62 = vpop.eup %5745  ;;  %v7041_v24 = vrot.slane %v4246_v25, %v6110_v2 }
0x1151   :  { %4114 = vrot.lane.b32.xlu0 %v5746_v62, %s5879_s0  ;;  %v4269_v62 = vld [vmem:[#allocation2 + $0x17] ss:$8 sm:$0x3] }
0x1152   :  { %v5748_v52 = vpop.eup %5747  ;;  %v4261_v28 = vcombine.low %v7038_v50, %v7041_v24 }
0x1153   :  { %4120 = vrot.lane.b32.xlu1 %v5748_v52, %s5879_s0 }
0x1154   :  { %v5750_v20 = vpop.eup %5749 }
0x1155   :  { %4122 = vrot.lane.b32.xlu0 %v5750_v20, %s5879_s0 }
0x1157   :  { %4143 = vperm.xlu1 %5302, %v4141_v53   ;;  %v4275_v53 = vld [vmem:[#allocation2 + $0x47] ss:$8 sm:$0x3] }
0x11b9   :  { %v4109_v51 = vpop.permute.xlu1 %4108 }
0x11ba   :  { %v4132_v12 = vmul.f32 %v4109_v51, %v4084_v31  ;;  %v4281_v31 = vld [vmem:[#allocation2 + $0x77] ss:$8 sm:$0x3] }
0x11bb   :  { %v4111_v27 = vpop.permute.xlu0 %4110 }
0x11bc   :  { %v4133_v17 = vmul.f32 %v4111_v27, %v4085_v23 }
0x11bd   :  { %v4117_v63 = vpop.permute.xlu1 %4116 }
0x11be   :  { %v4136_v18 = vmul.f32 %v4117_v63, %v4088_v5  ;;  %v4154_v6 = vcombine.low %v4132_v12, %v4133_v17  ;;  %v4277_v63 = vld [vmem:[#allocation2 + $0x57] ss:$8 sm:$0x3] }
0x11bf   :  { %v4119_v10 = vpop.permute.xlu0 %4118 }
0x11c0   :  { %v4137_v58 = vmul.f32 %v4119_v10, %v4089_v43  ;;  %v4164_v29 = vrot.slane %v4154_v6, %v6110_v2  ;;  %v4271_v43 = vld [vmem:[#allocation2 + $0x27] ss:$8 sm:$0x3] }
0x11c1   :  { %v4113_v60 = vpop.permute.xlu1 %4112 }
0x11c2   :  { %v4134_v61 = vmul.f32 %v4113_v60, %v4086_v42  ;;  %v4156_v30 = vcombine.low %v4136_v18, %v4137_v58  ;;  %v4279_v42 = vld [vmem:[#allocation2 + $0x67] ss:$8 sm:$0x3] }
0x11c3   :  { %v4115_v7 = vpop.permute.xlu0 %4114 }
0x11c4   :  { %v4135_v37 = vmul.f32 %v4115_v7, %v4087_v57  ;;  %v4178_v54 = vrot.slane %v4156_v30, %v6110_v2  ;;  %v4273_v7 = vld [vmem:[#allocation2 + $0x37] ss:$8 sm:$0x3] }
0x11c5   :  { %v4121_v41 = vpop.permute.xlu1 %4120 }
0x11c6   :  { %v4155_v56 = vcombine.low %v4134_v61, %v4135_v37  ;;  %v4138_v46 = vmul.f32 %v4121_v41, %v4090_v55 }
0x11c7   :  { %v4123_v33 = vpop.permute.xlu0 %4122 }
0x11c8   :  { %v4139_v35 = vmul.f32 %v4123_v33, %v4091_v8  ;;  %v4171_v49 = vrot.slane %v4155_v56, %v6110_v2 }
0x11ca   :  { %v4157_v45 = vcombine.low %v4138_v46, %v4139_v35  ;;  %v4186_v36 = vcombine.low %v4164_v29, %v4171_v49 }
0x11cc   :  { %v4185_v47 = vrot.slane %v4157_v45, %v6110_v2  ;;  %v4194_v22 = vrot.slane %v4186_v36, %v6110_v2 }
0x11ce   :  { %v4187_v48 = vcombine.low %v4178_v54, %v4185_v47 }
0x11d0   :  { %v4201_v59 = vrot.slane %v4187_v48, %v6110_v2 }
0x11d2   :  { %v4202_v14 = vcombine.low %v4194_v22, %v4201_v59 }
0x11d6   :  { %v7069_v3 = vpop.permute.xlu1 %4143 }
0x11d7   :  { %vm4145_vm2 = vcmp.eq.s32.totalorder %v7069_v3, 1 }
0x11d8   :  { %v7075_v38 = vsel %vm4145_vm2, %v4202_v14, %v6938_v16 }
0x11d9   :  { %5057 = vmatmul.mubr.msk.f32.vlgmr.msra.gmra.mrb[8].mxu1 %vm281_vm5, %v7075_v38 }
0x11da   :  { %5123 = vmatprep.mubr.msk.f32.mxu1 %vm5882_vm4, %v5876_v0 }
0x12ac   :  { %v4351_v19 = vpop.f32.mrb[8].mxu1 }
0x12ad   :  { %v4353_v26 = vpop.f32.mrb[9].mxu1 }
0x12ae   :  { %v4358_v11 = vcombine.low %v4351_v19, %v4353_v26  ;;  %v4359_v34 = vcombine.high %v4351_v19, %v4353_v26 }
0x12b0   :  { %v4366_v1 = vrot.slane %v4358_v11, %v6110_v2  ;;  %v4373_v39 = vrot.slane %v4359_v34, %v6110_v2 }
0x12b2   :  { %v4374_v40 = vcombine.high %v4366_v1, %v4366_v1  ;;  %v4375_v13 = vcombine.high %v4373_v39, %v4373_v39  ;;  %v4382_v32 = vrot.slane %v4366_v1, %v6110_v2  ;;  %v4389_v16 = vrot.slane %v4373_v39, %v6110_v2 }
0x12b4   :  { %v4396_v44 = vrot.slane %v4374_v40, %v6110_v2  ;;  %v4416_v25 = vadd.f32 %v4382_v32, %v4267_v4  ;;  %v4403_v52 = vrot.slane %v4375_v13, %v6110_v2  ;;  %v4404_v51 = vcombine.high %v4382_v32, %v4382_v32 }
0x12b5   :  { %v4420_v27 = vadd.f32 %v4389_v16, %v4275_v53  ;;  %v4405_v57 = vcombine.high %v4389_v16, %v4389_v16 }
0x12b6   :  { %v4417_v20 = vadd.f32 %v4396_v44, %v4269_v62  ;;  %4480 = vrot.lane.b32.xlu0 %v4416_v25, %s5879_s0  ;;  %v4421_v10 = vadd.f32 %v4403_v52, %v4277_v63  ;;  %v4406_v60 = vcombine.high %v4396_v44, %v4396_v44  ;;  %v4418_v23 = vadd.f32 %v4404_v51, %v4271_v43 }
0x12b7   :  { %v4407_v58 = vcombine.high %v4403_v52, %v4403_v52  ;;  %v4422_v37 = vadd.f32 %v4405_v57, %v4279_v42  ;;  %v5058_v17 = vmul.f32 -1.442695, %v4416_v25  ;;  %v5062_v8 = vmul.f32 -1.442695, %v4420_v27 }
0x12b8   :  { %4482 = vrot.lane.b32.xlu1 %v4417_v20, %s5879_s0  ;;  %v4419_v5 = vadd.f32 %v4406_v60, %v4273_v7  ;;  %v5059_v61 = vmul.f32 -1.442695, %v4417_v20  ;;  %v5063_v33 = vmul.f32 -1.442695, %v4421_v10  ;;  %v5060_v30 = vmul.f32 -1.442695, %v4418_v23 }
0x12b9   :  { %v4423_v55 = vadd.f32 %v4407_v58, %v4281_v31  ;;  %5751 = vpow2.f32 %v5058_v17  ;;  %v5064_v50 = vmul.f32 -1.442695, %v4422_v37 }
0x12ba   :  { %4488 = vrot.lane.b32.xlu0 %v4420_v27, %s5879_s0  ;;  %5753 = vpow2.f32 %v5059_v61  ;;  %v5061_v35 = vmul.f32 -1.442695, %v4419_v5 }
0x12bb   :  { %5755 = vpow2.f32 %v5062_v8  ;;  %v5065_v45 = vmul.f32 -1.442695, %v4423_v55 }
0x12bc   :  { %4490 = vrot.lane.b32.xlu1 %v4421_v10, %s5879_s0  ;;  %5757 = vpow2.f32 %v5063_v33 }
0x12bd   :  { %5759 = vpow2.f32 %v5060_v30 }
0x12be   :  { %4484 = vrot.lane.b32.xlu0 %v4418_v23, %s5879_s0  ;;  %5761 = vpow2.f32 %v5061_v35 }
0x12bf   :  { %5763 = vpow2.f32 %v5064_v50 }
0x12c0   :  { %4486 = vrot.lane.b32.xlu1 %v4419_v5, %s5879_s0  ;;  %5765 = vpow2.f32 %v5065_v45 }
0x12c2   :  { %4492 = vrot.lane.b32.xlu0 %v4422_v37, %s5879_s0 }
0x12c4   :  { %4494 = vrot.lane.b32.xlu1 %v4423_v55, %s5879_s0 }
0x12c6   :  { %4262 = vrot.lane.b32.xlu0 %v4261_v28, %s5879_s0  ;;  %v5752_v28 = vpop.eup %5751 }
0x12c7   :  { %v5754_v29 = vpop.eup %5753  ;;  %v4448_v36 = vadd.f32 1.0, %v5752_v28 }
0x12c8   :  { %v5756_v14 = vpop.eup %5755  ;;  %v4449_v26 = vadd.f32 1.0, %v5754_v29 }
0x12c9   :  { %v5758_v3 = vpop.eup %5757  ;;  %v4452_v1 = vadd.f32 1.0, %v5756_v14 }
0x12ca   :  { %v5760_v13 = vpop.eup %5759  ;;  %v4453_v44 = vadd.f32 1.0, %v5758_v3 }
0x12cb   :  { %v5762_v25 = vpop.eup %5761  ;;  %v4450_v52 = vadd.f32 1.0, %v5760_v13 }
0x12cc   :  { %v5764_v53 = vpop.eup %5763  ;;  %v4451_v27 = vadd.f32 1.0, %v5762_v25 }
0x12cd   :  { %v5766_v43 = vpop.eup %5765  ;;  %v4454_v57 = vadd.f32 1.0, %v5764_v53 }
0x12ce   :  { %v4455_v31 = vadd.f32 1.0, %v5766_v43 }
0x1328   :  { %v4481_v41 = vpop.permute.xlu0 %4480 }
0x1329   :  { %v4496_v48 = vrot.slane %v4481_v41, 1 }
0x132a   :  { %v4483_v56 = vpop.permute.xlu1 %4482 }
0x132b   :  { %v4497_v19 = vrot.slane %v4483_v56, 1  ;;  %5767 = vtanh.f32 %v4496_v48 }
0x132c   :  { %v4489_v18 = vpop.permute.xlu0 %4488  ;;  %5769 = vrcp.f32 %v4448_v36 }
0x132d   :  { %v4500_v34 = vrot.slane %v4489_v18, 1  ;;  %5771 = vtanh.f32 %v4497_v19 }
0x132e   :  { %v4491_v54 = vpop.permute.xlu1 %4490  ;;  %5773 = vrcp.f32 %v4449_v26 }
0x132f   :  { %v4501_v32 = vrot.slane %v4491_v54, 1  ;;  %5775 = vtanh.f32 %v4500_v34 }
0x1330   :  { %v7097_v12 = vpop.permute.xlu0 %4484  ;;  %5777 = vrcp.f32 %v4452_v1 }
0x1331   :  { %v4498_v62 = vrot.slane %v7097_v12, 1  ;;  %5779 = vtanh.f32 %v4501_v32 }
0x1332   :  { %v4487_v39 = vpop.permute.xlu1 %4486  ;;  %5781 = vrcp.f32 %v4453_v44 }
0x1333   :  { %v4499_v51 = vrot.slane %v4487_v39, 1  ;;  %5783 = vtanh.f32 %v4498_v62 }
0x1334   :  { %v7099_v46 = vpop.permute.xlu0 %4492  ;;  %5785 = vrcp.f32 %v4450_v52 }
0x1335   :  { %v4502_v60 = vrot.slane %v7099_v46, 1  ;;  %v5768_v7 = vpop.eup %5767  ;;  %5787 = vtanh.f32 %v4499_v51 }
0x1336   :  { %v4495_v63 = vpop.permute.xlu1 %4494  ;;  %v7118_v58 = vpop.eup %5769  ;;  %5789 = vrcp.f32 %v4451_v27 }
0x1337   :  { %v4503_v5 = vrot.slane %v4495_v63, 1  ;;  %v5772_v37 = vpop.eup %5771  ;;  %5791 = vtanh.f32 %v4502_v60  ;;  %v4602_v41 = vmul.f32 %v7118_v58, %v5768_v7 }
0x1338   :  { %v4263_v24 = vpop.permute.xlu0 %4262  ;;  %v7121_v55 = vpop.eup %5773  ;;  %5793 = vrcp.f32 %v4454_v57 }
0x1339   :  { %v4265_v6 = vsel %vm4145_vm2, %v4263_v24, %v6967_v21  ;;  %v5776_v17 = vpop.eup %5775  ;;  %5795 = vtanh.f32 %v4503_v5  ;;  %v4603_v61 = vmul.f32 %v7121_v55, %v5772_v37 }
0x133a   :  { %v4521_v49 = vcombine.high %v4265_v6, %v4265_v6  ;;  %v4528_v47 = vrot.slane %v4265_v6, %v6110_v2  ;;  %v7125_v18 = vpop.eup %5777  ;;  %5797 = vrcp.f32 %v4455_v31 }
0x133b   :  { %v5780_v8 = vpop.eup %5779  ;;  %v4606_v33 = vmul.f32 %v7125_v18, %v5776_v17  ;;  %v4787_v17 = vld [vmem:[#allocation5] sm:$0xff] }
0x133c   :  { %v4536_v59 = vcombine.high %v4528_v47, %v4528_v47  ;;  %v4544_v22 = vrot.slane %v4528_v47, %v6110_v2  ;;  %v4535_v11 = vrot.slane %v4521_v49, %v6110_v2  ;;  %v7129_v12 = vpop.eup %5781 }
0x133d   :  { %v5784_v30 = vpop.eup %5783  ;;  %v4607_v46 = vmul.f32 %v7129_v12, %v5780_v8  ;;  %v4789_v8 = vld [vmem:[#allocation5 + $0x10] sm:$0xff] }
0x133e   :  { %v4558_v21 = vrot.slane %v4536_v59, %v6110_v2  ;;  %4570 = vrot.lane.b32.xlu1 %v4544_v22, %s5879_s0  ;;  %v4566_v40 = vcombine.high %v4544_v22, %v4544_v22  ;;  %v4537_v4 = vcombine.high %v4535_v11, %v4535_v11  ;;  %v4551_v20 = vrot.slane %v4535_v11, %v6110_v2  ;;  %v7133_v56 = vpop.eup %5785 }
0x133f   :  { %v5788_v35 = vpop.eup %5787  ;;  %v4604_v24 = vmul.f32 %v7133_v56, %v5784_v30 }
0x1340   :  { %4572 = vrot.lane.b32.xlu0 %v4558_v21, %s5879_s0  ;;  %v4568_v16 = vcombine.high %v4558_v21, %v4558_v21  ;;  %v4565_v10 = vrot.slane %v4537_v4, %v6110_v2  ;;  %v4567_v23 = vcombine.high %v4551_v20, %v4551_v20  ;;  %v7137_v50 = vpop.eup %5789 }
0x1341   :  { %v5792_v28 = vpop.eup %5791  ;;  %v4605_v45 = vmul.f32 %v7137_v50, %v5788_v35 }
0x1342   :  { %4574 = vrot.lane.b32.xlu1 %v4566_v40, %s5879_s0  ;;  %v4569_v42 = vcombine.high %v4565_v10, %v4565_v10  ;;  %v7141_v6 = vpop.eup %5793 }
0x1343   :  { %v5796_v54 = vpop.eup %5795  ;;  %v4608_v49 = vmul.f32 %v7141_v6, %v5792_v28 }
0x1344   :  { %4576 = vrot.lane.b32.xlu0 %v4568_v16, %s5879_s0  ;;  %v7147_v47 = vpop.eup %5797 }
0x1345   :  { %v4609_v29 = vmul.f32 %v7147_v47, %v5796_v54  ;;  %v4791_v54 = vld [vmem:[#allocation5 + $0x20] sm:$0xff] }
0x1346   :  { %4578 = vrot.lane.b32.xlu1 %v4551_v20, %s5879_s0 }
0x1348   :  { %4580 = vrot.lane.b32.xlu0 %v4565_v10, %s5879_s0 }
0x134a   :  { %4582 = vrot.lane.b32.xlu1 %v4567_v23, %s5879_s0 }
0x134c   :  { %4584 = vrot.lane.b32.xlu0 %v4569_v42, %s5879_s0 }
0x134e   :  { %4618 = vrot.lane.b32.xlu1 %v4602_v41, %s5879_s0 }
0x1350   :  { %4620 = vrot.lane.b32.xlu0 %v4603_v61, %s5879_s0  ;;  %v4788_v61 = vld [vmem:[#allocation5 + $0x8] sm:$0xff] }
0x1351   :  { %v5265_v30 = vpack.c.bf16 %v4788_v61, %v4787_v17 }
0x1352   :  { %4626 = vrot.lane.b32.xlu1 %v4606_v33, %s5879_s0  ;;  %v5881_v33 = vmov 0.0|0.0  }
0x1353   :  { %5264 = vmatprep.subr.bf16.mxu0 %v5881_v33  ;;  %5276 = vmatprep.subr.bf16.mxu1 %v5881_v33 }
0x1354   :  { %4628 = vrot.lane.b32.xlu0 %v4607_v46, %s5879_s0  ;;  %v4790_v46 = vld [vmem:[#allocation5 + $0x18] sm:$0xff]  ;;  %5266 = vmatpush3.bf16.msra.mxu0 %v5265_v30 }
0x1355   :  { %5267 = vmatprep.subr.bf16.mxu0 %v5881_v33 }
0x1356   :  { %4622 = vrot.lane.b32.xlu1 %v4604_v24, %s5879_s0  ;;  %v5268_v24 = vpack.c.bf16 %v4790_v46, %v4789_v8  ;;  %v4884_v8 = vld [vmem:[%s7232_s7 + $0x30] sm:$0xff] }
0x1358   :  { %4624 = vrot.lane.b32.xlu0 %v4605_v45, %s5879_s0  ;;  %v4723_v45 = vsel %vm4722_vm3, 1, %v5880_v15  ;;  %5269 = vmatpush3.bf16.msra.mxu0 %v5268_v24  ;;  %v4879_v15 = vld [vmem:[%s7232_s7 + $0x8] sm:$0xff] }
0x1359   :  { %5270 = vmatprep.subr.bf16.mxu0 %v5881_v33 }
0x135a   :  { %4630 = vrot.lane.b32.xlu1 %v4608_v49, %s5879_s0  ;;  %v4792_v49 = vld [vmem:[#allocation5 + $0x28] sm:$0xff] }
0x135b   :  { %v5271_v9 = vpack.c.bf16 %v4792_v49, %v4791_v54 }
0x135c   :  { %4632 = vrot.lane.b32.xlu0 %v4609_v29, %s5879_s0  ;;  %v4793_v29 = vld [vmem:[#allocation5 + $0x30] sm:$0xff] }
0x135d   :  { %5272 = vmatpush3.bf16.msra.mxu0 %v5271_v9 }
0x135e   :  { %5273 = vmatprep.subr.bf16.mxu0 %v5881_v33 }
0x13b0   :  { %v4571_v48 = vpop.permute.xlu1 %4570 }
0x13b1   :  { %v4594_v21 = vmul.f32 %v7118_v58, %v4571_v48  ;;  %v4794_v48 = vld [vmem:[#allocation5 + $0x38] sm:$0xff] }
0x13b2   :  { %v4573_v36 = vpop.permute.xlu0 %4572 }
0x13b3   :  { %v4595_v34 = vmul.f32 %v7121_v55, %v4573_v36  ;;  %v4878_v36 = vld [vmem:[%s7232_s7] sm:$0xff] }
0x13b4   :  { %v4575_v59 = vpop.permute.xlu1 %4574 }
0x13b5   :  { %v4596_v25 = vmul.f32 %v7133_v56, %v4575_v59  ;;  %v4880_v59 = vld [vmem:[%s7232_s7 + $0x10] sm:$0xff] }
0x13b6   :  { %v4577_v22 = vpop.permute.xlu0 %4576 }
0x13b7   :  { %v4597_v20 = vmul.f32 %v7137_v50, %v4577_v22  ;;  %v5277_v22 = vpack.c.bf16 %v4879_v15, %v4878_v36 }
0x13b8   :  { %v4579_v14 = vpop.permute.xlu1 %4578 }
0x13b9   :  { %v4598_v40 = vmul.f32 %v7125_v18, %v4579_v14  ;;  %v4881_v14 = vld [vmem:[%s7232_s7 + $0x18] sm:$0xff]  ;;  %5278 = vmatpush3.bf16.msra.mxu1 %v5277_v22 }
0x13ba   :  { %v4581_v19 = vpop.permute.xlu0 %4580  ;;  %5279 = vmatprep.subr.bf16.mxu1 %v5881_v33 }
0x13bb   :  { %v4599_v44 = vmul.f32 %v7129_v12, %v4581_v19  ;;  %v5274_v19 = vpack.c.bf16 %v4794_v48, %v4793_v29 }
0x13bc   :  { %v4583_v26 = vpop.permute.xlu1 %4582 }
0x13bd   :  { %v4600_v27 = vmul.f32 %v7141_v6, %v4583_v26  ;;  %v5280_v26 = vpack.c.bf16 %v4881_v14, %v4880_v59  ;;  %5275 = vmatpush3.bf16.msra.mxu0 %v5274_v19 }
0x13be   :  { %v4585_v11 = vpop.permute.xlu0 %4584 }
0x13bf   :  { %v4601_v43 = vmul.f32 %v7147_v47, %v4585_v11  ;;  %v4882_v11 = vld [vmem:[%s7232_s7 + $0x20] sm:$0xff]  ;;  %5281 = vmatpush3.bf16.msra.mxu1 %v5280_v26 }
0x13c0   :  { %v4619_v3 = vpop.permute.xlu1 %4618  ;;  %5282 = vmatprep.subr.bf16.mxu1 %v5881_v33 }
0x13c1   :  { %v4642_v1 = vadd.f32 %v4619_v3, %v4594_v21  ;;  %v4883_v21 = vld [vmem:[%s7232_s7 + $0x28] sm:$0xff] }
0x13c2   :  { %v4621_v39 = vpop.permute.xlu0 %4620  ;;  %v5283_v0 = vpack.c.bf16 %v4883_v21, %v4882_v11 }
0x13c3   :  { %5799 = vtanh.f32 %v4642_v1  ;;  %v4643_v13 = vadd.f32 %v4621_v39, %v4595_v34 }
0x13c4   :  { %v4627_v32 = vpop.permute.xlu1 %4626  ;;  %5284 = vmatpush3.bf16.msra.mxu1 %v5283_v0 }
0x13c5   :  { %5801 = vtanh.f32 %v4643_v13  ;;  %v4646_v4 = vadd.f32 %v4627_v32, %v4598_v40  ;;  %5285 = vmatprep.subr.bf16.mxu1 %v5881_v33  ;;  %v4671_v13 = vrot.slane %v7129_v12, 1  ;;  %v4669_v32 = vrot.slane %v7137_v50, 1  ;;  %v4885_v33 = vld [vmem:[%s7232_s7 + $0x38] sm:$0xff] }
0x13c6   :  { %v4629_v16 = vpop.permute.xlu0 %4628  ;;  %v4673_v12 = vrot.slane %v7147_v47, 1  ;;  %v5286_v30 = vpack.c.bf16 %v4885_v33, %v4884_v8 }
0x13c7   :  { %5803 = vtanh.f32 %v4646_v4  ;;  %v4647_v62 = vadd.f32 %v4629_v16, %v4599_v44  ;;  %v4667_v44 = vrot.slane %v7121_v55, 1  ;;  %v4670_v16 = vrot.slane %v7125_v18, 1 }
0x13c8   :  { %v4623_v52 = vpop.permute.xlu1 %4622  ;;  %5287 = vmatpush3.bf16.msra.mxu1 %v5286_v30 }
0x13c9   :  { %5805 = vtanh.f32 %v4647_v62  ;;  %v4644_v53 = vadd.f32 %v4623_v52, %v4596_v25  ;;  %v4668_v62 = vrot.slane %v7133_v56, 1 }
0x13ca   :  { %v4625_v51 = vpop.permute.xlu0 %4624 }
0x13cb   :  { %5807 = vtanh.f32 %v4644_v53  ;;  %v4645_v63 = vadd.f32 %v4625_v51, %v4597_v20  ;;  %v4666_v20 = vrot.slane %v7118_v58, 1  ;;  %v4672_v53 = vrot.slane %v7141_v6, 1 }
0x13cc   :  { %v4631_v10 = vpop.permute.xlu1 %4630 }
0x13cd   :  { %v5800_v60 = vpop.eup %5799  ;;  %5809 = vtanh.f32 %v4645_v63  ;;  %v4648_v57 = vadd.f32 %v4631_v10, %v4600_v27 }
0x13ce   :  { %4690 = vrot.lane.b32.xlu1 %v5800_v60, %s5879_s0  ;;  %v4633_v23 = vpop.permute.xlu0 %4632 }
0x13cf   :  { %v5802_v7 = vpop.eup %5801  ;;  %5811 = vtanh.f32 %v4648_v57  ;;  %v4649_v5 = vadd.f32 %v4633_v23, %v4601_v43 }
0x13d0   :  { %4692 = vrot.lane.b32.xlu0 %v5802_v7, %s5879_s0 }
0x13d1   :  { %v5804_v42 = vpop.eup %5803  ;;  %5813 = vtanh.f32 %v4649_v5 }
0x13d2   :  { %4698 = vrot.lane.b32.xlu1 %v5804_v42, %s5879_s0 }
0x13d3   :  { %v5806_v37 = vpop.eup %5805 }
0x13d4   :  { %4700 = vrot.lane.b32.xlu0 %v5806_v37, %s5879_s0 }
0x13d5   :  { %v5808_v31 = vpop.eup %5807 }
0x13d6   :  { %4694 = vrot.lane.b32.xlu1 %v5808_v31, %s5879_s0 }
0x13d7   :  { %v5810_v41 = vpop.eup %5809 }
0x13d8   :  { %4696 = vrot.lane.b32.xlu0 %v5810_v41, %s5879_s0 }
0x13d9   :  { %v5812_v35 = vpop.eup %5811 }
0x13da   :  { %4702 = vrot.lane.b32.xlu1 %v5812_v35, %s5879_s0 }
0x13db   :  { %v5814_v28 = vpop.eup %5813 }
0x13dc   :  { %4704 = vrot.lane.b32.xlu0 %v5814_v28, %s5879_s0 }
0x13de   :  { %4725 = vperm.xlu1 %5302, %v4723_v45   ;;  %v5068_v45 = vld [vmem:[%s7233_s8] ss:$0 sm:$0xff] }
0x1440   :  { %v4691_v3 = vpop.permute.xlu1 %4690 }
0x1441   :  { %v4714_v50 = vmul.f32 %v4691_v3, %v4666_v20 }
0x1442   :  { %v4693_v34 = vpop.permute.xlu0 %4692 }
0x1443   :  { %v4715_v27 = vmul.f32 %v4693_v34, %v4667_v44 }
0x1444   :  { %v4699_v1 = vpop.permute.xlu1 %4698 }
0x1445   :  { %v4718_v63 = vmul.f32 %v4699_v1, %v4670_v16  ;;  %v4736_v23 = vcombine.low %v4714_v50, %v4715_v27 }
0x1446   :  { %v4701_v39 = vpop.permute.xlu0 %4700 }
0x1447   :  { %v4719_v25 = vmul.f32 %v4701_v39, %v4671_v13  ;;  %v4746_v5 = vrot.slane %v4736_v23, %v6110_v2 }
0x1448   :  { %v4695_v40 = vpop.permute.xlu1 %4694 }
0x1449   :  { %v4716_v10 = vmul.f32 %v4695_v40, %v4668_v62  ;;  %v4738_v55 = vcombine.low %v4718_v63, %v4719_v25 }
0x144a   :  { %v4697_v4 = vpop.permute.xlu0 %4696 }
0x144b   :  { %v4717_v52 = vmul.f32 %v4697_v4, %v4669_v32  ;;  %v4760_v56 = vrot.slane %v4738_v55, %v6110_v2 }
0x144c   :  { %v4703_v51 = vpop.permute.xlu1 %4702 }
0x144d   :  { %v4737_v43 = vcombine.low %v4716_v10, %v4717_v52  ;;  %v4720_v57 = vmul.f32 %v4703_v51, %v4672_v53 }
0x144e   :  { %v4705_v60 = vpop.permute.xlu0 %4704 }
0x144f   :  { %v4721_v18 = vmul.f32 %v4705_v60, %v4673_v12  ;;  %v4753_v58 = vrot.slane %v4737_v43, %v6110_v2 }
0x1451   :  { %v4739_v7 = vcombine.low %v4720_v57, %v4721_v18  ;;  %v4768_v37 = vcombine.low %v4746_v5, %v4753_v58 }
0x1453   :  { %v4767_v6 = vrot.slane %v4739_v7, %v6110_v2  ;;  %v4776_v31 = vrot.slane %v4768_v37, %v6110_v2 }
0x1455   :  { %v4769_v42 = vcombine.low %v4760_v56, %v4767_v6 }
0x1457   :  { %v4783_v47 = vrot.slane %v4769_v42, %v6110_v2  ;;  %v5066_v2 = vld [vmem:[%s7231_s6] ss:$0 sm:$0xff] }
0x1459   :  { %v4784_v17 = vcombine.low %v4776_v31, %v4783_v47 }
0x145d   :  { %v4726_v41 = vpop.permute.xlu1 %4725 }
0x145e   :  { %vm4727_vm6 = vcmp.eq.s32.totalorder %v4726_v41, 1 }
0x145f   :  { %v4786_v61 = vsel %vm4727_vm6, %v4784_v17, %v7075_v38 }
0x1460   :  { %5105 = vmatmul.mubr.msk.f32.vlgmr.msra.gmra.mrb[22].mxu0 %vm281_vm5, %v4786_v61 }
0x1533   :  { %v4871_v46 = vpop.f32.mrb[22].mxu0 }
0x1534   :  { %v4872_v35 = vadd.f32 %v5066_v2, %v4871_v46  ;;  %v5106_v24 = vpop.f32.mrb[23].mxu0 }
0x1536   :  { %vm4875_vm7 = vcmp.gt.f32.partialorder %v4872_v35, 0.0  ;;  %v4876_v38 = vmul.f32 0.01, %v4872_v35 }
0x1538   :  { %v4877_v28 = vsel %vm4875_vm7, %v4872_v35, %v4876_v38 }
0x1539   :  { %5124 = vmatmul.mubr.msk.f32.vlgmr.msra.gmra.mrb[10].mxu1 %vm281_vm5, %v4877_v28 }
0x160c   :  { %v4962_v54 = vpop.f32.mrb[10].mxu1 }
0x160d   :  { %v4963_v49 = vadd.f32 %v5068_v45, %v4962_v54  ;;  %v5125_v9 = vpop.f32.mrb[11].mxu1 }
0x160f   :  { %v4967_v29 = vsel %vm4966_vm8, %v4963_v49, -inf }
0x1610   :  { %4968 = vmax.xlane.f32.xlu0 %v4967_v29 }
0x169d   :  { %v4969_v48 = vpop.xlane.xlu0 %4968 }
0x169e   :  { %v4970_v36 = vsub.f32 %v4963_v49, %v4969_v48 }
0x16a0   :  { %v4971_v15 = vmul.f32 1.442695, %v4970_v36 }
0x16a2   :  { %5815 = vpow2.f32 %v4971_v15 }
0x16ac   :  { %v5816_v59 = vpop.eup %5815 }
0x16ad   :  { %v4973_v22 = vsel %vm4966_vm8, %v5816_v59, 0.0 }
0x16ae   :  { %4974 = vadd.xlane.f32.xlu1 %v4973_v22 }
0x173b   :  { %v4975_v14 = vpop.xlane.xlu1 %4974 }
0x173c   :  { %5817 = vrcp.f32 %v4975_v14 }
0x1746   :  { %v5818_v19 = vpop.eup %5817 }
0x1747   :  { %v4977_v26 = vmul.f32 %v5818_v19, %v5816_v59 }
0x1749   :  { %4978 = vst.msk [vmem:[%s7234_s9] sm:$0xff] %vm4966_vm8, %v4977_v26 }
0x174a   :  { %4983 = vsyncpa [#allocation4], 1 }
0x174b   :  { %4984 = vsyncpa [#allocation6], 1 }

</bundles_post_ra>
